<compile_context>
chip_gen: v6e
topology: v6e:2x2x1
jax: 0.10.0
libtpu: 0.0.40
codegen_flags: <defaults>
</compile_context>

<pallas_src>
import jax
import jax.numpy as jnp
from jax.experimental import pallas as pl
from jax.experimental.pallas import tpu as pltpu

HIDDEN = 256
IN_PAD = 8          # 7 raw features zero-padded to 8 (sublane aligned)
TB = 512            # batch tile (lanes of every matmul; multiple of 256)

# use_x1 = [t_ph2, t_ph5, hi_p, t_ph1, lo_p, aim_hi] = these raw columns
_USE_X1_COLS = (4, 6, 2, 5, 1, 3)


def _pid_kernel(x_ref, w1_ref, b1_ref, w2a_ref, b2a_ref, w2b_ref, b2b_ref,
                w3_ref, b3_ref, out_ref):
    # ---- in-kernel preprocessing: per-feature clip (VPU filler) ----------
    x = x_ref[...]                                           # (IN_PAD, TB) f32
    row = jax.lax.broadcasted_iota(jnp.int32, x.shape, 0)    # feature index
    lo = jnp.where(row >= 4, -100.0, 0.0)
    hi = jnp.where(row == 0, 8000.0,
         jnp.where(row == 1, 1100.0,
         jnp.where((row == 2) | (row == 3), 2400.0,
         jnp.where(row == 4, 200.0, 100.0))))
    xc = jnp.clip(x, lo, hi)                                 # clipped raw feats
    last_ac = xc[0:1, :]                                     # (1, TB) f32 (kept f32)

    # ---- fused L1 of both branches (feature select / diffs folded in w1) --
    z1 = jnp.dot(w1_ref[...], xc.astype(jnp.bfloat16),
                 preferred_element_type=jnp.float32) + b1_ref[...]
    h1 = jnp.tanh(z1).astype(jnp.bfloat16)                   # (512, TB)

    # ---- L2: block-diagonal, one (256,256)@(256,TB) dot per branch --------
    z2a = jnp.dot(w2a_ref[...], h1[:HIDDEN, :],
                  preferred_element_type=jnp.float32) + b2a_ref[...]
    z2b = jnp.dot(w2b_ref[...], h1[HIDDEN:, :],
                  preferred_element_type=jnp.float32) + b2b_ref[...]
    h2a = jnp.tanh(z2a).astype(jnp.bfloat16)                 # (256, TB)
    h2b = jnp.tanh(z2b).astype(jnp.bfloat16)                 # (256, TB)

    # ---- L3: split-K accumulated dots (no concat copy), lane-dense row ----
    part = (jnp.dot(w3_ref[0:1, :], h2a, preferred_element_type=jnp.float32)
            + jnp.dot(w3_ref[1:2, :], h2b, preferred_element_type=jnp.float32)
            + b3_ref[...])                                   # (1, TB) f32

    # ac_pid_out_hp = clamp(last + Part1 + Part2, min=800)
    out_ref[...] = jnp.maximum(last_ac + part, 800.0).reshape(out_ref.shape)


def _xavier_uniform(key, fan_in, fan_out):
    limit = (6.0 / (fan_in + fan_out)) ** 0.5
    return jax.random.uniform(key, (fan_in, fan_out), jnp.float32,
                              minval=-limit, maxval=limit)


def init_params(key):
    """Raw params in (in_features, out_features) layout.

    Weights: xavier-uniform (matches torch init). Biases: small random values
    instead of torch's zeros so the kernel's bias-add path is actually tested.
    """
    wk = jax.random.split(key, 6)
    bk = jax.random.split(jax.random.fold_in(key, 1), 6)
    rb = lambda k, n: 0.01 * jax.random.normal(k, (n,), jnp.float32)
    return dict(
        # MLP3: 6 -> 256 -> 256 -> 1
        w1a=_xavier_uniform(wk[0], 6, HIDDEN), b1a=rb(bk[0], HIDDEN),
        w2a=_xavier_uniform(wk[1], HIDDEN, HIDDEN), b2a=rb(bk[1], HIDDEN),
        w3a=_xavier_uniform(wk[2], HIDDEN, 1), b3a=rb(bk[2], 1),
        # MLP4: 2 -> 256 -> 256 -> 1
        w1b=_xavier_uniform(wk[3], 2, HIDDEN), b1b=rb(bk[3], HIDDEN),
        w2b=_xavier_uniform(wk[4], HIDDEN, HIDDEN), b2b=rb(bk[4], HIDDEN),
        w3b=_xavier_uniform(wk[5], HIDDEN, 1), b3b=rb(bk[5], 1),
    )


def pack_params(p):
    """Feature-major (out, in) bf16 weights with the column permutation and
    the +/- differences folded into the fused first-layer weight."""
    # MLP3 L1: use_x1[j] == clipped raw column _USE_X1_COLS[j]
    w1a_fm = jnp.zeros((HIDDEN, IN_PAD), jnp.float32)
    for j, src in enumerate(_USE_X1_COLS):
        w1a_fm = w1a_fm.at[:, src].set(p["w1a"][j, :])
    # MLP4 L1: use_x2 = [col4 - col5, col3 - col2] of the clipped raw columns
    w1b_fm = jnp.zeros((HIDDEN, IN_PAD), jnp.float32)
    w1b_fm = w1b_fm.at[:, 4].add(p["w1b"][0, :])
    w1b_fm = w1b_fm.at[:, 5].add(-p["w1b"][0, :])
    w1b_fm = w1b_fm.at[:, 3].add(p["w1b"][1, :])
    w1b_fm = w1b_fm.at[:, 2].add(-p["w1b"][1, :])

    w1 = jnp.concatenate([w1a_fm, w1b_fm], axis=0).astype(jnp.bfloat16)  # (512, 8)
    b1 = jnp.concatenate([p["b1a"], p["b1b"]])[:, None]                  # (512, 1) f32

    w3 = jnp.stack([p["w3a"][:, 0], p["w3b"][:, 0]]).astype(jnp.bfloat16)  # (2, 256)
    b3 = (p["b3a"] + p["b3b"]).reshape(1, 1)                               # (1, 1) f32

    return dict(
        w1=w1, b1=b1,
        w2a=p["w2a"].T.astype(jnp.bfloat16), b2a=p["b2a"][:, None],
        w2b=p["w2b"].T.astype(jnp.bfloat16), b2b=p["b2b"][:, None],
        w3=w3, b3=b3)


@jax.jit
def my_model_forward(x1, packed):
    """Reproduces MyModel.forward: x1 is any shape with trailing dim 7."""
    x = x1.reshape(-1, 7).astype(jnp.float32)
    b = x.shape[0]
    n_tiles = pl.cdiv(b, TB)
    b_pad = n_tiles * TB

    # Feature-major, zero-padded input: (IN_PAD, b_pad). The transpose is a
    # tiny wrapper-side XLA op (B*32 bytes) that buys lane-dense kernel I/O.
    xt = jnp.pad(x.T, ((0, IN_PAD - 7), (0, b_pad - b)))

    def full(shape):
        # grid-invariant operand: constant index_map -> stays VMEM-resident.
        return pl.BlockSpec(shape, lambda i: (0, 0))

    out = pl.pallas_call(
        _pid_kernel,
        out_shape=jax.ShapeDtypeStruct((n_tiles, 1, TB), jnp.float32),
        grid_spec=pltpu.PrefetchScalarGridSpec(
            num_scalar_prefetch=0,
            grid=(n_tiles,),
            in_specs=[
                pl.BlockSpec((IN_PAD, TB), lambda i: (0, i)),   # raw input^T
                full((2 * HIDDEN, IN_PAD)), full((2 * HIDDEN, 1)),   # fused L1
                full((HIDDEN, HIDDEN)),     full((HIDDEN, 1)),       # MLP3 L2
                full((HIDDEN, HIDDEN)),     full((HIDDEN, 1)),       # MLP4 L2
                full((2, HIDDEN)),          full((1, 1)),            # fused L3
            ],
            out_specs=pl.BlockSpec((1, 1, TB), lambda i: (i, 0, 0)),
        ),
        compiler_params=pltpu.CompilerParams(
            dimension_semantics=("parallel",)),
    )(xt, packed["w1"], packed["b1"],
      packed["w2a"], packed["b2a"], packed["w2b"], packed["b2b"],
      packed["w3"], packed["b3"])

    # lane-dense (n_tiles, 1, TB) -> (b, 1), drop batch padding
    return out.reshape(-1)[:b].reshape(b, 1)


def _reference_forward(x1, p):
    """Pure-JAX f32 reference on the RAW (unfused, untransposed) parameters."""
    x = x1.reshape(-1, 7).astype(jnp.float32)
    last_ac = jnp.clip(x[:, 0], 0.0, 8000.0)
    lo_p    = jnp.clip(x[:, 1], 0.0, 1100.0)
    hi_p    = jnp.clip(x[:, 2], 0.0, 2400.0)
    aim_hi  = jnp.clip(x[:, 3], 0.0, 2400.0)
    t_ph2   = jnp.clip(x[:, 4], -100.0, 200.0)
    t_ph1   = jnp.clip(x[:, 5], -100.0, 100.0)
    t_ph5   = jnp.clip(x[:, 6], -100.0, 100.0)
    use_x1 = jnp.stack([t_ph2, t_ph5, hi_p, t_ph1, lo_p, aim_hi], axis=1)
    use_x2 = jnp.stack([t_ph2 - t_ph1, aim_hi - hi_p], axis=1)

    def mlp(u, w1, b1, w2, b2, w3, b3):
        h = jnp.tanh(u @ w1 + b1)
        h = jnp.tanh(h @ w2 + b2)
        return h @ w3 + b3

    part1 = mlp(use_x1, p["w1a"], p["b1a"], p["w2a"], p["b2a"], p["w3a"], p["b3a"])
    part2 = mlp(use_x2, p["w1b"], p["b1b"], p["w2b"], p["b2b"], p["w3b"], p["b3b"])
    return jnp.maximum(last_ac[:, None] + part1 + part2, 800.0)


if __name__ == "__main__":
    key = jax.random.PRNGKey(0)
    pkey, xkey = jax.random.split(key)
    raw_params = init_params(pkey)
    packed_params = pack_params(raw_params)

    batch = 8
    # 7 input signals per row: [last_pid, lo_p, hi_p, aim_hi, t_ph2, t_ph1, t_ph5]
    base = jax.random.uniform(xkey, (batch, 7), jnp.float32)
    scale = jnp.array([8000.0, 1100.0, 2400.0, 2400.0, 300.0, 200.0, 200.0])
    shift = jnp.array([0.0, 0.0, 0.0, 0.0, -100.0, -100.0, -100.0])
    x1 = base * scale + shift

    out = my_model_forward(x1, packed_params)
    jax.block_until_ready(out)

    ref = _reference_forward(x1, raw_params)
    assert out.shape == (batch, 1), out.shape
    # bf16 matmuls (f32 accumulation): relaxed tolerance vs. the f32 reference.
    assert jnp.allclose(out, ref, rtol=2e-2, atol=2.0), (out, ref)
    print("KERNEL_OK")
</pallas_src>

<mosaic_0001>
module attributes {stable_mosaic.version = 11 : i64} {
  func.func @_pid_kernel(%arg0: i32, %arg1: memref<8x512xf32, #tpu.memory_space<vmem>>, %arg2: memref<512x8xbf16, #tpu.memory_space<vmem>>, %arg3: memref<512x1xf32, #tpu.memory_space<vmem>>, %arg4: memref<256x256xbf16, #tpu.memory_space<vmem>>, %arg5: memref<256x1xf32, #tpu.memory_space<vmem>>, %arg6: memref<256x256xbf16, #tpu.memory_space<vmem>>, %arg7: memref<256x1xf32, #tpu.memory_space<vmem>>, %arg8: memref<2x256xbf16, #tpu.memory_space<vmem>>, %arg9: memref<1x1xf32, #tpu.memory_space<vmem>>, %arg10: memref<1x1x512xf32, #tpu.memory_space<vmem>>) attributes {dimension_semantics = [#tpu.dimension_semantics<parallel>], iteration_bounds = array<i64: 1>, scalar_prefetch = 0 : i64, scratch_operands = 0 : i64, tpu.core_type = #tpu.core_type<tc>, window_params = [{transform_indices = @transform_0, window_bounds = array<i64: 8, 512>}, {pipeline_mode = #tpu.pipeline_mode<synchronous>, transform_indices = @transform_1, window_bounds = array<i64: 512, 8>}, {pipeline_mode = #tpu.pipeline_mode<synchronous>, transform_indices = @transform_2, window_bounds = array<i64: 512, 1>}, {pipeline_mode = #tpu.pipeline_mode<synchronous>, transform_indices = @transform_3, window_bounds = array<i64: 256, 256>}, {pipeline_mode = #tpu.pipeline_mode<synchronous>, transform_indices = @transform_4, window_bounds = array<i64: 256, 1>}, {pipeline_mode = #tpu.pipeline_mode<synchronous>, transform_indices = @transform_5, window_bounds = array<i64: 256, 256>}, {pipeline_mode = #tpu.pipeline_mode<synchronous>, transform_indices = @transform_6, window_bounds = array<i64: 256, 1>}, {pipeline_mode = #tpu.pipeline_mode<synchronous>, transform_indices = @transform_7, window_bounds = array<i64: 2, 256>}, {pipeline_mode = #tpu.pipeline_mode<synchronous>, transform_indices = @transform_8, window_bounds = array<i64: 1, 1>}, {transform_indices = @transform_9, window_bounds = array<i64: 1, 1, 512>}]} {
    %c0 = arith.constant 0 : index
    %c0_0 = arith.constant 0 : index
    %0 = vector.load %arg1[%c0, %c0_0] : memref<8x512xf32, #tpu.memory_space<vmem>>, vector<8x512xf32>
    %1 = tpu.iota {dimensions = array<i32: 0>} : vector<8x512xi32>
    %c4_i32 = arith.constant 4 : i32
    %2 = vector.broadcast %c4_i32 : i32 to vector<8x512xi32>
    %3 = arith.cmpi sge, %1, %2 : vector<8x512xi32>
    %cst = arith.constant -1.000000e+02 : f32
    %cst_1 = arith.constant 0.000000e+00 : f32
    %4 = vector.broadcast %cst : f32 to vector<8x512xf32>
    %5 = vector.broadcast %cst_1 : f32 to vector<8x512xf32>
    %6 = arith.select %3, %4, %5 : vector<8x512xi1>, vector<8x512xf32>
    %c0_i32 = arith.constant 0 : i32
    %7 = vector.broadcast %c0_i32 : i32 to vector<8x512xi32>
    %8 = arith.cmpi eq, %1, %7 : vector<8x512xi32>
    %c1_i32 = arith.constant 1 : i32
    %9 = vector.broadcast %c1_i32 : i32 to vector<8x512xi32>
    %10 = arith.cmpi eq, %1, %9 : vector<8x512xi32>
    %c2_i32 = arith.constant 2 : i32
    %11 = vector.broadcast %c2_i32 : i32 to vector<8x512xi32>
    %12 = arith.cmpi eq, %1, %11 : vector<8x512xi32>
    %c3_i32 = arith.constant 3 : i32
    %13 = vector.broadcast %c3_i32 : i32 to vector<8x512xi32>
    %14 = arith.cmpi eq, %1, %13 : vector<8x512xi32>
    %15 = arith.ori %12, %14 : vector<8x512xi1>
    %c4_i32_2 = arith.constant 4 : i32
    %16 = vector.broadcast %c4_i32_2 : i32 to vector<8x512xi32>
    %17 = arith.cmpi eq, %1, %16 : vector<8x512xi32>
    %cst_3 = arith.constant 2.000000e+02 : f32
    %cst_4 = arith.constant 1.000000e+02 : f32
    %18 = vector.broadcast %cst_3 : f32 to vector<8x512xf32>
    %19 = vector.broadcast %cst_4 : f32 to vector<8x512xf32>
    %20 = arith.select %17, %18, %19 : vector<8x512xi1>, vector<8x512xf32>
    %cst_5 = arith.constant 2.400000e+03 : f32
    %21 = vector.broadcast %cst_5 : f32 to vector<8x512xf32>
    %22 = arith.select %15, %21, %20 : vector<8x512xi1>, vector<8x512xf32>
    %cst_6 = arith.constant 1.100000e+03 : f32
    %23 = vector.broadcast %cst_6 : f32 to vector<8x512xf32>
    %24 = arith.select %10, %23, %22 : vector<8x512xi1>, vector<8x512xf32>
    %cst_7 = arith.constant 8.000000e+03 : f32
    %25 = vector.broadcast %cst_7 : f32 to vector<8x512xf32>
    %26 = arith.select %8, %25, %24 : vector<8x512xi1>, vector<8x512xf32>
    %27 = arith.maximumf %6, %0 : vector<8x512xf32>
    %28 = arith.minimumf %26, %27 : vector<8x512xf32>
    %29 = vector.extract_strided_slice %28 {offsets = [0, 0], sizes = [1, 512], strides = [1, 1]} : vector<8x512xf32> to vector<1x512xf32>
    %c0_8 = arith.constant 0 : index
    %c0_9 = arith.constant 0 : index
    %30 = vector.load %arg2[%c0_8, %c0_9] : memref<512x8xbf16, #tpu.memory_space<vmem>>, vector<512x8xbf16>
    %31 = arith.truncf %28 : vector<8x512xf32> to vector<8x512xbf16>
    %cst_10 = arith.constant dense<0.000000e+00> : vector<512x512xf32>
    %32 = tpu.matmul %30, %31, %cst_10 {dimension_numbers = #tpu.dot_dimension_numbers<[1], [0], [0], [1], [0, 0, 1, 1], [], []>} : vector<512x8xbf16>, vector<8x512xbf16>, vector<512x512xf32> -> vector<512x512xf32>
    %c0_11 = arith.constant 0 : index
    %c0_12 = arith.constant 0 : index
    %33 = vector.load %arg3[%c0_11, %c0_12] : memref<512x1xf32, #tpu.memory_space<vmem>>, vector<512x1xf32>
    %34 = vector.broadcast %33 : vector<512x1xf32> to vector<512x512xf32>
    %35 = arith.addf %32, %34 : vector<512x512xf32>
    %36 = math.tanh %35 : vector<512x512xf32>
    %37 = arith.truncf %36 : vector<512x512xf32> to vector<512x512xbf16>
    %c0_13 = arith.constant 0 : index
    %c0_14 = arith.constant 0 : index
    %38 = vector.load %arg4[%c0_13, %c0_14] : memref<256x256xbf16, #tpu.memory_space<vmem>>, vector<256x256xbf16>
    %39 = vector.extract_strided_slice %37 {offsets = [0, 0], sizes = [256, 512], strides = [1, 1]} : vector<512x512xbf16> to vector<256x512xbf16>
    %cst_15 = arith.constant dense<0.000000e+00> : vector<256x512xf32>
    %40 = tpu.matmul %38, %39, %cst_15 {dimension_numbers = #tpu.dot_dimension_numbers<[1], [0], [0], [1], [0, 0, 1, 1], [], []>} : vector<256x256xbf16>, vector<256x512xbf16>, vector<256x512xf32> -> vector<256x512xf32>
    %c0_16 = arith.constant 0 : index
    %c0_17 = arith.constant 0 : index
    %41 = vector.load %arg5[%c0_16, %c0_17] : memref<256x1xf32, #tpu.memory_space<vmem>>, vector<256x1xf32>
    %42 = vector.broadcast %41 : vector<256x1xf32> to vector<256x512xf32>
    %43 = arith.addf %40, %42 : vector<256x512xf32>
    %c0_18 = arith.constant 0 : index
    %c0_19 = arith.constant 0 : index
    %44 = vector.load %arg6[%c0_18, %c0_19] : memref<256x256xbf16, #tpu.memory_space<vmem>>, vector<256x256xbf16>
    %45 = vector.extract_strided_slice %37 {offsets = [256, 0], sizes = [256, 512], strides = [1, 1]} : vector<512x512xbf16> to vector<256x512xbf16>
    %cst_20 = arith.constant dense<0.000000e+00> : vector<256x512xf32>
    %46 = tpu.matmul %44, %45, %cst_20 {dimension_numbers = #tpu.dot_dimension_numbers<[1], [0], [0], [1], [0, 0, 1, 1], [], []>} : vector<256x256xbf16>, vector<256x512xbf16>, vector<256x512xf32> -> vector<256x512xf32>
    %c0_21 = arith.constant 0 : index
    %c0_22 = arith.constant 0 : index
    %47 = vector.load %arg7[%c0_21, %c0_22] : memref<256x1xf32, #tpu.memory_space<vmem>>, vector<256x1xf32>
    %48 = vector.broadcast %47 : vector<256x1xf32> to vector<256x512xf32>
    %49 = arith.addf %46, %48 : vector<256x512xf32>
    %50 = math.tanh %43 : vector<256x512xf32>
    %51 = arith.truncf %50 : vector<256x512xf32> to vector<256x512xbf16>
    %52 = math.tanh %49 : vector<256x512xf32>
    %53 = arith.truncf %52 : vector<256x512xf32> to vector<256x512xbf16>
    %c0_23 = arith.constant 0 : index
    %c0_24 = arith.constant 0 : index
    %54 = vector.load %arg8[%c0_23, %c0_24] : memref<2x256xbf16, #tpu.memory_space<vmem>>, vector<1x256xbf16>
    %cst_25 = arith.constant dense<0.000000e+00> : vector<1x512xf32>
    %55 = tpu.matmul %54, %51, %cst_25 {dimension_numbers = #tpu.dot_dimension_numbers<[1], [0], [0], [1], [0, 0, 1, 1], [], []>} : vector<1x256xbf16>, vector<256x512xbf16>, vector<1x512xf32> -> vector<1x512xf32>
    %c1 = arith.constant 1 : index
    %c0_26 = arith.constant 0 : index
    %56 = vector.load %arg8[%c1, %c0_26] : memref<2x256xbf16, #tpu.memory_space<vmem>>, vector<1x256xbf16>
    %cst_27 = arith.constant dense<0.000000e+00> : vector<1x512xf32>
    %57 = tpu.matmul %56, %53, %cst_27 {dimension_numbers = #tpu.dot_dimension_numbers<[1], [0], [0], [1], [0, 0, 1, 1], [], []>} : vector<1x256xbf16>, vector<256x512xbf16>, vector<1x512xf32> -> vector<1x512xf32>
    %58 = arith.addf %55, %57 : vector<1x512xf32>
    %c0_28 = arith.constant 0 : index
    %c0_29 = arith.constant 0 : index
    %59 = vector.load %arg9[%c0_28, %c0_29] : memref<1x1xf32, #tpu.memory_space<vmem>>, vector<1x1xf32>
    %60 = vector.broadcast %59 : vector<1x1xf32> to vector<1x512xf32>
    %61 = arith.addf %58, %60 : vector<1x512xf32>
    %62 = arith.addf %29, %61 : vector<1x512xf32>
    %cst_30 = arith.constant 8.000000e+02 : f32
    %63 = vector.broadcast %cst_30 : f32 to vector<1x512xf32>
    %64 = arith.maximumf %62, %63 : vector<1x512xf32>
    %65 = vector.shape_cast %64 : vector<1x512xf32> to vector<1x1x512xf32>
    %c0_31 = arith.constant 0 : index
    %c0_32 = arith.constant 0 : index
    %c0_33 = arith.constant 0 : index
    %66 = vector.load %arg10[%c0_31, %c0_32, %c0_33] : memref<1x1x512xf32, #tpu.memory_space<vmem>>, vector<1x1x512xf32>
    tpu.vector_store %arg10[%c0_31, %c0_32, %c0_33], %65 {strides = array<i32>} : memref<1x1x512xf32, #tpu.memory_space<vmem>>, vector<1x1x512xf32>,
    return
  }
  func.func @transform_0(%arg0: i32) -> (i32, i32) {
    %c0_i32 = arith.constant 0 : i32
    %c0_i32_0 = arith.constant 0 : i32
    return %c0_i32, %arg0 : i32, i32
  }
  func.func @transform_1(%arg0: i32) -> (i32, i32) {
    %c0_i32 = arith.constant 0 : i32
    %c0_i32_0 = arith.constant 0 : i32
    %c0_i32_1 = arith.constant 0 : i32
    return %c0_i32, %c0_i32_0 : i32, i32
  }
  func.func @transform_2(%arg0: i32) -> (i32, i32) {
    %c0_i32 = arith.constant 0 : i32
    %c0_i32_0 = arith.constant 0 : i32
    %c0_i32_1 = arith.constant 0 : i32
    return %c0_i32, %c0_i32_0 : i32, i32
  }
  func.func @transform_3(%arg0: i32) -> (i32, i32) {
    %c0_i32 = arith.constant 0 : i32
    %c0_i32_0 = arith.constant 0 : i32
    %c0_i32_1 = arith.constant 0 : i32
    return %c0_i32, %c0_i32_0 : i32, i32
  }
  func.func @transform_4(%arg0: i32) -> (i32, i32) {
    %c0_i32 = arith.constant 0 : i32
    %c0_i32_0 = arith.constant 0 : i32
    %c0_i32_1 = arith.constant 0 : i32
    return %c0_i32, %c0_i32_0 : i32, i32
  }
  func.func @transform_5(%arg0: i32) -> (i32, i32) {
    %c0_i32 = arith.constant 0 : i32
    %c0_i32_0 = arith.constant 0 : i32
    %c0_i32_1 = arith.constant 0 : i32
    return %c0_i32, %c0_i32_0 : i32, i32
  }
  func.func @transform_6(%arg0: i32) -> (i32, i32) {
    %c0_i32 = arith.constant 0 : i32
    %c0_i32_0 = arith.constant 0 : i32
    %c0_i32_1 = arith.constant 0 : i32
    return %c0_i32, %c0_i32_0 : i32, i32
  }
  func.func @transform_7(%arg0: i32) -> (i32, i32) {
    %c0_i32 = arith.constant 0 : i32
    %c0_i32_0 = arith.constant 0 : i32
    %c0_i32_1 = arith.constant 0 : i32
    return %c0_i32, %c0_i32_0 : i32, i32
  }
  func.func @transform_8(%arg0: i32) -> (i32, i32) {
    %c0_i32 = arith.constant 0 : i32
    %c0_i32_0 = arith.constant 0 : i32
    %c0_i32_1 = arith.constant 0 : i32
    return %c0_i32, %c0_i32_0 : i32, i32
  }
  func.func @transform_9(%arg0: i32) -> (i32, i32, i32) {
    %c0_i32 = arith.constant 0 : i32
    %c0_i32_0 = arith.constant 0 : i32
    %c0_i32_1 = arith.constant 0 : i32
    return %arg0, %c0_i32, %c0_i32_0 : i32, i32, i32
  }
}

</mosaic_0001>

<bundles_post_ra>
// kernel: my_model_forward.1
= control target key start
LH: loop header
LB: loop body
LE: loop exit
PB: predicated region body
PF: predicated region fallthrough
CT: control target
= control target key end

     0   :  { %v8739_v0 = vlaneseq  ;;  %v8740_v1 = vmov 0   ;;  %v5377_v10 = vmov 0.0   ;;  %v5378_v13 = vmov 100.0   ;;  %s8729_s2 = inlined_call_operand.vmem [shape: f32[512,1], index: 2, kind: input, shape index: {}]   ;;  %s8730_s0 = inlined_call_operand.vmem [shape: f32[8,512], index: 0, kind: input, shape index: {}]   ;;  %s8731_s1 = inlined_call_operand.vmem [shape: bf16[512,8], index: 1, kind: input, shape index: {}]   ;;  %s8732_s8 = inlined_call_operand.<no memory space> [shape: f32[1,1], index: 8, kind: input, shape index: {}]   ;;  %s8733_s6 = inlined_call_operand.vmem [shape: f32[256,1], index: 6, kind: input, shape index: {}]   ;;  %s8734_s4 = inlined_call_operand.vmem [shape: f32[256,1], index: 4, kind: input, shape index: {}]   ;;  %s8735_s3 = inlined_call_operand.vmem [shape: bf16[256,256], index: 3, kind: input, shape index: {}]   ;;  %s8736_s5 = inlined_call_operand.vmem [shape: bf16[256,256], index: 5, kind: input, shape index: {}]   ;;  %s8737_s7 = inlined_call_operand.vmem [shape: bf16[2,256], index: 7, kind: input, shape index: {}]   ;;  %s8738_s9 = inlined_call_operand.vmem [shape: f32[1,1,512], index: 9, kind: output, shape index: {}]  }
   0x1   :  { %4223 = vset.pattern.permute.xlu1 %v8740_v1  ;;  %4222 = vset.pattern.permute.xlu0 %v8740_v1  ;;  %v143_v2 = vld [vmem:[%s8729_s2 + $0x70] sm:$0xff]  ;;  %v141_v3 = vld [vmem:[%s8729_s2 + $0x60] sm:$0xff]  ;;  %v144_v4 = vld [vmem:[%s8729_s2 + $0x78] sm:$0xff]  ;;  %vm770_vm7 = vcmask 1043456   ;;  %vm673_vm8 = vcmask 64512  }
   0x2   :  { %265 = vperm.xlu0 %4222, %v143_v2   ;;  %255 = vperm.xlu1 %4223, %v141_v3   ;;  %v5442_v5 = vshrl.u32 %v8739_v0, 7  ;;  %v142_v6 = vld [vmem:[%s8729_s2 + $0x68] sm:$0xff]  ;;  %v38_v8 = vld [vmem:[%s8730_s0 + $0x18] sm:$0xff]  ;;  %v35_v9 = vld [vmem:[%s8730_s0] sm:$0xff] }
   0x3   :  { %v36_v7 = vld [vmem:[%s8730_s0 + $0x8] sm:$0xff]  ;;  %815 = vmatprep.mubr.bf16.mxu0 %v8740_v1  ;;  %1168 = vmatprep.mubr.bf16.mxu1 %v8740_v1  ;;  %v37_v12 = vld [vmem:[%s8730_s0 + $0x10] sm:$0xff]  ;;  %v140_v18 = vld [vmem:[%s8729_s2 + $0x58] sm:$0xff] }
   0x4   :  { %9005 = vst [vmem:[#allocation3_spill] sm:$0xff] %v5442_v5  ;;  %vm41_vm0 = vcmp.ge.s32.totalorder %v5442_v5, 4  ;;  %vm43_vm1 = vcmp.eq.s32.totalorder %v5442_v5, 0  ;;  %vm44_vm2 = vcmp.eq.s32.totalorder %v5442_v5, 1  ;;  %vm45_vm3 = vcmp.eq.s32.totalorder %v5442_v5, 2  ;;  %v139_v19 = vld [vmem:[%s8729_s2 + $0x50] sm:$0xff] }
   0x5   :  { %v42_v11 = vsel %vm41_vm0, -100.0, %v5377_v10  ;;  %vm46_vm4 = vcmp.eq.s32.totalorder %v5442_v5, 3  ;;  %vm48_vm5 = vcmp.eq.s32.totalorder %v5442_v5, 4  ;;  %v138_v30 = vld [vmem:[%s8729_s2 + $0x48] sm:$0xff]  ;;  %v137_v31 = vld [vmem:[%s8729_s2 + $0x40] sm:$0xff]  ;;  %v136_v37 = vld [vmem:[%s8729_s2 + $0x38] sm:$0xff] }
   0x6   :  { %270 = vperm.xlu0 %4222, %v144_v4   ;;  %260 = vperm.xlu1 %4223, %v142_v6   ;;  %vm47_vm6 = vmor %vm45_vm3, %vm46_vm4  ;;  %v49_v14 = vsel %vm48_vm5, 200.0, %v5378_v13  ;;  %v54_v15 = vmax.f32 %v42_v11, %v36_v7  ;;  %v56_v16 = vmax.f32 %v42_v11, %v38_v8  ;;  %v53_v17 = vmax.f32 %v42_v11, %v35_v9  ;;  %v4224_v36 = vld [vmem:[%s8731_s1] sm:$0xff]   ;;  %v135_v38 = vld [vmem:[%s8729_s2 + $0x30] sm:$0xff] }
   0x7   :  { %v50_v20 = vsel %vm47_vm6, 2400.0, %v49_v14  ;;  %v55_v21 = vmax.f32 %v42_v11, %v37_v12  ;;  %v134_v39 = vld [vmem:[%s8729_s2 + $0x28] sm:$0xff]  ;;  %v133_v40 = vld [vmem:[%s8729_s2 + $0x20] sm:$0xff]  ;;  %v132_v42 = vld [vmem:[%s8729_s2 + $0x18] sm:$0xff] }
   0x8   :  { %v51_v22 = vsel %vm44_vm2, 1100.0, %v50_v20  ;;  %v4225_v41 = vld [vmem:[%s8731_s1 + $0x8] sm:$0xff]   ;;  %v131_v43 = vld [vmem:[%s8729_s2 + $0x10] sm:$0xff]  ;;  %v129_v45 = vld [vmem:[%s8729_s2] sm:$0xff] }
   0x9   :  { %v52_v23 = vsel %vm43_vm1, 8000.0, %v51_v22  ;;  %v130_v44 = vld [vmem:[%s8729_s2 + $0x8] sm:$0xff]  ;;  %v4226_v46 = vld [vmem:[%s8731_s1 + $0x10] sm:$0xff]   ;;  %v160_v47 = vld [vmem:[%s8729_s2 + $0xf8] sm:$0xff] }
   0xa   :  { %250 = vperm.xlu1 %4223, %v140_v18   ;;  %245 = vperm.xlu0 %4222, %v139_v19   ;;  %v5477_v24 = vmin.f32 %v52_v23, %v54_v15  ;;  %v5479_v25 = vmin.f32 %v52_v23, %v56_v16  ;;  %v5481_v26 = vmin.f32 %v52_v23, %v53_v17  ;;  %v159_v48 = vld [vmem:[%s8729_s2 + $0xf0] sm:$0xff]  ;;  %v158_v49 = vld [vmem:[%s8729_s2 + $0xe8] sm:$0xff]  ;;  %v157_v50 = vld [vmem:[%s8729_s2 + $0xe0] sm:$0xff] }
   0xb   :  { %v5483_v27 = vmin.f32 %v52_v23, %v55_v21  ;;  %v4227_v51 = vld [vmem:[%s8731_s1 + $0x18] sm:$0xff]   ;;  %v155_v53 = vld [vmem:[%s8729_s2 + $0xd0] sm:$0xff]  ;;  %v154_v54 = vld [vmem:[%s8729_s2 + $0xc8] sm:$0xff] }
   0xc   :  { %9006 = vst [vmem:[#allocation4_spill] sm:$0xff] %v5477_v24  ;;  %9007 = vst [vmem:[#allocation5_spill] sm:$0xff] %v5479_v25  ;;  %v126_v28 = vpack.c.bf16 %v5477_v24, %v5477_v24  ;;  %v128_v29 = vpack.c.bf16 %v5479_v25, %v5479_v25  ;;  %v125_v32 = vpack.c.bf16 %v5481_v26, %v5481_v26  ;;  %v156_v52 = vld [vmem:[%s8729_s2 + $0xd8] sm:$0xff]  ;;  %v153_v55 = vld [vmem:[%s8729_s2 + $0xc0] sm:$0xff] }
   0xd   :  { %9008 = vst [vmem:[#allocation6_spill] sm:$0xff] %v5481_v26  ;;  %9009 = vst [vmem:[#allocation7_spill] sm:$0xff] %v5483_v27  ;;  %v127_v33 = vpack.c.bf16 %v5483_v27, %v5483_v27  ;;  %v4228_v56 = vld [vmem:[%s8731_s1 + $0x20] sm:$0xff]   ;;  %v152_v57 = vld [vmem:[%s8729_s2 + $0xb8] sm:$0xff] }
   0xe   :  { %4087 = vmatprep.subr.msk.bf16.mxu0 %vm770_vm7, %v126_v28  ;;  %4120 = vmatprep.subr.msk.bf16.mxu1 %vm770_vm7, %v128_v29  ;;  %v772_v34 = vsel %vm770_vm7, %v125_v32, 0  ;;  %v151_v58 = vld [vmem:[%s8729_s2 + $0xb0] sm:$0xff]  ;;  %v150_v59 = vld [vmem:[%s8729_s2 + $0xa8] sm:$0xff]  ;;  %v149_v60 = vld [vmem:[%s8729_s2 + $0xa0] sm:$0xff] }
   0xf   :  { %240 = vperm.xlu1 %4223, %v138_v30   ;;  %235 = vperm.xlu0 %4222, %v137_v31   ;;  %v778_v35 = vsel %vm770_vm7, %v127_v33, 0  ;;  %v4229_v61 = vld [vmem:[%s8731_s1 + $0x28] sm:$0xff]   ;;  %v148_v62 = vld [vmem:[%s8729_s2 + $0x98] sm:$0xff]  ;;  %v147_v63 = vld [vmem:[%s8729_s2 + $0x90] sm:$0xff] }
  0x10   :  { %798 = vmatpush1.bf16.msra.mxu0 %v772_v34  ;;  %1151 = vmatpush1.bf16.msra.mxu1 %v778_v35  ;;  %v146_v2 = vld [vmem:[%s8729_s2 + $0x88] sm:$0xff]  ;;  %v145_v3 = vld [vmem:[%s8729_s2 + $0x80] sm:$0xff]  ;;  %v4230_v4 = vld [vmem:[%s8731_s1 + $0x30] sm:$0xff]  }
  0x11   :  { %v176_v6 = vld [vmem:[%s8729_s2 + $0x178] sm:$0xff]  ;;  %v175_v7 = vld [vmem:[%s8729_s2 + $0x170] sm:$0xff]  ;;  %v174_v8 = vld [vmem:[%s8729_s2 + $0x168] sm:$0xff] }
  0x12   :  { %v173_v9 = vld [vmem:[%s8729_s2 + $0x160] sm:$0xff]  ;;  %v4231_v10 = vld [vmem:[%s8731_s1 + $0x38] sm:$0xff]   ;;  %v171_v12 = vld [vmem:[%s8729_s2 + $0x150] sm:$0xff] }
  0x13   :  { %4088 = vmatmul.mubr.msk.bf16.vlgmr.msra.gmra.mxu0 %vm673_vm8, %v4224_v36  ;;  %4121 = vmatmul.mubr.msk.bf16.vlgmr.msra.gmra.mxu1 %vm673_vm8, %v4224_v36  ;;  %v172_v11 = vld [vmem:[%s8729_s2 + $0x158] sm:$0xff]  ;;  %v170_v13 = vld [vmem:[%s8729_s2 + $0x148] sm:$0xff]  ;;  %v169_v14 = vld [vmem:[%s8729_s2 + $0x140] sm:$0xff] }
  0x14   :  { %230 = vperm.xlu1 %4223, %v136_v37   ;;  %225 = vperm.xlu0 %4222, %v135_v38   ;;  %v4232_v15 = vld [vmem:[%s8731_s1 + $0x40] sm:$0xff]   ;;  %v168_v16 = vld [vmem:[%s8729_s2 + $0x138] sm:$0xff]  ;;  %v167_v17 = vld [vmem:[%s8729_s2 + $0x130] sm:$0xff] }
  0x15   :  { %825 = vmatprep.mubr.bf16.mxu0 %v8740_v1  ;;  %1178 = vmatprep.mubr.bf16.mxu1 %v8740_v1  ;;  %v166_v18 = vld [vmem:[%s8729_s2 + $0x128] sm:$0xff]  ;;  %v165_v19 = vld [vmem:[%s8729_s2 + $0x120] sm:$0xff]  ;;  %v164_v21 = vld [vmem:[%s8729_s2 + $0x118] sm:$0xff] }
  0x16   :  { %v4233_v20 = vld [vmem:[%s8731_s1 + $0x48] sm:$0xff]   ;;  %v163_v22 = vld [vmem:[%s8729_s2 + $0x110] sm:$0xff]  ;;  %v161_v28 = vld [vmem:[%s8729_s2 + $0x100] sm:$0xff] }
  0x17   :  { %v162_v23 = vld [vmem:[%s8729_s2 + $0x108] sm:$0xff]  ;;  %v4234_v29 = vld [vmem:[%s8731_s1 + $0x50] sm:$0xff]   ;;  %v192_v30 = vld [vmem:[%s8729_s2 + $0x1f8] sm:$0xff] }
  0x18   :  { %220 = vperm.xlu1 %4223, %v134_v39   ;;  %215 = vperm.xlu0 %4222, %v133_v40   ;;  %v191_v31 = vld [vmem:[%s8729_s2 + $0x1f0] sm:$0xff]  ;;  %v190_v32 = vld [vmem:[%s8729_s2 + $0x1e8] sm:$0xff]  ;;  %v189_v33 = vld [vmem:[%s8729_s2 + $0x1e0] sm:$0xff] }
  0x19   :  { %v4235_v34 = vld [vmem:[%s8731_s1 + $0x58] sm:$0xff]   ;;  %v187_v36 = vld [vmem:[%s8729_s2 + $0x1d0] sm:$0xff]  ;;  %v186_v37 = vld [vmem:[%s8729_s2 + $0x1c8] sm:$0xff] }
  0x1a   :  { %v188_v35 = vld [vmem:[%s8729_s2 + $0x1d8] sm:$0xff]  ;;  %v185_v38 = vld [vmem:[%s8729_s2 + $0x1c0] sm:$0xff] }
  0x1b   :  { %4089 = vmatmul.mubr.msk.bf16.gmra.mxu0 %vm673_vm8, %v4225_v41  ;;  %4122 = vmatmul.mubr.msk.bf16.gmra.mxu1 %vm673_vm8, %v4225_v41  ;;  %v4236_v39 = vld [vmem:[%s8731_s1 + $0x60] sm:$0xff]   ;;  %v184_v40 = vld [vmem:[%s8729_s2 + $0x1b8] sm:$0xff]  ;;  %v183_v41 = vld [vmem:[%s8729_s2 + $0x1b0] sm:$0xff] }
  0x1c   :  { %210 = vperm.xlu1 %4223, %v132_v42   ;;  %205 = vperm.xlu0 %4222, %v131_v43   ;;  %v182_v42 = vld [vmem:[%s8729_s2 + $0x1a8] sm:$0xff]  ;;  %v181_v43 = vld [vmem:[%s8729_s2 + $0x1a0] sm:$0xff] }
  0x1d   :  { %835 = vmatprep.mubr.bf16.mxu0 %v8740_v1  ;;  %1188 = vmatprep.mubr.bf16.mxu1 %v8740_v1 }
  0x20   :  { %200 = vperm.xlu1 %4223, %v130_v44   ;;  %195 = vperm.xlu0 %4222, %v129_v45   ;;  %v4237_v44 = vld [vmem:[%s8731_s1 + $0x68] sm:$0xff]   ;;  %v180_v45 = vld [vmem:[%s8729_s2 + $0x198] sm:$0xff] }
  0x23   :  { %4090 = vmatmul.mubr.msk.bf16.gmra.mxu0 %vm673_vm8, %v4226_v46  ;;  %4123 = vmatmul.mubr.msk.bf16.gmra.mxu1 %vm673_vm8, %v4226_v46  ;;  %v179_v46 = vld [vmem:[%s8729_s2 + $0x190] sm:$0xff] }
  0x24   :  { %350 = vperm.xlu1 %4223, %v160_v47   ;;  %345 = vperm.xlu0 %4222, %v159_v48   ;;  %v178_v47 = vld [vmem:[%s8729_s2 + $0x188] sm:$0xff]  ;;  %v177_v48 = vld [vmem:[%s8729_s2 + $0x180] sm:$0xff] }
  0x25   :  { %845 = vmatprep.mubr.bf16.mxu0 %v8740_v1  ;;  %1198 = vmatprep.mubr.bf16.mxu1 %v8740_v1 }
  0x28   :  { %340 = vperm.xlu1 %4223, %v158_v49   ;;  %335 = vperm.xlu0 %4222, %v157_v50   ;;  %v14_v49 = vstv %s8732_s8  ;;  %v4238_v50 = vld [vmem:[%s8731_s1 + $0x70] sm:$0xff]  }
  0x29   :  { %15 = vst [vmem:[#allocation2] sm:$0x1] %v14_v49  ;;  %v4247_v49 = vld [vmem:[%s8731_s1 + $0xb8] sm:$0xff]  }
  0x2b   :  { %4091 = vmatmul.mubr.msk.bf16.gmra.mxu0 %vm673_vm8, %v4227_v51  ;;  %4124 = vmatmul.mubr.msk.bf16.gmra.mxu1 %vm673_vm8, %v4227_v51  ;;  %v2690_v51 = vld [vmem:[%s8733_s6 + $0x78] sm:$0xff] }
  0x2c   :  { %330 = vperm.xlu1 %4223, %v156_v52   ;;  %325 = vperm.xlu0 %4222, %v155_v53   ;;  %v2689_v52 = vld [vmem:[%s8733_s6 + $0x70] sm:$0xff]  ;;  %v2688_v53 = vld [vmem:[%s8733_s6 + $0x68] sm:$0xff] }
  0x2d   :  { %855 = vmatprep.mubr.bf16.mxu0 %v8740_v1  ;;  %1208 = vmatprep.mubr.bf16.mxu1 %v8740_v1 }
  0x30   :  { %320 = vperm.xlu1 %4223, %v154_v54   ;;  %315 = vperm.xlu0 %4222, %v153_v55   ;;  %v2687_v54 = vld [vmem:[%s8733_s6 + $0x60] sm:$0xff]  ;;  %v4239_v55 = vld [vmem:[%s8731_s1 + $0x78] sm:$0xff]  }
  0x33   :  { %4092 = vmatmul.mubr.msk.bf16.gmra.mxu0 %vm673_vm8, %v4228_v56  ;;  %4125 = vmatmul.mubr.msk.bf16.gmra.mxu1 %vm673_vm8, %v4228_v56  ;;  %v2686_v56 = vld [vmem:[%s8733_s6 + $0x58] sm:$0xff] }
  0x34   :  { %310 = vperm.xlu1 %4223, %v152_v57   ;;  %305 = vperm.xlu0 %4222, %v151_v58   ;;  %v2685_v57 = vld [vmem:[%s8733_s6 + $0x50] sm:$0xff]  ;;  %v2684_v58 = vld [vmem:[%s8733_s6 + $0x48] sm:$0xff] }
  0x35   :  { %865 = vmatprep.mubr.bf16.mxu0 %v8740_v1  ;;  %1218 = vmatprep.mubr.bf16.mxu1 %v8740_v1 }
  0x38   :  { %300 = vperm.xlu1 %4223, %v150_v59   ;;  %295 = vperm.xlu0 %4222, %v149_v60   ;;  %v2683_v59 = vld [vmem:[%s8733_s6 + $0x40] sm:$0xff] }
  0x39   :  { %v4240_v60 = vld [vmem:[%s8731_s1 + $0x80] sm:$0xff]  }
  0x3b   :  { %4093 = vmatmul.mubr.msk.bf16.gmra.mxu0 %vm673_vm8, %v4229_v61  ;;  %4126 = vmatmul.mubr.msk.bf16.gmra.mxu1 %vm673_vm8, %v4229_v61  ;;  %v2682_v61 = vld [vmem:[%s8733_s6 + $0x38] sm:$0xff] }
  0x3c   :  { %290 = vperm.xlu1 %4223, %v148_v62   ;;  %285 = vperm.xlu0 %4222, %v147_v63   ;;  %v2681_v62 = vld [vmem:[%s8733_s6 + $0x30] sm:$0xff]  ;;  %v2680_v63 = vld [vmem:[%s8733_s6 + $0x28] sm:$0xff] }
  0x3d   :  { %875 = vmatprep.mubr.bf16.mxu0 %v8740_v1  ;;  %1228 = vmatprep.mubr.bf16.mxu1 %v8740_v1 }
  0x40   :  { %280 = vperm.xlu1 %4223, %v146_v2   ;;  %275 = vperm.xlu0 %4222, %v145_v3   ;;  %v2679_v2 = vld [vmem:[%s8733_s6 + $0x20] sm:$0xff]  ;;  %v4241_v3 = vld [vmem:[%s8731_s1 + $0x88] sm:$0xff]  }
  0x43   :  { %4094 = vmatmul.mubr.msk.bf16.gmra.mxu0 %vm673_vm8, %v4230_v4  ;;  %4127 = vmatmul.mubr.msk.bf16.gmra.mxu1 %vm673_vm8, %v4230_v4  ;;  %v2678_v4 = vld [vmem:[%s8733_s6 + $0x18] sm:$0xff] }
  0x44   :  { %430 = vperm.xlu1 %4223, %v176_v6   ;;  %425 = vperm.xlu0 %4222, %v175_v7   ;;  %v2677_v6 = vld [vmem:[%s8733_s6 + $0x10] sm:$0xff]  ;;  %v2676_v7 = vld [vmem:[%s8733_s6 + $0x8] sm:$0xff] }
  0x45   :  { %885 = vmatprep.mubr.bf16.mxu0 %v8740_v1  ;;  %1238 = vmatprep.mubr.bf16.mxu1 %v8740_v1 }
  0x48   :  { %420 = vperm.xlu1 %4223, %v174_v8   ;;  %415 = vperm.xlu0 %4222, %v173_v9   ;;  %v2675_v8 = vld [vmem:[%s8733_s6] sm:$0xff]  ;;  %v4242_v9 = vld [vmem:[%s8731_s1 + $0x90] sm:$0xff]  }
  0x4b   :  { %4095 = vmatmul.mubr.msk.bf16.gmra.mxu0 %vm673_vm8, %v4231_v10  ;;  %4128 = vmatmul.mubr.msk.bf16.gmra.mxu1 %vm673_vm8, %v4231_v10  ;;  %v2706_v10 = vld [vmem:[%s8733_s6 + $0xf8] sm:$0xff] }
  0x4c   :  { %410 = vperm.xlu1 %4223, %v172_v11   ;;  %405 = vperm.xlu0 %4222, %v171_v12   ;;  %v2705_v11 = vld [vmem:[%s8733_s6 + $0xf0] sm:$0xff]  ;;  %v2704_v12 = vld [vmem:[%s8733_s6 + $0xe8] sm:$0xff] }
  0x4d   :  { %895 = vmatprep.mubr.bf16.mxu0 %v8740_v1  ;;  %1248 = vmatprep.mubr.bf16.mxu1 %v8740_v1 }
  0x50   :  { %400 = vperm.xlu1 %4223, %v170_v13   ;;  %395 = vperm.xlu0 %4222, %v169_v14   ;;  %v2703_v13 = vld [vmem:[%s8733_s6 + $0xe0] sm:$0xff]  ;;  %v4243_v14 = vld [vmem:[%s8731_s1 + $0x98] sm:$0xff]  }
  0x53   :  { %4096 = vmatmul.mubr.msk.bf16.gmra.mxu0 %vm673_vm8, %v4232_v15  ;;  %4129 = vmatmul.mubr.msk.bf16.gmra.mxu1 %vm673_vm8, %v4232_v15 }
  0x54   :  { %390 = vperm.xlu1 %4223, %v168_v16   ;;  %385 = vperm.xlu0 %4222, %v167_v17   ;;  %v2702_v16 = vld [vmem:[%s8733_s6 + $0xd8] sm:$0xff]  ;;  %v2701_v17 = vld [vmem:[%s8733_s6 + $0xd0] sm:$0xff] }
  0x55   :  { %905 = vmatprep.mubr.bf16.mxu0 %v8740_v1  ;;  %1258 = vmatprep.mubr.bf16.mxu1 %v8740_v1 }
  0x58   :  { %380 = vperm.xlu1 %4223, %v166_v18   ;;  %375 = vperm.xlu0 %4222, %v165_v19   ;;  %v2700_v19 = vld [vmem:[%s8733_s6 + $0xc8] sm:$0xff] }
  0x5b   :  { %4097 = vmatmul.mubr.msk.bf16.gmra.mxu0 %vm673_vm8, %v4233_v20  ;;  %4130 = vmatmul.mubr.msk.bf16.gmra.mxu1 %vm673_vm8, %v4233_v20  ;;  %v2699_v20 = vld [vmem:[%s8733_s6 + $0xc0] sm:$0xff] }
  0x5c   :  { %370 = vperm.xlu1 %4223, %v164_v21   ;;  %365 = vperm.xlu0 %4222, %v163_v22   ;;  %v4244_v22 = vld [vmem:[%s8731_s1 + $0xa0] sm:$0xff]  }
  0x5d   :  { %915 = vmatprep.mubr.bf16.mxu0 %v8740_v1  ;;  %1268 = vmatprep.mubr.bf16.mxu1 %v8740_v1 }
  0x60   :  { %360 = vperm.xlu1 %4223, %v162_v23   ;;  %355 = vperm.xlu0 %4222, %v161_v28   ;;  %v2698_v28 = vld [vmem:[%s8733_s6 + $0xb8] sm:$0xff] }
  0x63   :  { %4098 = vmatmul.mubr.msk.bf16.gmra.mxu0 %vm673_vm8, %v4234_v29  ;;  %4131 = vmatmul.mubr.msk.bf16.gmra.mxu1 %vm673_vm8, %v4234_v29  ;;  %v2697_v29 = vld [vmem:[%s8733_s6 + $0xb0] sm:$0xff] }
  0x64   :  { %510 = vperm.xlu1 %4223, %v192_v30   ;;  %505 = vperm.xlu0 %4222, %v191_v31   ;;  %v2696_v31 = vld [vmem:[%s8733_s6 + $0xa8] sm:$0xff] }
  0x65   :  { %925 = vmatprep.mubr.bf16.mxu0 %v8740_v1  ;;  %1278 = vmatprep.mubr.bf16.mxu1 %v8740_v1 }
  0x68   :  { %500 = vperm.xlu1 %4223, %v190_v32   ;;  %495 = vperm.xlu0 %4222, %v189_v33   ;;  %v2695_v32 = vld [vmem:[%s8733_s6 + $0xa0] sm:$0xff] }
  0x6b   :  { %4099 = vmatmul.mubr.msk.bf16.gmra.mxu0 %vm673_vm8, %v4235_v34  ;;  %4132 = vmatmul.mubr.msk.bf16.gmra.mxu1 %vm673_vm8, %v4235_v34  ;;  %v4245_v34 = vld [vmem:[%s8731_s1 + $0xa8] sm:$0xff]  }
  0x6c   :  { %490 = vperm.xlu1 %4223, %v188_v35   ;;  %485 = vperm.xlu0 %4222, %v187_v36   ;;  %v2694_v35 = vld [vmem:[%s8733_s6 + $0x98] sm:$0xff]  ;;  %v2693_v36 = vld [vmem:[%s8733_s6 + $0x90] sm:$0xff] }
  0x6d   :  { %935 = vmatprep.mubr.bf16.mxu0 %v8740_v1  ;;  %1288 = vmatprep.mubr.bf16.mxu1 %v8740_v1 }
  0x70   :  { %480 = vperm.xlu1 %4223, %v186_v37   ;;  %475 = vperm.xlu0 %4222, %v185_v38  }
  0x73   :  { %4100 = vmatmul.mubr.msk.bf16.gmra.mxu0 %vm673_vm8, %v4236_v39  ;;  %4133 = vmatmul.mubr.msk.bf16.gmra.mxu1 %vm673_vm8, %v4236_v39  ;;  %v2692_v39 = vld [vmem:[%s8733_s6 + $0x88] sm:$0xff] }
  0x74   :  { %470 = vperm.xlu1 %4223, %v184_v40   ;;  %465 = vperm.xlu0 %4222, %v183_v41   ;;  %v2691_v40 = vld [vmem:[%s8733_s6 + $0x80] sm:$0xff]  ;;  %v4246_v41 = vld [vmem:[%s8731_s1 + $0xb0] sm:$0xff]  }
  0x75   :  { %945 = vmatprep.mubr.bf16.mxu0 %v8740_v1  ;;  %1298 = vmatprep.mubr.bf16.mxu1 %v8740_v1 }
  0x78   :  { %460 = vperm.xlu1 %4223, %v182_v42   ;;  %455 = vperm.xlu0 %4222, %v181_v43   ;;  %v1920_v43 = vld [vmem:[%s8734_s4 + $0x78] sm:$0xff] }
  0x7b   :  { %4101 = vmatmul.mubr.msk.bf16.gmra.mxu0 %vm673_vm8, %v4237_v44  ;;  %4134 = vmatmul.mubr.msk.bf16.gmra.mxu1 %vm673_vm8, %v4237_v44  ;;  %v1919_v44 = vld [vmem:[%s8734_s4 + $0x70] sm:$0xff] }
  0x7c   :  { %450 = vperm.xlu1 %4223, %v180_v45   ;;  %445 = vperm.xlu0 %4222, %v179_v46   ;;  %v1918_v46 = vld [vmem:[%s8734_s4 + $0x68] sm:$0xff] }
  0x7d   :  { %955 = vmatprep.mubr.bf16.mxu0 %v8740_v1  ;;  %1308 = vmatprep.mubr.bf16.mxu1 %v8740_v1  ;;  %v5866_v15 = vpop.permute.xlu0 %265  ;;  %v5874_v18 = vpop.permute.xlu1 %255 }
  0x80   :  { %440 = vperm.xlu1 %4223, %v178_v47   ;;  %435 = vperm.xlu0 %4222, %v177_v48   ;;  %v1917_v47 = vld [vmem:[%s8734_s4 + $0x60] sm:$0xff] }
  0x81   :  { %v5886_v21 = vpop.permute.xlu0 %270  ;;  %v5891_v23 = vpop.permute.xlu1 %260 }
  0x83   :  { %4102 = vmatmul.mubr.msk.bf16.gmra.mxu0 %vm673_vm8, %v4238_v50  ;;  %4135 = vmatmul.mubr.msk.bf16.gmra.mxu1 %vm673_vm8, %v4238_v50 }
  0x84   :  { %2784 = vperm.xlu1 %4223, %v2690_v51   ;;  %2779 = vperm.xlu0 %4222, %v2689_v52   ;;  %v1916_v51 = vld [vmem:[%s8734_s4 + $0x58] sm:$0xff]  ;;  %v1915_v52 = vld [vmem:[%s8734_s4 + $0x50] sm:$0xff] }
  0x85   :  { %965 = vmatprep.mubr.bf16.mxu0 %v8740_v1  ;;  %1318 = vmatprep.mubr.bf16.mxu1 %v8740_v1  ;;  %v5901_v30 = vpop.permute.xlu0 %245  ;;  %v5911_v33 = vpop.permute.xlu1 %250 }
  0x88   :  { %2774 = vperm.xlu1 %4223, %v2688_v53   ;;  %2769 = vperm.xlu0 %4222, %v2687_v54   ;;  %v1914_v54 = vld [vmem:[%s8734_s4 + $0x48] sm:$0xff] }
  0x8a   :  { %v5922_v37 = vpop.permute.xlu0 %235  ;;  %v5926_v38 = vpop.permute.xlu1 %240 }
  0x8b   :  { %4103 = vmatmul.mubr.msk.bf16.gmra.mxu0 %vm673_vm8, %v4239_v55  ;;  %4136 = vmatmul.mubr.msk.bf16.gmra.mxu1 %vm673_vm8, %v4239_v55  ;;  %v1913_v55 = vld [vmem:[%s8734_s4 + $0x40] sm:$0xff] }
  0x8c   :  { %2764 = vperm.xlu1 %4223, %v2686_v56   ;;  %2759 = vperm.xlu0 %4222, %v2685_v57   ;;  %v4248_v57 = vld [vmem:[%s8731_s1 + $0xc0] sm:$0xff]  }
  0x8d   :  { %975 = vmatprep.mubr.bf16.mxu0 %v8740_v1  ;;  %1328 = vmatprep.mubr.bf16.mxu1 %v8740_v1 }
  0x8f   :  { %v5939_v42 = vpop.permute.xlu0 %225  ;;  %v5947_v45 = vpop.permute.xlu1 %230 }
  0x90   :  { %2754 = vperm.xlu1 %4223, %v2684_v58   ;;  %2749 = vperm.xlu0 %4222, %v2683_v59   ;;  %v1912_v58 = vld [vmem:[%s8734_s4 + $0x38] sm:$0xff]  ;;  %v1911_v59 = vld [vmem:[%s8734_s4 + $0x30] sm:$0xff] }
  0x93   :  { %4104 = vmatmul.mubr.msk.bf16.gmra.mxu0 %vm673_vm8, %v4240_v60  ;;  %4137 = vmatmul.mubr.msk.bf16.gmra.mxu1 %vm673_vm8, %v4240_v60  ;;  %v5959_v48 = vpop.permute.xlu0 %215  ;;  %v5964_v50 = vpop.permute.xlu1 %220 }
  0x94   :  { %2744 = vperm.xlu1 %4223, %v2682_v61   ;;  %2739 = vperm.xlu0 %4222, %v2681_v62  }
  0x95   :  { %985 = vmatprep.mubr.bf16.mxu0 %v8740_v1  ;;  %1338 = vmatprep.mubr.bf16.mxu1 %v8740_v1 }
  0x97   :  { %v5974_v53 = vpop.permute.xlu0 %205  ;;  %v5984_v56 = vpop.permute.xlu1 %210 }
  0x98   :  { %2734 = vperm.xlu1 %4223, %v2680_v63   ;;  %2729 = vperm.xlu0 %4222, %v2679_v2  }
  0x9b   :  { %4105 = vmatmul.mubr.msk.bf16.gmra.mxu0 %vm673_vm8, %v4241_v3  ;;  %4138 = vmatmul.mubr.msk.bf16.gmra.mxu1 %vm673_vm8, %v4241_v3  ;;  %v196_v60 = vpop.permute.xlu0 %195  ;;  %v201_v63 = vpop.permute.xlu1 %200 }
  0x9c   :  { %2724 = vperm.xlu1 %4223, %v2678_v4   ;;  %2719 = vperm.xlu0 %4222, %v2677_v6   ;;  %v1910_v4 = vld [vmem:[%s8734_s4 + $0x28] sm:$0xff]  ;;  %v1909_v6 = vld [vmem:[%s8734_s4 + $0x20] sm:$0xff] }
  0x9d   :  { %995 = vmatprep.mubr.bf16.mxu0 %v8740_v1  ;;  %1348 = vmatprep.mubr.bf16.mxu1 %v8740_v1 }
  0xa0   :  { %2714 = vperm.xlu1 %4223, %v2676_v7   ;;  %2709 = vperm.xlu0 %4222, %v2675_v8  }
  0xa3   :  { %4106 = vmatmul.mubr.msk.bf16.gmra.mxu0 %vm673_vm8, %v4242_v9  ;;  %4139 = vmatmul.mubr.msk.bf16.gmra.mxu1 %vm673_vm8, %v4242_v9 }
  0xa4   :  { %2864 = vperm.xlu1 %4223, %v2706_v10   ;;  %2859 = vperm.xlu0 %4222, %v2705_v11   ;;  %v4249_v11 = vld [vmem:[%s8731_s1 + $0xc8] sm:$0xff]  }
  0xa5   :  { %1005 = vmatprep.mubr.bf16.mxu0 %v8740_v1  ;;  %1358 = vmatprep.mubr.bf16.mxu1 %v8740_v1 }
  0xa8   :  { %2854 = vperm.xlu1 %4223, %v2704_v12   ;;  %2849 = vperm.xlu0 %4222, %v2703_v13  }
  0xab   :  { %4107 = vmatmul.mubr.msk.bf16.gmra.mxu0 %vm673_vm8, %v4243_v14  ;;  %4140 = vmatmul.mubr.msk.bf16.gmra.mxu1 %vm673_vm8, %v4243_v14  ;;  %v6008_v14 = vpop.permute.xlu0 %345 }
  0xac   :  { %2844 = vperm.xlu1 %4223, %v2702_v16   ;;  %2839 = vperm.xlu0 %4222, %v2701_v17   ;;  %9010 = vst [vmem:[#allocation8_spill] sm:$0xff] %v6008_v14 }
  0xad   :  { %1015 = vmatprep.mubr.bf16.mxu0 %v8740_v1  ;;  %1368 = vmatprep.mubr.bf16.mxu1 %v8740_v1 }
  0xb0   :  { %2834 = vperm.xlu1 %4223, %v2700_v19   ;;  %2829 = vperm.xlu0 %4222, %v2699_v20   ;;  %v1908_v19 = vld [vmem:[%s8734_s4 + $0x18] sm:$0xff]  ;;  %v1907_v20 = vld [vmem:[%s8734_s4 + $0x10] sm:$0xff] }
  0xb3   :  { %4108 = vmatmul.mubr.msk.bf16.gmra.mxu0 %vm673_vm8, %v4244_v22  ;;  %4141 = vmatmul.mubr.msk.bf16.gmra.mxu1 %vm673_vm8, %v4244_v22 }
  0xb4   :  { %2824 = vperm.xlu1 %4223, %v2698_v28   ;;  %2819 = vperm.xlu0 %4222, %v2697_v29   ;;  %v6016_v29 = vpop.permute.xlu1 %350 }
  0xb5   :  { %1025 = vmatprep.mubr.bf16.mxu0 %v8740_v1  ;;  %1378 = vmatprep.mubr.bf16.mxu1 %v8740_v1  ;;  %9011 = vst [vmem:[#allocation9_spill] sm:$0xff] %v6016_v29 }
  0xb8   :  { %2814 = vperm.xlu1 %4223, %v2696_v31   ;;  %2809 = vperm.xlu0 %4222, %v2695_v32  }
  0xbb   :  { %4109 = vmatmul.mubr.msk.bf16.gmra.mxu0 %vm673_vm8, %v4245_v34  ;;  %4142 = vmatmul.mubr.msk.bf16.gmra.mxu1 %vm673_vm8, %v4245_v34 }
  0xbc   :  { %2804 = vperm.xlu1 %4223, %v2694_v35   ;;  %2799 = vperm.xlu0 %4222, %v2693_v36  }
  0xbd   :  { %1035 = vmatprep.mubr.bf16.mxu0 %v8740_v1  ;;  %1388 = vmatprep.mubr.bf16.mxu1 %v8740_v1 }
  0xc0   :  { %2794 = vperm.xlu1 %4223, %v2692_v39   ;;  %2789 = vperm.xlu0 %4222, %v2691_v40   ;;  %v1906_v40 = vld [vmem:[%s8734_s4 + $0x8] sm:$0xff] }
  0xc3   :  { %4110 = vmatmul.mubr.msk.bf16.gmra.mxu0 %vm673_vm8, %v4246_v41  ;;  %4143 = vmatmul.mubr.msk.bf16.gmra.mxu1 %vm673_vm8, %v4246_v41  ;;  %v1905_v41 = vld [vmem:[%s8734_s4] sm:$0xff] }
  0xc4   :  { %2014 = vperm.xlu1 %4223, %v1920_v43   ;;  %2009 = vperm.xlu0 %4222, %v1919_v44  }
  0xc5   :  { %1045 = vmatprep.mubr.bf16.mxu0 %v8740_v1  ;;  %1398 = vmatprep.mubr.bf16.mxu1 %v8740_v1 }
  0xc8   :  { %2004 = vperm.xlu1 %4223, %v1918_v46   ;;  %1999 = vperm.xlu0 %4222, %v1917_v47   ;;  %v6030_v46 = vpop.permute.xlu0 %335 }
  0xc9   :  { %9012 = vst [vmem:[#allocation10_spill] sm:$0xff] %v6030_v46 }
  0xcb   :  { %4111 = vmatmul.mubr.msk.bf16.gmra.mxu0 %vm673_vm8, %v4247_v49  ;;  %4144 = vmatmul.mubr.msk.bf16.gmra.mxu1 %vm673_vm8, %v4247_v49 }
  0xcc   :  { %1994 = vperm.xlu1 %4223, %v1916_v51   ;;  %1989 = vperm.xlu0 %4222, %v1915_v52   ;;  %v4250_v51 = vld [vmem:[%s8731_s1 + $0xd0] sm:$0xff]  }
  0xcd   :  { %1055 = vmatprep.mubr.bf16.mxu0 %v8740_v1  ;;  %1408 = vmatprep.mubr.bf16.mxu1 %v8740_v1 }
  0xd0   :  { %1984 = vperm.xlu1 %4223, %v1914_v54   ;;  %1979 = vperm.xlu0 %4222, %v1913_v55   ;;  %v6037_v55 = vpop.permute.xlu1 %340 }
  0xd1   :  { %9013 = vst [vmem:[#allocation11_spill] sm:$0xff] %v6037_v55 }
  0xd3   :  { %4112 = vmatmul.mubr.msk.bf16.gmra.mxu0 %vm673_vm8, %v4248_v57  ;;  %4145 = vmatmul.mubr.msk.bf16.gmra.mxu1 %vm673_vm8, %v4248_v57  ;;  %v817_v61 = vpop.f32.mrf.mxu0  ;;  %v1170_v62 = vpop.f32.mrf.mxu1 }
  0xd4   :  { %1974 = vperm.xlu1 %4223, %v1912_v58   ;;  %1969 = vperm.xlu0 %4222, %v1911_v59   ;;  %v818_v2 = vadd.f32 %v817_v61, %v196_v60  ;;  %v1171_v3 = vadd.f32 %v1170_v62, %v196_v60  ;;  %v1935_v59 = vld [vmem:[%s8734_s4 + $0xf0] sm:$0xff] }
  0xd5   :  { %1065 = vmatprep.mubr.bf16.mxu0 %v8740_v1  ;;  %1418 = vmatprep.mubr.bf16.mxu1 %v8740_v1  ;;  %v819_v7 = vpop.f32.mrf.mxu0  ;;  %v1172_v8 = vpop.f32.mrf.mxu1 }
  0xd6   :  { %4352 = vtanh.f32 %v818_v2  ;;  %v820_v9 = vadd.f32 %v819_v7, %v196_v60  ;;  %v1173_v10 = vadd.f32 %v1172_v8, %v196_v60  ;;  %v6059_v7 = vpop.permute.xlu0 %325  ;;  %v1933_v8 = vld [vmem:[%s8734_s4 + $0xe0] sm:$0xff] }
  0xd7   :  { %4354 = vtanh.f32 %v1171_v3  ;;  %v821_v12 = vpop.f32.mrf.mxu0  ;;  %v1174_v13 = vpop.f32.mrf.mxu1  ;;  %9016 = vst [vmem:[#allocation14_spill] sm:$0xff] %v6059_v7 }
  0xd8   :  { %1964 = vperm.xlu1 %4223, %v1910_v4   ;;  %1959 = vperm.xlu0 %4222, %v1909_v6   ;;  %4356 = vtanh.f32 %v820_v9  ;;  %v822_v16 = vadd.f32 %v821_v12, %v201_v63  ;;  %v1175_v17 = vadd.f32 %v1174_v13, %v201_v63  ;;  %v6073_v13 = vpop.permute.xlu1 %330 }
  0xd9   :  { %4358 = vtanh.f32 %v1173_v10  ;;  %v823_v22 = vpop.f32.mrf.mxu0  ;;  %v1176_v28 = vpop.f32.mrf.mxu1  ;;  %9019 = vst [vmem:[#allocation17_spill] sm:$0xff] %v6073_v13 }
  0xda   :  { %4360 = vtanh.f32 %v822_v16  ;;  %v824_v31 = vadd.f32 %v823_v22, %v201_v63  ;;  %v1177_v32 = vadd.f32 %v1176_v28, %v201_v63  ;;  %v4251_v16 = vld [vmem:[%s8731_s1 + $0xd8] sm:$0xff]  }
  0xdb   :  { %4113 = vmatmul.mubr.msk.bf16.gmra.mxu0 %vm673_vm8, %v4249_v11  ;;  %4146 = vmatmul.mubr.msk.bf16.gmra.mxu1 %vm673_vm8, %v4249_v11  ;;  %4362 = vtanh.f32 %v1175_v17  ;;  %v827_v34 = vpop.f32.mrf.mxu0  ;;  %v1180_v35 = vpop.f32.mrf.mxu1  ;;  %v1932_v28 = vld [vmem:[%s8734_s4 + $0xd8] sm:$0xff] }
  0xdc   :  { %1954 = vperm.xlu1 %4223, %v1908_v19   ;;  %1949 = vperm.xlu0 %4222, %v1907_v20   ;;  %4364 = vtanh.f32 %v824_v31  ;;  %v828_v36 = vadd.f32 %v827_v34, %v5974_v53  ;;  %v1181_v39 = vadd.f32 %v1180_v35, %v5974_v53  ;;  %v1931_v31 = vld [vmem:[%s8734_s4 + $0xd0] sm:$0xff] }
  0xdd   :  { %1075 = vmatprep.mubr.bf16.mxu0 %v8740_v1  ;;  %1428 = vmatprep.mubr.bf16.mxu1 %v8740_v1  ;;  %4366 = vtanh.f32 %v1177_v32  ;;  %v829_v43 = vpop.f32.mrf.mxu0  ;;  %v1182_v44 = vpop.f32.mrf.mxu1  ;;  %v1927_v32 = vld [vmem:[%s8734_s4 + $0xb0] sm:$0xff] }
  0xde   :  { %4368 = vtanh.f32 %v828_v36  ;;  %v830_v47 = vadd.f32 %v829_v43, %v5974_v53  ;;  %v1183_v49 = vadd.f32 %v1182_v44, %v5974_v53  ;;  %v1936_v53 = vld [vmem:[%s8734_s4 + $0xf8] sm:$0xff] }
  0xdf   :  { %4370 = vtanh.f32 %v1181_v39  ;;  %v831_v52 = vpop.f32.mrf.mxu0  ;;  %v1184_v54 = vpop.f32.mrf.mxu1  ;;  %v1928_v39 = vld [vmem:[%s8734_s4 + $0xb8] sm:$0xff] }
  0xe0   :  { %1944 = vperm.xlu1 %4223, %v1906_v40   ;;  %1939 = vperm.xlu0 %4222, %v1905_v41   ;;  %4372 = vtanh.f32 %v830_v47  ;;  %v832_v57 = vadd.f32 %v831_v52, %v5984_v56  ;;  %v1185_v58 = vadd.f32 %v1184_v54, %v5984_v56  ;;  %v6100_v41 = vpop.permute.xlu0 %315  ;;  %v6116_v54 = vpop.permute.xlu1 %320 }
  0xe1   :  { %4374 = vtanh.f32 %v1183_v49  ;;  %v833_v60 = vpop.f32.mrf.mxu0  ;;  %v1186_v61 = vpop.f32.mrf.mxu1  ;;  %9024 = vst [vmem:[#allocation22_spill] sm:$0xff] %v6100_v41  ;;  %9027 = vst [vmem:[#allocation25_spill] sm:$0xff] %v6116_v54 }
  0xe2   :  { %4376 = vtanh.f32 %v832_v57  ;;  %v834_v62 = vadd.f32 %v833_v60, %v5984_v56  ;;  %v1187_v63 = vadd.f32 %v1186_v61, %v5984_v56  ;;  %v1934_v56 = vld [vmem:[%s8734_s4 + $0xe8] sm:$0xff] }
  0xe3   :  { %4114 = vmatmul.mubr.msk.bf16.gmra.mxu0 %vm673_vm8, %v4250_v51  ;;  %4147 = vmatmul.mubr.msk.bf16.gmra.mxu1 %vm673_vm8, %v4250_v51  ;;  %v6051_v2 = vpop.eup %4352  ;;  %4378 = vtanh.f32 %v1185_v58  ;;  %v6053_v3 = vpop.f32.mrf.mxu0  ;;  %v1930_v57 = vld [vmem:[%s8734_s4 + $0xc8] sm:$0xff]  ;;  %v1929_v58 = vld [vmem:[%s8734_s4 + $0xc0] sm:$0xff] }
  0xe4   :  { %9014 = vst [vmem:[#allocation12_spill] sm:$0xff] %v6051_v2  ;;  %v6055_v4 = vpop.f32.mrf.mxu1  ;;  %2094 = vperm.xlu1 %4223, %v1936_v53   ;;  %2089 = vperm.xlu0 %4222, %v1935_v59   ;;  %v6057_v6 = vpop.eup %4354  ;;  %4380 = vtanh.f32 %v834_v62  ;;  %v4252_v62 = vld [vmem:[%s8731_s1 + $0xe0] sm:$0xff]  }
  0xe5   :  { %9015 = vst [vmem:[#allocation13_spill] sm:$0xff] %v6057_v6  ;;  %1085 = vmatprep.mubr.bf16.mxu0 %v8740_v1  ;;  %1438 = vmatprep.mubr.bf16.mxu1 %v8740_v1  ;;  %v6069_v9 = vpop.eup %4356  ;;  %4382 = vtanh.f32 %v1187_v63  ;;  %v839_v10 = vpop.f32.mrf.mxu0 }
  0xe6   :  { %9017 = vst [vmem:[#allocation15_spill] sm:$0xff] %v6069_v9  ;;  %v1192_v11 = vpop.f32.mrf.mxu1  ;;  %v6071_v12 = vpop.eup %4358 }
  0xe7   :  { %9018 = vst [vmem:[#allocation16_spill] sm:$0xff] %v6071_v12  ;;  %v6078_v17 = vpop.eup %4360  ;;  %v6080_v19 = vpop.f32.mrf.mxu0  ;;  %v1193_v0 = vadd.f32 %v1192_v11, %v5959_v48  ;;  %v4253_v11 = vld [vmem:[%s8731_s1 + $0xe8] sm:$0xff]  }
  0xe8   :  { %9020 = vst [vmem:[#allocation18_spill] sm:$0xff] %v6078_v17  ;;  %v6082_v20 = vpop.f32.mrf.mxu1  ;;  %2084 = vperm.xlu1 %4223, %v1934_v56   ;;  %2079 = vperm.xlu0 %4222, %v1933_v8   ;;  %v6084_v22 = vpop.eup %4362  ;;  %v840_v56 = vadd.f32 %v839_v10, %v5959_v48  ;;  %v9035_v10 = vmov 0   ;;  %v4258_v17 = vld [vmem:[%s8735_s3 + $0x4] ss:$8 sps:$4 sm:$0xff]  }
  0xe9   :  { %9021 = vst [vmem:[#allocation19_spill] sm:$0xff] %v6084_v22  ;;  %v6094_v34 = vpop.eup %4364  ;;  %v843_v35 = vpop.f32.mrf.mxu0 }
  0xea   :  { %9022 = vst [vmem:[#allocation20_spill] sm:$0xff] %v6094_v34  ;;  %v1196_v36 = vpop.f32.mrf.mxu1  ;;  %v6098_v40 = vpop.eup %4366  ;;  %4384 = vtanh.f32 %v840_v56  ;;  %v1925_v56 = vld [vmem:[%s8734_s4 + $0xa0] sm:$0xff] }
  0xeb   :  { %9023 = vst [vmem:[#allocation21_spill] sm:$0xff] %v6098_v40  ;;  %4115 = vmatmul.mubr.msk.bf16.gmra.mxu0 %vm673_vm8, %v4251_v16  ;;  %4148 = vmatmul.mubr.msk.bf16.gmra.mxu1 %vm673_vm8, %v4251_v16  ;;  %v6106_v44 = vpop.eup %4368  ;;  %v6108_v47 = vpop.f32.mrf.mxu0  ;;  %v1197_v24 = vadd.f32 %v1196_v36, %v5964_v50  ;;  %4386 = vtanh.f32 %v1193_v0 }
  0xec   :  { %9025 = vst [vmem:[#allocation23_spill] sm:$0xff] %v6106_v44  ;;  %v6110_v49 = vpop.f32.mrf.mxu1  ;;  %2074 = vperm.xlu1 %4223, %v1932_v28   ;;  %2069 = vperm.xlu0 %4222, %v1931_v31   ;;  %v6114_v52 = vpop.eup %4370 }
  0xed   :  { %9026 = vst [vmem:[#allocation24_spill] sm:$0xff] %v6114_v52  ;;  %1095 = vmatprep.mubr.bf16.mxu0 %v8740_v1  ;;  %1448 = vmatprep.mubr.bf16.mxu1 %v8740_v1  ;;  %v6126_v53 = vpop.eup %4372  ;;  %v849_v59 = vpop.f32.mrf.mxu0 }
  0xee   :  { %9028 = vst [vmem:[#allocation26_spill] sm:$0xff] %v6126_v53  ;;  %v1202_v60 = vpop.f32.mrf.mxu1  ;;  %v6128_v61 = vpop.eup %4374 }
  0xef   :  { %9029 = vst [vmem:[#allocation27_spill] sm:$0xff] %v6128_v61  ;;  %v6133_v63 = vpop.eup %4376  ;;  %v851_v8 = vpop.f32.mrf.mxu0  ;;  %v1203_v36 = vadd.f32 %v1202_v60, %v5939_v42 }
  0xf0   :  { %9030 = vst [vmem:[#allocation28_spill] sm:$0xff] %v6133_v63  ;;  %v6136_v16 = vpop.f32.mrf.mxu1  ;;  %2064 = vperm.xlu1 %4223, %v1930_v57   ;;  %2059 = vperm.xlu0 %4222, %v1929_v58   ;;  %v6138_v28 = vpop.eup %4378  ;;  %v844_v57 = vadd.f32 %v843_v35, %v5964_v50  ;;  %v850_v35 = vadd.f32 %v849_v59, %v5939_v42 }
  0xf1   :  { %9031 = vst [vmem:[#allocation29_spill] sm:$0xff] %v6138_v28  ;;  %v6140_v31 = vpop.permute.xlu0 %305  ;;  %v6151_v51 = vpop.eup %4380 }
  0xf2   :  { %9032 = vst [vmem:[#allocation30_spill] sm:$0xff] %v6151_v51  ;;  %v853_v58 = vpop.f32.mrf.mxu0  ;;  %v1206_v43 = vpop.f32.mrf.mxu1  ;;  %4388 = vtanh.f32 %v844_v57 }
  0xf3   :  { %v6156_v1 = vpop.eup %4382  ;;  %v6158_v25 = vpop.permute.xlu1 %310  ;;  %4116 = vmatmul.mubr.msk.bf16.gmra.mxu0 %vm673_vm8, %v4252_v62  ;;  %4149 = vmatmul.mubr.msk.bf16.gmra.mxu1 %vm673_vm8, %v4252_v62  ;;  %v1926_v62 = vld [vmem:[%s8734_s4 + $0xa8] sm:$0xff]  ;;  %4390 = vtanh.f32 %v1197_v24  ;;  %v854_v60 = vadd.f32 %v853_v58, %v5947_v45  ;;  %v1207_v5 = vadd.f32 %v1206_v43, %v5947_v45  ;;  %v1924_v24 = vld [vmem:[%s8734_s4 + $0x98] sm:$0xff]  ;;  %v1923_v58 = vld [vmem:[%s8734_s4 + $0x90] sm:$0xff] }
  0xf4   :  { %9033 = vst [vmem:[#allocation31_spill] sm:$0xff] %v6156_v1  ;;  %9034 = vst [vmem:[#allocation32_spill] sm:$0xff] %v6158_v25  ;;  %v857_v27 = vpop.f32.mrf.mxu0  ;;  %v1210_v26 = vpop.f32.mrf.mxu1  ;;  %2054 = vperm.xlu1 %4223, %v1928_v39   ;;  %2049 = vperm.xlu0 %4222, %v1927_v32   ;;  %v852_v32 = vadd.f32 %v851_v8, %v5947_v45  ;;  %4392 = vtanh.f32 %v850_v35 }
  0xf5   :  { %1105 = vmatprep.mubr.bf16.mxu0 %v9035_v10  ;;  %1458 = vmatprep.mubr.bf16.mxu1 %v9035_v10  ;;  %v6178_v0 = vpop.permute.xlu0 %295  ;;  %4394 = vtanh.f32 %v1203_v36  ;;  %v858_v57 = vadd.f32 %v857_v27, %v5922_v37  ;;  %v1211_v43 = vadd.f32 %v1210_v26, %v5922_v37 }
  0xf6   :  { %v859_v39 = vpop.f32.mrf.mxu0  ;;  %v1212_v59 = vpop.f32.mrf.mxu1  ;;  %4396 = vtanh.f32 %v852_v32 }
  0xf7   :  { %v6187_v8 = vpop.permute.xlu1 %300  ;;  %4398 = vtanh.f32 %v854_v60  ;;  %v1213_v27 = vadd.f32 %v1212_v59, %v5922_v37 }
  0xf8   :  { %v861_v29 = vpop.f32.mrf.mxu0  ;;  %v6185_v14 = vpop.f32.mrf.mxu1  ;;  %2044 = vperm.xlu1 %4223, %v1926_v62   ;;  %2039 = vperm.xlu0 %4222, %v1925_v56   ;;  %v860_v62 = vadd.f32 %v859_v39, %v5922_v37  ;;  %4400 = vtanh.f32 %v1207_v5  ;;  %v1922_v39 = vld [vmem:[%s8734_s4 + $0x88] sm:$0xff]  ;;  %v1921_v5 = vld [vmem:[%s8734_s4 + $0x80] sm:$0xff] }
  0xf9   :  { %v6205_v32 = vpop.permute.xlu0 %285  ;;  %4402 = vtanh.f32 %v858_v57  ;;  %v862_v26 = vadd.f32 %v861_v29, %v5926_v38  ;;  %v4254_v57 = vld [vmem:[%s8731_s1 + $0xf0] sm:$0xff]  }
  0xfa   :  { %v863_v35 = vpop.f32.mrf.mxu0  ;;  %v1216_v55 = vpop.f32.mrf.mxu1  ;;  %4404 = vtanh.f32 %v1211_v43 }
  0xfb   :  { %4117 = vmatmul.mubr.msk.bf16.gmra.mxu0 %vm673_vm8, %v4253_v11  ;;  %4150 = vmatmul.mubr.msk.bf16.gmra.mxu1 %vm673_vm8, %v4253_v11  ;;  %v864_v37 = vadd.f32 %v863_v35, %v5926_v38  ;;  %v6217_v60 = vpop.permute.xlu1 %290  ;;  %4406 = vtanh.f32 %v860_v62  ;;  %v1217_v29 = vadd.f32 %v1216_v55, %v5926_v38  ;;  %v6226_v43 = vpop.eup %4384  ;;  %v3995_v62 = vld [vmem:[#allocation2] sm:$0x1] }
  0xfc   :  { %v6201_v36 = vpop.f32.mrf.mxu0  ;;  %v6203_v56 = vpop.f32.mrf.mxu1  ;;  %2034 = vperm.xlu1 %4223, %v1924_v24   ;;  %2029 = vperm.xlu0 %4222, %v1923_v58   ;;  %4408 = vtanh.f32 %v1213_v27 }
  0xfd   :  { %1115 = vmatprep.mubr.bf16.mxu0 %v9035_v10  ;;  %1468 = vmatprep.mubr.bf16.mxu1 %v9035_v10  ;;  %4410 = vtanh.f32 %v862_v26  ;;  %v6229_v6 = vpop.eup %4386 }
  0xfe   :  { %v869_v11 = vpop.f32.mrf.mxu0  ;;  %v1222_v59 = vpop.f32.mrf.mxu1  ;;  %9036 = vst [vmem:[#allocation33_spill] sm:$0xff] %v6229_v6  ;;  %4412 = vtanh.f32 %v864_v37 }
  0xff   :  { %v870_v24 = vadd.f32 %v869_v11, %v5901_v30  ;;  %v1223_v35 = vadd.f32 %v1222_v59, %v5901_v30  ;;  %v6232_v2 = vpop.eup %4388  ;;  %v6234_v11 = vpop.permute.xlu0 %275  ;;  %4414 = vtanh.f32 %v1217_v29 }
 0x100   :  { %v871_v58 = vpop.f32.mrf.mxu0  ;;  %v6224_v46 = vpop.f32.mrf.mxu1  ;;  %2024 = vperm.xlu1 %4223, %v1922_v39   ;;  %2019 = vperm.xlu0 %4222, %v1921_v5   ;;  %9037 = vst [vmem:[#allocation34_spill] sm:$0xff] %v6234_v11 }
 0x101   :  { %v872_v55 = vadd.f32 %v871_v58, %v5911_v33  ;;  %v6239_v26 = vpop.eup %4390  ;;  %4416 = vtanh.f32 %v870_v24 }
 0x102   :  { %v873_v22 = vpop.f32.mrf.mxu0  ;;  %v1226_v27 = vpop.f32.mrf.mxu1  ;;  %9038 = vst [vmem:[#allocation35_spill] sm:$0xff] %v6239_v26  ;;  %4418 = vtanh.f32 %v1223_v35 }
 0x103   :  { %v874_v39 = vadd.f32 %v873_v22, %v5911_v33  ;;  %4118 = vmatmul.mubr.msk.bf16.gmra.mxu0 %vm673_vm8, %v4254_v57  ;;  %4151 = vmatmul.mubr.msk.bf16.gmra.mxu1 %vm673_vm8, %v4254_v57  ;;  %v1227_v5 = vadd.f32 %v1226_v27, %v5911_v33  ;;  %v6243_v58 = vpop.eup %4392  ;;  %v4255_v22 = vld [vmem:[%s8731_s1 + $0xf8] sm:$0xff]   ;;  %4420 = vtanh.f32 %v872_v55 }
 0x104   :  { %v877_v37 = vpop.f32.mrf.mxu0  ;;  %v1230_v59 = vpop.f32.mrf.mxu1  ;;  %3998 = vperm.xlu0 %4222, %v3995_v62   ;;  %1125 = vmatprep.mubr.bf16.mxu0 %v9035_v10 }
 0x105   :  { %v878_v29 = vadd.f32 %v877_v37, %v5874_v18  ;;  %1478 = vmatprep.mubr.bf16.mxu1 %v9035_v10  ;;  %v6250_v57 = vpop.eup %4394  ;;  %v1231_v24 = vadd.f32 %v1230_v59, %v5874_v18  ;;  %4422 = vtanh.f32 %v874_v39 }
 0x106   :  { %v879_v27 = vpop.f32.mrf.mxu0  ;;  %v1232_v62 = vpop.f32.mrf.mxu1  ;;  %4424 = vtanh.f32 %v1227_v5 }
 0x107   :  { %v6256_v35 = vpop.eup %4396  ;;  %v880_v10 = vadd.f32 %v879_v27, %v5874_v18  ;;  %v1233_v13 = vadd.f32 %v1232_v62, %v5874_v18  ;;  %4426 = vtanh.f32 %v878_v29 }
 0x108   :  { %v6259_v37 = vpop.eup %4398  ;;  %v881_v12 = vpop.f32.mrf.mxu0  ;;  %4428 = vtanh.f32 %v1231_v24 }
 0x109   :  { %v1234_v55 = vpop.f32.mrf.mxu1  ;;  %v6262_v40 = vpop.eup %4400  ;;  %v882_v59 = vadd.f32 %v881_v12, %v5891_v23  ;;  %4430 = vtanh.f32 %v880_v10 }
 0x10a   :  { %v6265_v7 = vpop.eup %4402  ;;  %v883_v9 = vpop.f32.mrf.mxu0  ;;  %4432 = vtanh.f32 %v1233_v13 }
 0x10b   :  { %v1236_v34 = vpop.f32.mrf.mxu1  ;;  %v6267_v39 = vpop.eup %4404  ;;  %v884_v27 = vadd.f32 %v883_v9, %v5891_v23  ;;  %4119 = vmatmul.mubr.msk.bf16.gmra.mxu0 %vm673_vm8, %v4255_v22  ;;  %4152 = vmatmul.mubr.msk.bf16.gmra.mxu1 %vm673_vm8, %v4255_v22  ;;  %4434 = vtanh.f32 %v882_v59 }
 0x10c   :  { %v1237_v5 = vadd.f32 %v1236_v34, %v5891_v23  ;;  %v6273_v18 = vpop.eup %4406  ;;  %v887_v12 = vpop.f32.mrf.mxu0  ;;  %2289 = vmatprep.mubr.bf16.mxu0 %v4258_v17  ;;  %2482 = vmatprep.mubr.bf16.mxu1 %v4258_v17 }
 0x10d   :  { %v1240_v29 = vpop.f32.mrf.mxu1  ;;  %v6275_v24 = vpop.eup %4408  ;;  %v888_v62 = vadd.f32 %v887_v12, %v5866_v15  ;;  %4436 = vtanh.f32 %v884_v27 }
 0x10e   :  { %v6278_v10 = vpop.eup %4410  ;;  %v889_v9 = vpop.f32.mrf.mxu0  ;;  %4438 = vtanh.f32 %v1237_v5 }
 0x10f   :  { %v1242_v34 = vpop.f32.mrf.mxu1  ;;  %v6280_v52 = vpop.eup %4412  ;;  %v890_v22 = vadd.f32 %v889_v9, %v5866_v15  ;;  %4440 = vtanh.f32 %v888_v62 }
 0x110   :  { %v1243_v13 = vadd.f32 %v1242_v34, %v5866_v15  ;;  %v6284_v28 = vpop.eup %4414  ;;  %v891_v17 = vpop.f32.mrf.mxu0  ;;  %v1241_v34 = vadd.f32 %v1240_v29, %v5866_v15 }
 0x111   :  { %v1244_v44 = vpop.f32.mrf.mxu1  ;;  %v6286_v59 = vpop.eup %4416  ;;  %4442 = vtanh.f32 %v890_v22  ;;  %v892_v12 = vadd.f32 %v891_v17, %v5886_v21  ;;  %v1235_v22 = vadd.f32 %v1234_v55, %v5891_v23 }
 0x112   :  { %v1245_v27 = vadd.f32 %v1244_v44, %v5886_v21  ;;  %v6290_v63 = vpop.eup %4418  ;;  %4444 = vtanh.f32 %v1243_v13  ;;  %v893_v5 = vpop.f32.mrf.mxu0 }
 0x113   :  { %v1246_v54 = vpop.f32.mrf.mxu1  ;;  %v6292_v9 = vpop.eup %4420  ;;  %4446 = vtanh.f32 %v892_v12  ;;  %v894_v62 = vadd.f32 %v893_v5, %v5886_v21 }
 0x114   :  { %v1247_v61 = vadd.f32 %v1246_v54, %v5886_v21  ;;  %v6297_v1 = vpop.eup %4422  ;;  %4448 = vtanh.f32 %v1245_v27  ;;  %v897_v44 = vpop.f32.mrf.mxu0 }
 0x115   :  { %v1250_v17 = vpop.f32.mrf.mxu1  ;;  %v6300_v53 = vpop.eup %4424  ;;  %4450 = vtanh.f32 %v894_v62  ;;  %v898_v13 = vadd.f32 %v897_v44, %v6234_v11 }
 0x116   :  { %v6303_v51 = vpop.eup %4426  ;;  %4452 = vtanh.f32 %v1247_v61  ;;  %v1251_v15 = vadd.f32 %v1250_v17, %v6234_v11  ;;  %v6306_v29 = vpop.f32.mrf.mxu0  ;;  %v1225_v61 = vadd.f32 %v6224_v46, %v5911_v33  ;;  %v1221_v11 = vadd.f32 %v6203_v56, %v5901_v30 }
 0x117   :  { %9039 = vst [vmem:[#allocation36_spill] sm:$0xff] %v6306_v29  ;;  %v6308_v21 = vpop.f32.mrf.mxu1  ;;  %v6310_v54 = vpop.eup %4428  ;;  %4454 = vtanh.f32 %v1241_v34  ;;  %v868_v34 = vadd.f32 %v6201_v36, %v5901_v30  ;;  %v1215_v46 = vadd.f32 %v6185_v14, %v5926_v38 }
 0x118   :  { %9040 = vst [vmem:[#allocation37_spill] sm:$0xff] %v6308_v21  ;;  %v6312_v23 = vpop.permute.xlu1 %280  ;;  %v6314_v55 = vpop.eup %4430  ;;  %4456 = vtanh.f32 %v1235_v22 }
 0x119   :  { %9041 = vst [vmem:[#allocation38_spill] sm:$0xff] %v6312_v23  ;;  %v901_v12 = vpop.f32.mrf.mxu0  ;;  %v1254_v27 = vpop.f32.mrf.mxu1  ;;  %4458 = vtanh.f32 %v898_v13 }
 0x11a   :  { %v6316_v5 = vpop.eup %4432  ;;  %v902_v62 = vadd.f32 %v901_v12, %v6312_v23  ;;  %v1255_v44 = vadd.f32 %v1254_v27, %v6312_v23  ;;  %4460 = vtanh.f32 %v1251_v15 }
 0x11b   :  { %v6322_v17 = vpop.eup %4434  ;;  %v6326_v21 = vpop.f32.mrf.mxu0 }
 0x11c   :  { %9042 = vst [vmem:[#allocation39_spill] sm:$0xff] %v6326_v21  ;;  %v6328_v22 = vpop.f32.mrf.mxu1  ;;  %v4437_v29 = vpop.eup %4436  ;;  %4462 = vtanh.f32 %v902_v62 }
 0x11d   :  { %9043 = vst [vmem:[#allocation40_spill] sm:$0xff] %v6328_v22  ;;  %v4439_v33 = vpop.eup %4438  ;;  %4464 = vtanh.f32 %v1255_v44  ;;  %v907_v13 = vpop.f32.mrf.mxu0  ;;  %v1205_v44 = vadd.f32 %v6136_v16, %v5947_v45  ;;  %v842_v45 = vadd.f32 %v6080_v19, %v5964_v50 }
 0x11e   :  { %v1260_v12 = vpop.f32.mrf.mxu1  ;;  %v4441_v27 = vpop.eup %4440  ;;  %4466 = vtanh.f32 %v1225_v61  ;;  %v908_v36 = vadd.f32 %v907_v13, %v6205_v32 }
 0x11f   :  { %v4443_v15 = vpop.eup %4442  ;;  %4468 = vtanh.f32 %v868_v34  ;;  %v1261_v22 = vadd.f32 %v1260_v12, %v6205_v32  ;;  %v909_v21 = vpop.f32.mrf.mxu0  ;;  %v848_v12 = vadd.f32 %v6108_v47, %v5939_v42  ;;  %v1195_v47 = vadd.f32 %v6082_v20, %v5964_v50 }
 0x120   :  { %v6336_v23 = vpop.f32.mrf.mxu1  ;;  %v4445_v30 = vpop.eup %4444  ;;  %4470 = vtanh.f32 %v1221_v11  ;;  %v1191_v50 = vadd.f32 %v6055_v4, %v5959_v48  ;;  %v1766_v4 = vpack.c.bf16 %v6297_v1, %v6286_v59 }
 0x121   :  { %9044 = vst [vmem:[#allocation41_spill] sm:$0xff] %v6336_v23  ;;  %v4447_v56 = vpop.eup %4446  ;;  %4472 = vtanh.f32 %v1215_v46  ;;  %v911_v62 = vpop.f32.mrf.mxu0  ;;  %v1201_v46 = vadd.f32 %v6110_v49, %v5939_v42  ;;  %v1770_v42 = vpack.c.bf16 %v4437_v29, %v6314_v55 }
 0x122   :  { %v1264_v38 = vpop.f32.mrf.mxu1  ;;  %v4449_v14 = vpop.eup %4448  ;;  %4474 = vtanh.f32 %v908_v36  ;;  %v912_v61 = vadd.f32 %v911_v62, %v6217_v60 }
 0x123   :  { %v1265_v34 = vadd.f32 %v1264_v38, %v6217_v60  ;;  %v4451_v13 = vpop.eup %4450  ;;  %4476 = vtanh.f32 %v1261_v22  ;;  %v913_v23 = vpop.f32.mrf.mxu0  ;;  %v1773_v38 = vpack.c.bf16 %v4447_v56, %v4441_v27 }
 0x124   :  { %v1266_v11 = vpop.f32.mrf.mxu1  ;;  %v4453_v41 = vpop.eup %4452  ;;  %4478 = vtanh.f32 %v912_v61  ;;  %v1774_v26 = vpack.c.bf16 %v4451_v13, %v4443_v15  ;;  %v838_v15 = vadd.f32 %v6053_v3, %v5959_v48  ;;  %v914_v1 = vadd.f32 %v913_v23, %v6217_v60 }
 0x125   :  { %v4455_v6 = vpop.eup %4454  ;;  %4480 = vtanh.f32 %v1265_v34  ;;  %v917_v16 = vpop.f32.mrf.mxu0  ;;  %v1776_v62 = vpack.c.bf16 %v4453_v41, %v4445_v30  ;;  %v1772_v41 = vpack.c.bf16 %v4439_v33, %v6316_v5  ;;  %v910_v30 = vadd.f32 %v909_v21, %v6205_v32 }
 0x126   :  { %v1270_v36 = vpop.f32.mrf.mxu1  ;;  %v4457_v25 = vpop.eup %4456  ;;  %4482 = vtanh.f32 %v1205_v44  ;;  %2257 = vmatprep.subr.bf16.mxu0 %v1774_v26  ;;  %v1775_v22 = vpack.c.bf16 %v4449_v14, %v4455_v6  ;;  %v1769_v26 = vpack.c.bf16 %v6322_v17, %v6303_v51  ;;  %v1768_v51 = vpack.c.bf16 %v6300_v53, %v6290_v63 }
 0x127   :  { %v6351_v49 = vpop.eup %4458  ;;  %4484 = vtanh.f32 %v848_v12  ;;  %2450 = vmatprep.subr.bf16.mxu1 %v1776_v62  ;;  %v919_v19 = vpop.f32.mrf.mxu0  ;;  %2258 = vmatpush1.bf16.msra.mxu0 %v1773_v38  ;;  %v1771_v48 = vpack.c.bf16 %v4457_v25, %v6310_v54  ;;  %v1267_v54 = vadd.f32 %v1266_v11, %v6217_v60  ;;  %v918_v13 = vadd.f32 %v917_v16, %v6178_v0 }
 0x128   :  { %9045 = vst [vmem:[#allocation42_spill] sm:$0xff] %v6351_v49  ;;  %v1272_v61 = vpop.f32.mrf.mxu1  ;;  %v6356_v27 = vpop.eup %4460  ;;  %4486 = vtanh.f32 %v1201_v46  ;;  %2451 = vmatpush1.bf16.msra.mxu1 %v1775_v22  ;;  %2259 = vmatprep.subr.bf16.mxu0 %v1770_v42  ;;  %v1762_v23 = vpack.c.bf16 %v6280_v52, %v6273_v18  ;;  %v1271_v60 = vadd.f32 %v1270_v36, %v6178_v0 }
 0x129   :  { %9046 = vst [vmem:[#allocation43_spill] sm:$0xff] %v6356_v27  ;;  %v6360_v6 = vpop.eup %4462  ;;  %4488 = vtanh.f32 %v842_v45  ;;  %2452 = vmatprep.subr.bf16.mxu1 %v1772_v41  ;;  %v921_v3 = vpop.f32.mrf.mxu0  ;;  %v920_v16 = vadd.f32 %v919_v19, %v6178_v0  ;;  %v1273_v18 = vadd.f32 %v1272_v61, %v6178_v0 }
 0x12a   :  { %9047 = vst [vmem:[#allocation44_spill] sm:$0xff] %v6360_v6  ;;  %v6362_v20 = vpop.f32.mrf.mxu1  ;;  %v6366_v29 = vpop.eup %4464  ;;  %4490 = vtanh.f32 %v1195_v47  ;;  %v922_v42 = vadd.f32 %v921_v3, %v6187_v8 }
 0x12b   :  { %9048 = vst [vmem:[#allocation45_spill] sm:$0xff] %v6366_v29  ;;  %v6368_v55 = vpop.permute.xlu0 %425  ;;  %v4467_v33 = vpop.eup %4466  ;;  %4492 = vtanh.f32 %v838_v15  ;;  %2260 = vmatpush1.bf16.msra.mxu0 %v1769_v26 }
 0x12c   :  { %9049 = vst [vmem:[#allocation46_spill] sm:$0xff] %v6368_v55  ;;  %v923_v56 = vpop.f32.mrf.mxu0  ;;  %v1276_v14 = vpop.f32.mrf.mxu1  ;;  %4494 = vtanh.f32 %v1191_v50  ;;  %2453 = vmatpush1.bf16.msra.mxu1 %v1771_v48  ;;  %2261 = vmatprep.subr.bf16.mxu0 %v1766_v4 }
 0x12d   :  { %v4469_v25 = vpop.eup %4468  ;;  %2454 = vmatprep.subr.bf16.mxu1 %v1768_v51  ;;  %v6387_v63 = vpop.permute.xlu1 %430  ;;  %4496 = vtanh.f32 %v910_v30  ;;  %v924_v61 = vadd.f32 %v923_v56, %v6187_v8 }
 0x12e   :  { %v4471_v59 = vpop.eup %4470  ;;  %v6382_v21 = vpop.f32.mrf.mxu0  ;;  %v1765_v34 = vpack.c.bf16 %v6292_v9, %v4469_v25  ;;  %9050 = vst [vmem:[#allocation47_spill] sm:$0xff] %v6387_v63  ;;  %v1764_v9 = vpack.c.bf16 %v6284_v28, %v6275_v24  ;;  %4498 = vtanh.f32 %v914_v1  ;;  %v1761_v28 = vpack.c.bf16 %v6278_v10, %v6265_v7  ;;  %v9058_v25 = vld [vmem:[#allocation32_spill] sm:$0xff] }
 0x12f   :  { %v6384_v44 = vpop.f32.mrf.mxu1  ;;  %v4473_v53 = vpop.eup %4472  ;;  %v1767_v12 = vpack.c.bf16 %v4467_v33, %v4471_v59  ;;  %4500 = vtanh.f32 %v1267_v54  ;;  %v1758_v24 = vpack.c.bf16 %v6259_v37, %v6243_v58  ;;  %v1760_v7 = vpack.c.bf16 %v6262_v40, %v6250_v57 }
 0x130   :  { %v6392_v46 = vpop.eup %4474  ;;  %v929_v11 = vpop.f32.mrf.mxu0  ;;  %2262 = vmatpush1.bf16.msra.mxu0 %v1765_v34  ;;  %4502 = vtanh.f32 %v918_v13  ;;  %v1763_v15 = vpack.c.bf16 %v4473_v53, %v6267_v39  ;;  %v1277_v39 = vadd.f32 %v1276_v14, %v6187_v8  ;;  %v1754_v14 = vpack.c.bf16 %v6232_v2, %v6226_v43  ;;  %v9059_v34 = vld [vmem:[#allocation33_spill] sm:$0xff]  ;;  %v9060_v53 = vld [vmem:[#allocation35_spill] sm:$0xff] }
 0x131   :  { %9051 = vst [vmem:[#allocation48_spill] sm:$0xff] %v6392_v46  ;;  %v1282_v45 = vpop.f32.mrf.mxu1  ;;  %v6397_v62 = vpop.eup %4476  ;;  %2455 = vmatpush1.bf16.msra.mxu1 %v1767_v12  ;;  %2263 = vmatprep.subr.bf16.mxu0 %v1762_v23  ;;  %4504 = vtanh.f32 %v1271_v60  ;;  %v930_v26 = vadd.f32 %v929_v11, %v6140_v31 }
 0x132   :  { %9052 = vst [vmem:[#allocation49_spill] sm:$0xff] %v6397_v62  ;;  %v6399_v38 = vpop.permute.xlu0 %415  ;;  %v6402_v52 = vpop.eup %4478  ;;  %2456 = vmatprep.subr.bf16.mxu1 %v1764_v9  ;;  %4506 = vtanh.f32 %v920_v16  ;;  %v1283_v30 = vadd.f32 %v1282_v45, %v6140_v31  ;;  %v9062_v9 = vld [vmem:[#allocation22_spill] sm:$0xff] }
 0x133   :  { %9053 = vst [vmem:[#allocation50_spill] sm:$0xff] %v6399_v38  ;;  %9054 = vst [vmem:[#allocation51_spill] sm:$0xff] %v6402_v52  ;;  %v931_v36 = vpop.f32.mrf.mxu0  ;;  %v6405_v47 = vpop.f32.mrf.mxu1  ;;  %4508 = vtanh.f32 %v1273_v18 }
 0x134   :  { %v6411_v22 = vpop.eup %4480  ;;  %2264 = vmatpush1.bf16.msra.mxu0 %v1761_v28  ;;  %v6422_v10 = vpop.permute.xlu1 %420  ;;  %4510 = vtanh.f32 %v922_v42  ;;  %v932_v1 = vadd.f32 %v931_v36, %v9058_v25 }
 0x135   :  { %9055 = vst [vmem:[#allocation52_spill] sm:$0xff] %v6411_v22  ;;  %v4483_v19 = vpop.eup %4482  ;;  %v933_v41 = vpop.f32.mrf.mxu0  ;;  %9056 = vst [vmem:[#allocation53_spill] sm:$0xff] %v6422_v10  ;;  %2457 = vmatpush1.bf16.msra.mxu1 %v1763_v15  ;;  %2265 = vmatprep.subr.bf16.mxu0 %v1758_v24  ;;  %4512 = vtanh.f32 %v924_v61  ;;  %v9065_v61 = vld [vmem:[#allocation30_spill] sm:$0xff] }
 0x136   :  { %v1286_v50 = vpop.f32.mrf.mxu1  ;;  %v4485_v37 = vpop.eup %4484  ;;  %2458 = vmatprep.subr.bf16.mxu1 %v1760_v7  ;;  %4514 = vtanh.f32 %v1277_v39  ;;  %v934_v12 = vadd.f32 %v933_v41, %v9058_v25  ;;  %v9066_v41 = vld [vmem:[#allocation26_spill] sm:$0xff]  ;;  %v9069_v39 = vld [vmem:[#allocation31_spill] sm:$0xff] }
 0x137   :  { %v4487_v3 = vpop.eup %4486  ;;  %v937_v48 = vpop.f32.mrf.mxu0  ;;  %v1757_v40 = vpack.c.bf16 %v6256_v35, %v4485_v37  ;;  %v1756_v35 = vpack.c.bf16 %v9060_v53, %v9059_v34  ;;  %4516 = vtanh.f32 %v930_v26  ;;  %v1287_v2 = vadd.f32 %v1286_v50, %v9058_v25 }
 0x138   :  { %v1290_v4 = vpop.f32.mrf.mxu1  ;;  %v4489_v57 = vpop.eup %4488  ;;  %v1759_v56 = vpack.c.bf16 %v4483_v19, %v4487_v3  ;;  %4518 = vtanh.f32 %v1283_v30  ;;  %v938_v16 = vadd.f32 %v937_v48, %v9062_v9  ;;  %v9067_v50 = vpack.c.bf16 %v9065_v61, %v9066_v41  ;;  %v9070_v3 = vld [vmem:[#allocation27_spill] sm:$0xff]  ;;  %v9088_v61 = vld [vmem:[#allocation16_spill] sm:$0xff] }
 0x139   :  { %v6427_v33 = vpop.permute.xlu0 %405  ;;  %v4491_v51 = vpop.eup %4490  ;;  %2266 = vmatpush1.bf16.msra.mxu0 %v1757_v40  ;;  %4520 = vtanh.f32 %v932_v1  ;;  %v1291_v36 = vadd.f32 %v1290_v4, %v9062_v9  ;;  %v9071_v26 = vpack.c.bf16 %v9069_v39, %v9070_v3 }
 0x13a   :  { %9057 = vst [vmem:[#allocation54_spill] sm:$0xff] %v6427_v33  ;;  %v939_v59 = vpop.f32.mrf.mxu0  ;;  %v1292_v54 = vpop.f32.mrf.mxu1  ;;  %2459 = vmatpush1.bf16.msra.mxu1 %v1759_v56  ;;  %2267 = vmatprep.subr.bf16.mxu0 %v1754_v14  ;;  %4522 = vtanh.f32 %v934_v12  ;;  %v9080_v12 = vld [vmem:[#allocation29_spill] sm:$0xff] }
 0x13b   :  { %v4493_v13 = vpop.eup %4492  ;;  %2460 = vmatprep.subr.bf16.mxu1 %v1756_v35  ;;  %v6439_v45 = vpop.permute.xlu1 %410  ;;  %v940_v19 = vadd.f32 %v939_v59, %v9062_v9  ;;  %4524 = vtanh.f32 %v1287_v2  ;;  %v1293_v37 = vadd.f32 %v1292_v54, %v9062_v9  ;;  %v9075_v59 = vld [vmem:[#allocation28_spill] sm:$0xff]  ;;  %v9076_v54 = vld [vmem:[#allocation23_spill] sm:$0xff] }
 0x13c   :  { %v4495_v23 = vpop.eup %4494  ;;  %v941_v43 = vpop.f32.mrf.mxu0  ;;  %v1753_v11 = vpack.c.bf16 %v4489_v57, %v4493_v13  ;;  %9061 = vst [vmem:[#allocation32_spill] sm:$0xff] %v6439_v45  ;;  %4526 = vtanh.f32 %v938_v16  ;;  %v9073_v57 = vld [vmem:[#allocation25_spill] sm:$0xff]  ;;  %v9077_v34 = vpack.c.bf16 %v9075_v59, %v9076_v54 }
 0x13d   :  { %v6437_v60 = vpop.f32.mrf.mxu1  ;;  %v1755_v18 = vpack.c.bf16 %v4491_v51, %v4495_v23  ;;  %v6443_v42 = vpop.eup %4496  ;;  %v942_v30 = vadd.f32 %v941_v43, %v9073_v57  ;;  %4528 = vtanh.f32 %v1291_v36  ;;  %v9081_v23 = vld [vmem:[#allocation24_spill] sm:$0xff] }
 0x13e   :  { %v943_v28 = vpop.f32.mrf.mxu0  ;;  %2268 = vmatpush1.bf16.msra.mxu0 %v1753_v11  ;;  %9063 = vst [vmem:[#allocation33_spill] sm:$0xff] %v6443_v42  ;;  %v6445_v15 = vpop.permute.xlu0 %395  ;;  %v9082_v2 = vpack.c.bf16 %v9080_v12, %v9081_v23  ;;  %v9083_v43 = vld [vmem:[#allocation20_spill] sm:$0xff]  ;;  %v9084_v11 = vld [vmem:[#allocation15_spill] sm:$0xff] }
 0x13f   :  { %v1296_v24 = vpop.f32.mrf.mxu1  ;;  %9064 = vst [vmem:[#allocation35_spill] sm:$0xff] %v6445_v15  ;;  %2461 = vmatpush1.bf16.msra.mxu1 %v1755_v18  ;;  %2269 = vmatprep.subr.bf16.mxu0 %v9067_v50  ;;  %v6451_v7 = vpop.eup %4498  ;;  %v944_v14 = vadd.f32 %v943_v28, %v9073_v57  ;;  %4530 = vtanh.f32 %v940_v19  ;;  %v9085_v9 = vpack.c.bf16 %v9083_v43, %v9084_v11  ;;  %v9086_v18 = vld [vmem:[#allocation14_spill] sm:$0xff]  ;;  %v9087_v28 = vld [vmem:[#allocation21_spill] sm:$0xff]  ;;  %v9093_v12 = vld [vmem:[#allocation12_spill] sm:$0xff] }
 0x140   :  { %9068 = vst [vmem:[#allocation22_spill] sm:$0xff] %v6451_v7  ;;  %2462 = vmatprep.subr.bf16.mxu1 %v9071_v26  ;;  %v6457_v48 = vpop.f32.mrf.mxu0  ;;  %v6461_v40 = vpop.eup %4500  ;;  %v1297_v13 = vadd.f32 %v1296_v24, %v9073_v57  ;;  %4532 = vtanh.f32 %v1293_v37  ;;  %v9089_v41 = vpack.c.bf16 %v9087_v28, %v9088_v61  ;;  %v9091_v37 = vld [vmem:[#allocation17_spill] sm:$0xff]  ;;  %v9095_v11 = vld [vmem:[#allocation19_spill] sm:$0xff]  ;;  %v1281_v7 = vadd.f32 %v6384_v44, %v6140_v31 }
 0x141   :  { %v6459_v4 = vpop.f32.mrf.mxu1  ;;  %9072 = vst [vmem:[#allocation30_spill] sm:$0xff] %v6461_v40  ;;  %v6464_v56 = vpop.eup %4502  ;;  %4534 = vtanh.f32 %v942_v30  ;;  %v9096_v30 = vld [vmem:[#allocation13_spill] sm:$0xff] }
 0x142   :  { %9074 = vst [vmem:[#allocation26_spill] sm:$0xff] %v6464_v56  ;;  %v949_v51 = vpop.f32.mrf.mxu0  ;;  %2270 = vmatpush1.bf16.msra.mxu0 %v9077_v34  ;;  %v6470_v53 = vpop.eup %4504  ;;  %4536 = vtanh.f32 %v944_v14  ;;  %v9092_v34 = vld [vmem:[#allocation18_spill] sm:$0xff] }
 0x143   :  { %v1302_v1 = vpop.f32.mrf.mxu1  ;;  %9078 = vst [vmem:[#allocation31_spill] sm:$0xff] %v6470_v53  ;;  %v6472_v35 = vpop.permute.xlu1 %400  ;;  %2463 = vmatpush1.bf16.msra.mxu1 %v9082_v2  ;;  %2271 = vmatprep.subr.bf16.mxu0 %v9085_v9  ;;  %v950_v36 = vadd.f32 %v949_v51, %v9086_v18  ;;  %v9094_v23 = vpack.c.bf16 %v9092_v34, %v9093_v12  ;;  %v9099_v34 = vld [vmem:[#allocation10_spill] sm:$0xff] }
 0x144   :  { %9079 = vst [vmem:[#allocation27_spill] sm:$0xff] %v6472_v35  ;;  %v6481_v16 = vpop.eup %4506  ;;  %2464 = vmatprep.subr.bf16.mxu1 %v9089_v41  ;;  %v951_v19 = vpop.f32.mrf.mxu0  ;;  %v1303_v3 = vadd.f32 %v1302_v1, %v9086_v18  ;;  %4538 = vtanh.f32 %v1297_v13  ;;  %v9097_v9 = vpack.c.bf16 %v9095_v11, %v9096_v30 }
 0x145   :  { %v6487_v50 = vpop.f32.mrf.mxu1  ;;  %v6489_v24 = vpop.eup %4508  ;;  %v952_v59 = vadd.f32 %v951_v19, %v9091_v37  ;;  %4540 = vtanh.f32 %v950_v36 }
 0x146   :  { %v6491_v39 = vpop.permute.xlu0 %385  ;;  %v6494_v26 = vpop.eup %4510  ;;  %2272 = vmatpush1.bf16.msra.mxu0 %v9094_v23  ;;  %4542 = vtanh.f32 %v1303_v3 }
 0x147   :  { %9090 = vst [vmem:[#allocation25_spill] sm:$0xff] %v6494_v26  ;;  %v953_v51 = vpop.f32.mrf.mxu0  ;;  %v1306_v54 = vpop.f32.mrf.mxu1  ;;  %2465 = vmatpush1.bf16.msra.mxu1 %v9097_v9 }
 0x148   :  { %v6500_v2 = vpop.eup %4512  ;;  %v954_v43 = vadd.f32 %v953_v51, %v9091_v37  ;;  %v1307_v14 = vadd.f32 %v1306_v54, %v9091_v37  ;;  %v6511_v19 = vpop.permute.xlu1 %390  ;;  %4544 = vtanh.f32 %v952_v59  ;;  %v9100_v59 = vld [vmem:[#allocation11_spill] sm:$0xff] }
 0x149   :  { %v6506_v1 = vpop.eup %4514  ;;  %v957_v28 = vpop.f32.mrf.mxu0 }
 0x14a   :  { %9098 = vst [vmem:[#allocation28_spill] sm:$0xff] %v6506_v1  ;;  %v1310_v61 = vpop.f32.mrf.mxu1  ;;  %v6509_v41 = vpop.eup %4516  ;;  %v958_v13 = vadd.f32 %v957_v28, %v9099_v34  ;;  %4546 = vtanh.f32 %v954_v43 }
 0x14b   :  { %v6514_v12 = vpop.eup %4518  ;;  %v1311_v51 = vadd.f32 %v1310_v61, %v9099_v34  ;;  %v959_v23 = vpop.f32.mrf.mxu0  ;;  %4548 = vtanh.f32 %v1307_v14 }
 0x14c   :  { %v1312_v11 = vpop.f32.mrf.mxu1  ;;  %v6517_v30 = vpop.eup %4520  ;;  %v960_v54 = vadd.f32 %v959_v23, %v9099_v34  ;;  %4550 = vtanh.f32 %v958_v13 }
 0x14d   :  { %v6519_v36 = vpop.permute.xlu0 %375  ;;  %v6522_v9 = vpop.eup %4522  ;;  %v1313_v3 = vadd.f32 %v1312_v11, %v9099_v34  ;;  %4552 = vtanh.f32 %v1311_v51  ;;  %v9101_v51 = vld [vmem:[#allocation8_spill] sm:$0xff] }
 0x14e   :  { %v961_v28 = vpop.f32.mrf.mxu0  ;;  %v1314_v17 = vpop.f32.mrf.mxu1  ;;  %4554 = vtanh.f32 %v960_v54 }
 0x14f   :  { %v6525_v5 = vpop.eup %4524  ;;  %v962_v61 = vadd.f32 %v961_v28, %v9100_v59  ;;  %v6532_v23 = vpop.permute.xlu1 %380  ;;  %4556 = vtanh.f32 %v1313_v3 }
 0x150   :  { %v6528_v58 = vpop.eup %4526  ;;  %v963_v0 = vpop.f32.mrf.mxu0 }
 0x151   :  { %v1316_v63 = vpop.f32.mrf.mxu1  ;;  %v6530_v43 = vpop.eup %4528  ;;  %v964_v14 = vadd.f32 %v963_v0, %v9100_v59  ;;  %4558 = vtanh.f32 %v962_v61 }
 0x152   :  { %v1317_v34 = vadd.f32 %v1316_v63, %v9100_v59  ;;  %v6536_v11 = vpop.eup %4530  ;;  %v967_v13 = vpop.f32.mrf.mxu0 }
 0x153   :  { %v1320_v55 = vpop.f32.mrf.mxu1  ;;  %v6538_v28 = vpop.eup %4532  ;;  %v968_v38 = vadd.f32 %v967_v13, %v9101_v51  ;;  %4560 = vtanh.f32 %v964_v14  ;;  %v9102_v14 = vld [vmem:[#allocation9_spill] sm:$0xff] }
 0x154   :  { %v6540_v10 = vpop.permute.xlu0 %365  ;;  %v6543_v27 = vpop.eup %4534  ;;  %4562 = vtanh.f32 %v1317_v34 }
 0x155   :  { %v969_v54 = vpop.f32.mrf.mxu0  ;;  %v1322_v29 = vpop.f32.mrf.mxu1  ;;  %4564 = vtanh.f32 %v968_v38  ;;  %v1321_v38 = vadd.f32 %v1320_v55, %v9101_v51 }
 0x156   :  { %v6545_v0 = vpop.eup %4536  ;;  %v970_v63 = vadd.f32 %v969_v54, %v9101_v51  ;;  %v1323_v3 = vadd.f32 %v1322_v29, %v9101_v51  ;;  %v6553_v13 = vpop.permute.xlu1 %370 }
 0x157   :  { %v6549_v49 = vpop.eup %4538  ;;  %v971_v6 = vpop.f32.mrf.mxu0 }
 0x158   :  { %v1324_v45 = vpop.f32.mrf.mxu1  ;;  %v6551_v61 = vpop.eup %4540  ;;  %4566 = vtanh.f32 %v970_v63  ;;  %v972_v33 = vadd.f32 %v971_v6, %v9102_v14  ;;  %v1315_v6 = vadd.f32 %v1314_v17, %v9100_v59 }
 0x159   :  { %v1325_v62 = vadd.f32 %v1324_v45, %v9102_v14  ;;  %v6557_v22 = vpop.eup %4542  ;;  %4568 = vtanh.f32 %v1323_v3  ;;  %v973_v34 = vpop.f32.mrf.mxu0 }
 0x15a   :  { %v1326_v54 = vpop.f32.mrf.mxu1  ;;  %v6559_v29 = vpop.eup %4544  ;;  %4570 = vtanh.f32 %v972_v33  ;;  %v974_v52 = vadd.f32 %v973_v34, %v9102_v14 }
 0x15b   :  { %v6561_v46 = vpop.permute.xlu0 %355  ;;  %v1327_v63 = vadd.f32 %v1326_v54, %v9102_v14  ;;  %v6566_v35 = vpop.eup %4546  ;;  %4572 = vtanh.f32 %v1325_v62  ;;  %v1305_v54 = vadd.f32 %v6487_v50, %v9091_v37  ;;  %v1295_v50 = vadd.f32 %v6437_v60, %v9073_v57 }
 0x15c   :  { %9103 = vst [vmem:[#allocation23_spill] sm:$0xff] %v6561_v46  ;;  %v977_v45 = vpop.f32.mrf.mxu0  ;;  %v1330_v3 = vpop.f32.mrf.mxu1  ;;  %4574 = vtanh.f32 %v974_v52 }
 0x15d   :  { %v6569_v40 = vpop.eup %4548  ;;  %v978_v53 = vadd.f32 %v977_v45, %v6561_v46  ;;  %4576 = vtanh.f32 %v1327_v63  ;;  %v1331_v55 = vadd.f32 %v1330_v3, %v6561_v46  ;;  %v6581_v17 = vpop.permute.xlu1 %360  ;;  %v1301_v46 = vadd.f32 %v6459_v4, %v9086_v18 }
 0x15e   :  { %v6572_v15 = vpop.eup %4550  ;;  %v6575_v33 = vpop.f32.mrf.mxu0  ;;  %9106 = vst [vmem:[#allocation20_spill] sm:$0xff] %v6581_v17  ;;  %4578 = vtanh.f32 %v1321_v38  ;;  %v948_v38 = vadd.f32 %v6457_v48, %v9086_v18 }
 0x15f   :  { %9104 = vst [vmem:[#allocation29_spill] sm:$0xff] %v6575_v33  ;;  %v6577_v51 = vpop.f32.mrf.mxu1  ;;  %v6579_v14 = vpop.eup %4552  ;;  %4580 = vtanh.f32 %v1315_v6 }
 0x160   :  { %9105 = vst [vmem:[#allocation24_spill] sm:$0xff] %v6577_v51  ;;  %v6583_v62 = vpop.eup %4554  ;;  %v981_v52 = vpop.f32.mrf.mxu0  ;;  %4582 = vtanh.f32 %v978_v53 }
 0x161   :  { %v1334_v59 = vpop.f32.mrf.mxu1  ;;  %v6585_v34 = vpop.eup %4556  ;;  %v982_v63 = vadd.f32 %v981_v52, %v6581_v17  ;;  %4584 = vtanh.f32 %v1331_v55 }
 0x162   :  { %v1335_v45 = vadd.f32 %v1334_v59, %v6581_v17  ;;  %v6591_v3 = vpop.eup %4558  ;;  %v6595_v51 = vpop.f32.mrf.mxu0 }
 0x163   :  { %9107 = vst [vmem:[#allocation15_spill] sm:$0xff] %v6595_v51  ;;  %v6597_v6 = vpop.f32.mrf.mxu1  ;;  %v4561_v33 = vpop.eup %4560  ;;  %4586 = vtanh.f32 %v982_v63 }
 0x164   :  { %9108 = vst [vmem:[#allocation14_spill] sm:$0xff] %v6597_v6  ;;  %v4563_v53 = vpop.eup %4562  ;;  %4588 = vtanh.f32 %v1335_v45  ;;  %v987_v37 = vpop.f32.mrf.mxu0  ;;  %v1802_v56 = vpack.c.bf16 %v4561_v33, %v6583_v62  ;;  %v9113_v33 = vld [vmem:[#allocation38_spill] sm:$0xff]  ;;  %v9114_v62 = vld [vmem:[#allocation39_spill] sm:$0xff] }
 0x165   :  { %v1340_v52 = vpop.f32.mrf.mxu1  ;;  %v4565_v59 = vpop.eup %4564  ;;  %4590 = vtanh.f32 %v1305_v54  ;;  %v988_v48 = vadd.f32 %v987_v37, %v6540_v10  ;;  %v1285_v54 = vadd.f32 %v6405_v47, %v9058_v25 }
 0x166   :  { %v4567_v55 = vpop.eup %4566  ;;  %4592 = vtanh.f32 %v948_v38  ;;  %v1341_v6 = vadd.f32 %v1340_v52, %v6540_v10  ;;  %v6605_v51 = vpop.f32.mrf.mxu0  ;;  %v928_v52 = vadd.f32 %v6382_v21, %v6140_v31 }
 0x167   :  { %v6607_v17 = vpop.f32.mrf.mxu1  ;;  %v4569_v4 = vpop.eup %4568  ;;  %4594 = vtanh.f32 %v1301_v46 }
 0x168   :  { %9109 = vst [vmem:[#allocation21_spill] sm:$0xff] %v6607_v17  ;;  %v4571_v18 = vpop.eup %4570  ;;  %4596 = vtanh.f32 %v1295_v50  ;;  %v991_v60 = vpop.f32.mrf.mxu0 }
 0x169   :  { %v1344_v57 = vpop.f32.mrf.mxu1  ;;  %v4573_v63 = vpop.eup %4572  ;;  %4598 = vtanh.f32 %v988_v48  ;;  %v992_v45 = vadd.f32 %v991_v60, %v6553_v13  ;;  %v1275_v48 = vadd.f32 %v6362_v20, %v6187_v8  ;;  %v1804_v20 = vpack.c.bf16 %v4563_v53, %v6585_v34 }
 0x16a   :  { %v1345_v38 = vadd.f32 %v1344_v57, %v6553_v13  ;;  %v4575_v37 = vpop.eup %4574  ;;  %4600 = vtanh.f32 %v1341_v6  ;;  %v6615_v17 = vpop.f32.mrf.mxu0  ;;  %v1805_v6 = vpack.c.bf16 %v4571_v18, %v4565_v59  ;;  %v9115_v18 = vld [vmem:[#allocation41_spill] sm:$0xff]  ;;  %v1801_v34 = vpack.c.bf16 %v6591_v3, %v6572_v15 }
 0x16b   :  { %v6617_v46 = vpop.f32.mrf.mxu1  ;;  %v4577_v50 = vpop.eup %4576  ;;  %4602 = vtanh.f32 %v992_v45  ;;  %v1806_v47 = vpack.c.bf16 %v4575_v37, %v4567_v55 }
 0x16c   :  { %v4579_v25 = vpop.eup %4578  ;;  %4604 = vtanh.f32 %v1345_v38  ;;  %v997_v60 = vpop.f32.mrf.mxu0  ;;  %v1808_v21 = vpack.c.bf16 %v4577_v50, %v4569_v4  ;;  %v904_v4 = vadd.f32 %v9114_v62, %v9113_v33  ;;  %v1798_v38 = vpack.c.bf16 %v6566_v35, %v6551_v61  ;;  %v9120_v35 = vld [vmem:[#allocation36_spill] sm:$0xff] }
 0x16d   :  { %v6623_v57 = vpop.f32.mrf.mxu1  ;;  %v4581_v42 = vpop.eup %4580  ;;  %4606 = vtanh.f32 %v1285_v54  ;;  %2273 = vmatprep.subr.bf16.mxu0 %v1806_v47  ;;  %v1807_v26 = vpack.c.bf16 %v4573_v63, %v4579_v25  ;;  %v998_v31 = vadd.f32 %v997_v60, %v6519_v36  ;;  %v1263_v63 = vadd.f32 %v9115_v18, %v6205_v32  ;;  %v9119_v25 = vld [vmem:[#allocation34_spill] sm:$0xff]  ;;  %v9121_v60 = vld [vmem:[#allocation37_spill] sm:$0xff] }
 0x16e   :  { %v6626_v1 = vpop.eup %4582  ;;  %4608 = vtanh.f32 %v928_v52  ;;  %2466 = vmatprep.subr.bf16.mxu1 %v1808_v21  ;;  %v6629_v44 = vpop.f32.mrf.mxu0  ;;  %2274 = vmatpush2.bf16.msra.mxu0 %v1805_v6  ;;  %v9118_v52 = vld [vmem:[#allocation40_spill] sm:$0xff]  ;;  %v1800_v47 = vpack.c.bf16 %v6569_v40, %v6557_v22  ;;  %v900_v61 = vadd.f32 %v9120_v35, %v9119_v25  ;;  %v1253_v21 = vadd.f32 %v9121_v60, %v9119_v25  ;;  %v9162_v32 = vld [vmem:[#allocation50_spill] sm:$0xff] }
 0x16f   :  { %9110 = vst [vmem:[#allocation16_spill] sm:$0xff] %v6626_v1  ;;  %v6631_v8 = vpop.f32.mrf.mxu1  ;;  %v6634_v59 = vpop.eup %4584  ;;  %4610 = vtanh.f32 %v1281_v7  ;;  %2467 = vmatpush2.bf16.msra.mxu1 %v1807_v26  ;;  %2275 = vmatprep.subr.bf16.mxu0 %v1802_v56  ;;  %v1803_v26 = vpack.c.bf16 %v4581_v42, %v6579_v14  ;;  %v1257_v50 = vadd.f32 %v9118_v52, %v9113_v33 }
 0x170   :  { %9111 = vst [vmem:[#allocation17_spill] sm:$0xff] %v6634_v59  ;;  %v6636_v55 = vpop.eup %4586  ;;  %4612 = vtanh.f32 %v1275_v48  ;;  %2468 = vmatprep.subr.bf16.mxu1 %v1804_v20  ;;  %v1001_v54 = vpop.f32.mrf.mxu0  ;;  %v990_v33 = vadd.f32 %v6605_v51, %v6540_v10  ;;  %v1794_v18 = vpack.c.bf16 %v6545_v0, %v6536_v11  ;;  %v1347_v11 = vadd.f32 %v6617_v46, %v6553_v13 }
 0x171   :  { %9112 = vst [vmem:[#allocation18_spill] sm:$0xff] %v6636_v55  ;;  %v6642_v45 = vpop.f32.mrf.mxu1  ;;  %v6646_v53 = vpop.eup %4588  ;;  %v1002_v56 = vadd.f32 %v1001_v54, %v6532_v23  ;;  %4614 = vtanh.f32 %v998_v31  ;;  %v1351_v51 = vadd.f32 %v6623_v57, %v6519_v36  ;;  %v4264_v57 = vld [vmem:[%s8735_s3 + $0x24] ss:$8 sps:$4 sm:$0xff]  }
 0x172   :  { %9116 = vst [vmem:[#allocation12_spill] sm:$0xff] %v6646_v53  ;;  %v6648_v7 = vpop.permute.xlu0 %505  ;;  %v4591_v37 = vpop.eup %4590  ;;  %2276 = vmatpush2.bf16.msra.mxu0 %v1801_v34 }
 0x173   :  { %9117 = vst [vmem:[#allocation19_spill] sm:$0xff] %v6648_v7  ;;  %v1003_v15 = vpop.f32.mrf.mxu0  ;;  %v1356_v3 = vpop.f32.mrf.mxu1  ;;  %4616 = vtanh.f32 %v1002_v56  ;;  %2469 = vmatpush2.bf16.msra.mxu1 %v1803_v26  ;;  %2277 = vmatprep.subr.bf16.mxu0 %v1798_v38 }
 0x174   :  { %v4593_v14 = vpop.eup %4592  ;;  %4618 = vtanh.f32 %v1263_v63  ;;  %2470 = vmatprep.subr.bf16.mxu1 %v1800_v47  ;;  %v6671_v20 = vpop.permute.xlu1 %510  ;;  %v994_v63 = vadd.f32 %v6615_v17, %v6553_v13  ;;  %v1000_v13 = vadd.f32 %v6629_v44, %v6519_v36 }
 0x175   :  { %v4595_v48 = vpop.eup %4594  ;;  %v6666_v6 = vpop.f32.mrf.mxu0  ;;  %v1797_v22 = vpack.c.bf16 %v6559_v29, %v4593_v14  ;;  %9122 = vst [vmem:[#allocation13_spill] sm:$0xff] %v6671_v20  ;;  %4620 = vtanh.f32 %v904_v4  ;;  %v1796_v29 = vpack.c.bf16 %v6549_v49, %v6538_v28  ;;  %v1793_v49 = vpack.c.bf16 %v6543_v27, %v6528_v58 }
 0x176   :  { %v6668_v31 = vpop.f32.mrf.mxu1  ;;  %v4597_v40 = vpop.eup %4596  ;;  %v1799_v62 = vpack.c.bf16 %v4591_v37, %v4595_v48  ;;  %4622 = vtanh.f32 %v1257_v50  ;;  %v1790_v28 = vpack.c.bf16 %v6522_v9, %v6509_v41  ;;  %v1004_v50 = vadd.f32 %v1003_v15, %v6532_v23 }
 0x177   :  { %v6677_v54 = vpop.eup %4598  ;;  %v1009_v34 = vpop.f32.mrf.mxu0  ;;  %2278 = vmatpush2.bf16.msra.mxu0 %v1797_v22  ;;  %4624 = vtanh.f32 %v900_v61  ;;  %v1795_v46 = vpack.c.bf16 %v4597_v40, %v6530_v43  ;;  %v1792_v58 = vpack.c.bf16 %v6525_v5, %v6514_v12  ;;  %v1357_v43 = vadd.f32 %v1356_v3, %v6532_v23 }
 0x178   :  { %9123 = vst [vmem:[#allocation10_spill] sm:$0xff] %v6677_v54  ;;  %v1362_v56 = vpop.f32.mrf.mxu1  ;;  %v6683_v4 = vpop.eup %4600  ;;  %2471 = vmatpush2.bf16.msra.mxu1 %v1799_v62  ;;  %2279 = vmatprep.subr.bf16.mxu0 %v1794_v18  ;;  %4626 = vtanh.f32 %v1253_v21  ;;  %v1010_v15 = vadd.f32 %v1009_v34, %v6491_v39  ;;  %v1786_v3 = vpack.c.bf16 %v6500_v2, %v6481_v16 }
 0x179   :  { %9124 = vst [vmem:[#allocation11_spill] sm:$0xff] %v6683_v4  ;;  %v6685_v26 = vpop.permute.xlu0 %495  ;;  %v6689_v0 = vpop.eup %4602  ;;  %2472 = vmatprep.subr.bf16.mxu1 %v1796_v29  ;;  %4628 = vtanh.f32 %v990_v33  ;;  %v1363_v48 = vadd.f32 %v1362_v56, %v6491_v39  ;;  %v9130_v33 = vld [vmem:[#allocation28_spill] sm:$0xff]  ;;  %v9133_v56 = vld [vmem:[#allocation26_spill] sm:$0xff]  ;;  %v9134_v29 = vld [vmem:[#allocation25_spill] sm:$0xff] }
 0x17a   :  { %9125 = vst [vmem:[#allocation8_spill] sm:$0xff] %v6685_v26  ;;  %9126 = vst [vmem:[#allocation9_spill] sm:$0xff] %v6689_v0  ;;  %v1011_v17 = vpop.f32.mrf.mxu0  ;;  %v6693_v38 = vpop.f32.mrf.mxu1  ;;  %4630 = vtanh.f32 %v994_v63  ;;  %v1788_v62 = vpack.c.bf16 %v9130_v33, %v6489_v24  ;;  %v9135_v24 = vld [vmem:[#allocation33_spill] sm:$0xff]  ;;  %v9142_v33 = vld [vmem:[#allocation27_spill] sm:$0xff] }
 0x17b   :  { %v6699_v37 = vpop.eup %4604  ;;  %2280 = vmatpush2.bf16.msra.mxu0 %v1793_v49  ;;  %v6711_v44 = vpop.permute.xlu1 %500  ;;  %4632 = vtanh.f32 %v1347_v11  ;;  %v1012_v21 = vadd.f32 %v1011_v17, %v6511_v19  ;;  %v1785_v11 = vpack.c.bf16 %v9134_v29, %v9133_v56 }
 0x17c   :  { %9127 = vst [vmem:[#allocation38_spill] sm:$0xff] %v6699_v37  ;;  %v4607_v52 = vpop.eup %4606  ;;  %v1013_v47 = vpop.f32.mrf.mxu0  ;;  %9128 = vst [vmem:[#allocation39_spill] sm:$0xff] %v6711_v44  ;;  %2473 = vmatpush2.bf16.msra.mxu1 %v1795_v46  ;;  %2281 = vmatprep.subr.bf16.mxu0 %v1790_v28  ;;  %4634 = vtanh.f32 %v1351_v51  ;;  %v9136_v51 = vld [vmem:[#allocation22_spill] sm:$0xff] }
 0x17d   :  { %v1366_v27 = vpop.f32.mrf.mxu1  ;;  %v4609_v9 = vpop.eup %4608  ;;  %2474 = vmatprep.subr.bf16.mxu1 %v1792_v58  ;;  %4636 = vtanh.f32 %v1000_v13  ;;  %v1014_v18 = vadd.f32 %v1013_v47, %v6511_v19  ;;  %v1782_v17 = vpack.c.bf16 %v9136_v51, %v9135_v24  ;;  %v9138_v13 = vld [vmem:[#allocation35_spill] sm:$0xff]  ;;  %v9144_v24 = vld [vmem:[#allocation48_spill] sm:$0xff] }
 0x17e   :  { %v4611_v14 = vpop.eup %4610  ;;  %v1017_v25 = vpop.f32.mrf.mxu0  ;;  %v1789_v5 = vpack.c.bf16 %v6517_v30, %v4609_v9  ;;  %4638 = vtanh.f32 %v1004_v50  ;;  %v1367_v16 = vadd.f32 %v1366_v27, %v6511_v19 }
 0x17f   :  { %v1370_v35 = vpop.f32.mrf.mxu1  ;;  %v4613_v12 = vpop.eup %4612  ;;  %v1791_v60 = vpack.c.bf16 %v4607_v52, %v4611_v14  ;;  %4640 = vtanh.f32 %v1357_v43  ;;  %v1018_v46 = vadd.f32 %v1017_v25, %v9138_v13  ;;  %v9139_v52 = vld [vmem:[#allocation31_spill] sm:$0xff]  ;;  %v9140_v14 = vld [vmem:[#allocation30_spill] sm:$0xff] }
 0x180   :  { %v6716_v61 = vpop.permute.xlu0 %485  ;;  %v1019_v22 = vpop.f32.mrf.mxu0  ;;  %2282 = vmatpush2.bf16.msra.mxu0 %v1789_v5  ;;  %4642 = vtanh.f32 %v1010_v15  ;;  %v1787_v50 = vpack.c.bf16 %v4613_v12, %v9139_v52  ;;  %v1371_v58 = vadd.f32 %v1370_v35, %v9138_v13 }
 0x181   :  { %9129 = vst [vmem:[#allocation41_spill] sm:$0xff] %v6716_v61  ;;  %v1372_v40 = vpop.f32.mrf.mxu1  ;;  %v6724_v30 = vpop.eup %4614  ;;  %2475 = vmatpush2.bf16.msra.mxu1 %v1791_v60  ;;  %2283 = vmatprep.subr.bf16.mxu0 %v1786_v3  ;;  %4644 = vtanh.f32 %v1363_v48  ;;  %v1020_v25 = vadd.f32 %v1019_v22, %v9138_v13 }
 0x182   :  { %9131 = vst [vmem:[#allocation40_spill] sm:$0xff] %v6724_v30  ;;  %v6727_v63 = vpop.eup %4616  ;;  %2476 = vmatprep.subr.bf16.mxu1 %v1788_v62  ;;  %v1021_v2 = vpop.f32.mrf.mxu0  ;;  %4646 = vtanh.f32 %v1012_v21  ;;  %v1373_v48 = vadd.f32 %v1372_v40, %v9138_v13  ;;  %v9148_v13 = vld [vmem:[#allocation52_spill] sm:$0xff] }
 0x183   :  { %9132 = vst [vmem:[#allocation34_spill] sm:$0xff] %v6727_v63  ;;  %v6730_v34 = vpop.f32.mrf.mxu1  ;;  %v4619_v49 = vpop.eup %4618  ;;  %4648 = vtanh.f32 %v1014_v18  ;;  %v1022_v62 = vadd.f32 %v1021_v2, %v9142_v33 }
 0x184   :  { %v6736_v28 = vpop.permute.xlu1 %490  ;;  %v4621_v27 = vpop.eup %4620  ;;  %2284 = vmatpush2.bf16.msra.mxu0 %v1785_v11  ;;  %v1784_v15 = vpack.c.bf16 %v9140_v14, %v4619_v49  ;;  %4650 = vtanh.f32 %v1367_v16  ;;  %v9143_v16 = vld [vmem:[#allocation51_spill] sm:$0xff] }
 0x185   :  { %9137 = vst [vmem:[#allocation36_spill] sm:$0xff] %v6736_v28  ;;  %v1023_v9 = vpop.f32.mrf.mxu0  ;;  %v1376_v43 = vpop.f32.mrf.mxu1  ;;  %2477 = vmatpush2.bf16.msra.mxu1 %v1787_v50  ;;  %2285 = vmatprep.subr.bf16.mxu0 %v1782_v17  ;;  %4652 = vtanh.f32 %v1018_v46  ;;  %v9145_v40 = vpack.c.bf16 %v9143_v16, %v9144_v24  ;;  %v9149_v46 = vld [vmem:[#allocation49_spill] sm:$0xff]  ;;  %v9155_v16 = vld [vmem:[#allocation44_spill] sm:$0xff]  ;;  %v9156_v24 = vld [vmem:[#allocation42_spill] sm:$0xff] }
 0x186   :  { %v4623_v5 = vpop.eup %4622  ;;  %v6744_v60 = vpop.permute.xlu0 %475  ;;  %2478 = vmatprep.subr.bf16.mxu1 %v1784_v15  ;;  %4654 = vtanh.f32 %v1371_v58  ;;  %v1024_v22 = vadd.f32 %v1023_v9, %v9142_v33  ;;  %v1377_v2 = vadd.f32 %v1376_v43, %v9142_v33  ;;  %v9150_v52 = vpack.c.bf16 %v9148_v13, %v9149_v46  ;;  %v9158_v13 = vld [vmem:[#allocation45_spill] sm:$0xff]  ;;  %v9159_v46 = vld [vmem:[#allocation43_spill] sm:$0xff] }
 0x187   :  { %9141 = vst [vmem:[#allocation37_spill] sm:$0xff] %v6744_v60  ;;  %v4625_v12 = vpop.eup %4624  ;;  %v6748_v3 = vpop.f32.mrf.mxu0  ;;  %4656 = vtanh.f32 %v1020_v25  ;;  %v4256_v25 = vld [vmem:[%s8735_s3] ss:$8 sps:$4 sm:$0xff]  }
 0x188   :  { %v6750_v35 = vpop.f32.mrf.mxu1  ;;  %v4627_v21 = vpop.eup %4626  ;;  %v1778_v56 = vpack.c.bf16 %v4621_v27, %v4625_v12  ;;  %2286 = vmatpush2.bf16.msra.mxu0 %v9145_v40  ;;  %4658 = vtanh.f32 %v1373_v48  ;;  %v9152_v27 = vld [vmem:[#allocation54_spill] sm:$0xff]  ;;  %v9154_v48 = vld [vmem:[#allocation32_spill] sm:$0xff]  ;;  %v9157_v40 = vpack.c.bf16 %v9155_v16, %v9156_v24 }
 0x189   :  { %v6753_v29 = vpop.eup %4628  ;;  %v1029_v18 = vpop.f32.mrf.mxu0  ;;  %v1780_v51 = vpack.c.bf16 %v4623_v5, %v4627_v21  ;;  %2479 = vmatpush2.bf16.msra.mxu1 %v9150_v52  ;;  %4660 = vtanh.f32 %v1022_v62  ;;  %v4261_v62 = vld [vmem:[%s8735_s3 + $0x14] ss:$8 sps:$4 sm:$0xff]  }
 0x18a   :  { %v1382_v11 = vpop.f32.mrf.mxu1  ;;  %v6759_v17 = vpop.eup %4630  ;;  %2287 = vmatprep.subr.bf16.mxu0 %v1778_v56  ;;  %v1030_v58 = vadd.f32 %v1029_v18, %v9152_v27  ;;  %4662 = vtanh.f32 %v1024_v22  ;;  %v9160_v22 = vpack.c.bf16 %v9158_v13, %v9159_v46 }
 0x18b   :  { %9146 = vst [vmem:[#allocation28_spill] sm:$0xff] %v6759_v17  ;;  %v6761_v49 = vpop.permute.xlu1 %480  ;;  %v6767_v50 = vpop.eup %4632  ;;  %2480 = vmatprep.subr.bf16.mxu1 %v1780_v51  ;;  %v1383_v43 = vadd.f32 %v1382_v11, %v9152_v27  ;;  %4664 = vtanh.f32 %v1377_v2  ;;  %v1355_v17 = vadd.f32 %v6642_v45, %v6532_v23 }
 0x18c   :  { %9147 = vst [vmem:[#allocation26_spill] sm:$0xff] %v6761_v49  ;;  %9151 = vst [vmem:[#allocation25_spill] sm:$0xff] %v6767_v50  ;;  %v1031_v9 = vpop.f32.mrf.mxu0  ;;  %v6770_v14 = vpop.f32.mrf.mxu1  ;;  %2288 = vmatpush2.bf16.msra.mxu0 %v9157_v40 }
 0x18d   :  { %v6772_v15 = vpop.eup %4634  ;;  %v6774_v5 = vpop.permute.xlu0 %465  ;;  %v1032_v21 = vadd.f32 %v1031_v9, %v9154_v48  ;;  %2481 = vmatpush2.bf16.msra.mxu1 %v9160_v22  ;;  %4666 = vtanh.f32 %v1030_v58 }
 0x18e   :  { %9153 = vst [vmem:[#allocation33_spill] sm:$0xff] %v6774_v5  ;;  %v6780_v12 = vpop.eup %4636  ;;  %v1033_v56 = vpop.f32.mrf.mxu0  ;;  %4668 = vtanh.f32 %v1383_v43  ;;  %v4259_v43 = vld [vmem:[%s8735_s3 + $0x10] ss:$8 sps:$4 sm:$0xff]  }
 0x18f   :  { %v1386_v18 = vpop.f32.mrf.mxu1  ;;  %v6789_v11 = vpop.eup %4638  ;;  %v1034_v51 = vadd.f32 %v1033_v56, %v9154_v48  ;;  %2290 = vmatmul.mubr.bf16.vlgmr.msra.gmra.mxu0 %v4256_v25  ;;  %4670 = vtanh.f32 %v1032_v21 }
 0x190   :  { %v6795_v52 = vpop.eup %4640  ;;  %v1387_v9 = vadd.f32 %v1386_v18, %v9154_v48  ;;  %v1037_v16 = vpop.f32.mrf.mxu0  ;;  %2483 = vmatmul.mubr.bf16.vlgmr.msra.gmra.mxu1 %v4256_v25  ;;  %2299 = vmatprep.mubr.bf16.mxu0 %v4261_v62 }
 0x191   :  { %v1390_v24 = vpop.f32.mrf.mxu1  ;;  %v6798_v40 = vpop.eup %4642  ;;  %v1038_v2 = vadd.f32 %v1037_v16, %v9162_v32  ;;  %4672 = vtanh.f32 %v1034_v51  ;;  %2492 = vmatprep.mubr.bf16.mxu1 %v4261_v62  ;;  %v9163_v51 = vld [vmem:[#allocation53_spill] sm:$0xff] }
 0x192   :  { %v6800_v42 = vpop.permute.xlu1 %470  ;;  %v6803_v56 = vpop.eup %4644  ;;  %v1391_v13 = vadd.f32 %v1390_v24, %v9162_v32  ;;  %4674 = vtanh.f32 %v1387_v9 }
 0x193   :  { %9161 = vst [vmem:[#allocation22_spill] sm:$0xff] %v6800_v42  ;;  %v1039_v46 = vpop.f32.mrf.mxu0  ;;  %v1392_v58 = vpop.f32.mrf.mxu1  ;;  %4676 = vtanh.f32 %v1038_v2 }
 0x194   :  { %v6806_v18 = vpop.eup %4646  ;;  %v6808_v22 = vpop.permute.xlu0 %455  ;;  %v1040_v41 = vadd.f32 %v1039_v46, %v9162_v32  ;;  %v1393_v25 = vadd.f32 %v1392_v58, %v9162_v32  ;;  %4678 = vtanh.f32 %v1391_v13  ;;  %v9164_v13 = vld [vmem:[#allocation46_spill] sm:$0xff] }
 0x195   :  { %v6814_v16 = vpop.eup %4648  ;;  %v1041_v21 = vpop.f32.mrf.mxu0 }
 0x196   :  { %v1394_v24 = vpop.f32.mrf.mxu1  ;;  %v6820_v47 = vpop.eup %4650  ;;  %v1042_v46 = vadd.f32 %v1041_v21, %v9163_v51  ;;  %4680 = vtanh.f32 %v1040_v41 }
 0x197   :  { %v6823_v20 = vpop.eup %4652  ;;  %v1043_v62 = vpop.f32.mrf.mxu0  ;;  %4682 = vtanh.f32 %v1393_v25  ;;  %2300 = vmatmul.mubr.bf16.gmra.mxu0 %v4259_v43 }
 0x198   :  { %v1396_v7 = vpop.f32.mrf.mxu1  ;;  %v6825_v44 = vpop.eup %4654  ;;  %v1044_v32 = vadd.f32 %v1043_v62, %v9163_v51  ;;  %4684 = vtanh.f32 %v1042_v46  ;;  %2493 = vmatmul.mubr.bf16.gmra.mxu1 %v4259_v43  ;;  %2309 = vmatprep.mubr.bf16.mxu0 %v4264_v57  ;;  %v9165_v43 = vld [vmem:[#allocation47_spill] sm:$0xff] }
 0x199   :  { %v6827_v9 = vpop.permute.xlu1 %460  ;;  %v1397_v58 = vadd.f32 %v1396_v7, %v9163_v51  ;;  %v6831_v26 = vpop.eup %4656  ;;  %2502 = vmatprep.mubr.bf16.mxu1 %v4264_v57 }
 0x19a   :  { %v1047_v2 = vpop.f32.mrf.mxu0  ;;  %v1400_v28 = vpop.f32.mrf.mxu1  ;;  %4686 = vtanh.f32 %v1044_v32 }
 0x19b   :  { %v6833_v21 = vpop.eup %4658  ;;  %v6835_v61 = vpop.permute.xlu0 %445  ;;  %v1048_v59 = vadd.f32 %v1047_v2, %v9164_v13  ;;  %4688 = vtanh.f32 %v1397_v58  ;;  %v4262_v58 = vld [vmem:[%s8735_s3 + $0x20] ss:$8 sps:$4 sm:$0xff]  }
 0x19c   :  { %v6838_v53 = vpop.eup %4660  ;;  %v1049_v41 = vpop.f32.mrf.mxu0 }
 0x19d   :  { %v1402_v62 = vpop.f32.mrf.mxu1  ;;  %v6840_v7 = vpop.eup %4662  ;;  %v1050_v25 = vadd.f32 %v1049_v41, %v9164_v13  ;;  %4690 = vtanh.f32 %v1048_v59 }
 0x19e   :  { %v1403_v1 = vadd.f32 %v1402_v62, %v9164_v13  ;;  %v6844_v55 = vpop.eup %4664  ;;  %v1051_v46 = vpop.f32.mrf.mxu0  ;;  %v4267_v62 = vld [vmem:[%s8735_s3 + $0x34] ss:$8 sps:$4 sm:$0xff]  }
 0x19f   :  { %v1404_v2 = vpop.f32.mrf.mxu1  ;;  %v6846_v49 = vpop.eup %4666  ;;  %4692 = vtanh.f32 %v1050_v25  ;;  %v1052_v60 = vadd.f32 %v1051_v46, %v9165_v43  ;;  %v1401_v46 = vadd.f32 %v1400_v28, %v9164_v13  ;;  %2310 = vmatmul.mubr.bf16.gmra.mxu0 %v4262_v58 }
 0x1a0   :  { %v6848_v32 = vpop.permute.xlu1 %450  ;;  %v1405_v4 = vadd.f32 %v1404_v2, %v9165_v43  ;;  %v6855_v41 = vpop.eup %4668  ;;  %4694 = vtanh.f32 %v1403_v1  ;;  %v1395_v1 = vadd.f32 %v1394_v24, %v9163_v51  ;;  %2503 = vmatmul.mubr.bf16.gmra.mxu1 %v4262_v58  ;;  %2319 = vmatprep.mubr.bf16.mxu0 %v4267_v62 }
 0x1a1   :  { %v1053_v57 = vpop.f32.mrf.mxu0  ;;  %v1406_v59 = vpop.f32.mrf.mxu1  ;;  %4696 = vtanh.f32 %v1052_v60  ;;  %2512 = vmatprep.mubr.bf16.mxu1 %v4267_v62 }
 0x1a2   :  { %v6860_v37 = vpop.eup %4670  ;;  %v6862_v25 = vpop.permute.xlu0 %435  ;;  %v1054_v2 = vadd.f32 %v1053_v57, %v9165_v43  ;;  %v1407_v54 = vadd.f32 %v1406_v59, %v9165_v43  ;;  %4698 = vtanh.f32 %v1405_v4  ;;  %v4265_v59 = vld [vmem:[%s8735_s3 + $0x30] ss:$8 sps:$4 sm:$0xff]  }
 0x1a3   :  { %9166 = vst [vmem:[#allocation35_spill] sm:$0xff] %v6862_v25  ;;  %v6867_v0 = vpop.eup %4672  ;;  %v1057_v42 = vpop.f32.mrf.mxu0 }
 0x1a4   :  { %v1410_v5 = vpop.f32.mrf.mxu1  ;;  %v6870_v30 = vpop.eup %4674  ;;  %4700 = vtanh.f32 %v1054_v2  ;;  %v1058_v63 = vadd.f32 %v1057_v42, %v6862_v25 }
 0x1a5   :  { %v6873_v50 = vpop.eup %4676  ;;  %4702 = vtanh.f32 %v1407_v54  ;;  %v1411_v28 = vadd.f32 %v1410_v5, %v6862_v25  ;;  %v6876_v60 = vpop.f32.mrf.mxu0  ;;  %v1385_v5 = vadd.f32 %v6770_v14, %v9154_v48  ;;  %v1381_v48 = vadd.f32 %v6750_v35, %v9152_v27 }
 0x1a6   :  { %9167 = vst [vmem:[#allocation31_spill] sm:$0xff] %v6876_v60  ;;  %v6878_v13 = vpop.f32.mrf.mxu1  ;;  %v6880_v4 = vpop.eup %4678  ;;  %4704 = vtanh.f32 %v1401_v46  ;;  %v1028_v46 = vadd.f32 %v6748_v3, %v9152_v27  ;;  %v1375_v3 = vadd.f32 %v6730_v34, %v9142_v33 }
 0x1a7   :  { %9168 = vst [vmem:[#allocation30_spill] sm:$0xff] %v6878_v13  ;;  %v6882_v24 = vpop.permute.xlu1 %440  ;;  %v6884_v51 = vpop.eup %4680  ;;  %4706 = vtanh.f32 %v1395_v1  ;;  %2320 = vmatmul.mubr.bf16.gmra.mxu0 %v4265_v59 }
 0x1a8   :  { %9169 = vst [vmem:[#allocation27_spill] sm:$0xff] %v6882_v24  ;;  %v1061_v42 = vpop.f32.mrf.mxu0  ;;  %v1414_v43 = vpop.f32.mrf.mxu1  ;;  %4708 = vtanh.f32 %v1058_v63  ;;  %v4270_v63 = vld [vmem:[%s8735_s3 + $0x44] ss:$8 sps:$4 sm:$0xff]   ;;  %2513 = vmatmul.mubr.bf16.gmra.mxu1 %v4265_v59 }
 0x1a9   :  { %v6886_v54 = vpop.eup %4682  ;;  %v1062_v58 = vadd.f32 %v1061_v42, %v6882_v24  ;;  %v1415_v57 = vadd.f32 %v1414_v43, %v6882_v24  ;;  %4710 = vtanh.f32 %v1411_v28  ;;  %2329 = vmatprep.mubr.bf16.mxu0 %v4270_v63  ;;  %2522 = vmatprep.mubr.bf16.mxu1 %v4270_v63  ;;  %v1008_v63 = vadd.f32 %v6666_v6, %v6491_v39 }
 0x1aa   :  { %v6895_v62 = vpop.eup %4684  ;;  %v6899_v2 = vpop.f32.mrf.mxu0 }
 0x1ab   :  { %9170 = vst [vmem:[#allocation51_spill] sm:$0xff] %v6899_v2  ;;  %v6901_v1 = vpop.f32.mrf.mxu1  ;;  %v6906_v14 = vpop.eup %4686  ;;  %4712 = vtanh.f32 %v1062_v58 }
 0x1ac   :  { %9171 = vst [vmem:[#allocation48_spill] sm:$0xff] %v6901_v1  ;;  %v6910_v42 = vpop.eup %4688  ;;  %4714 = vtanh.f32 %v1415_v57  ;;  %v1067_v28 = vpop.f32.mrf.mxu0  ;;  %v1834_v23 = vpack.c.bf16 %v6906_v14, %v6884_v51  ;;  %v1833_v14 = vpack.c.bf16 %v6895_v62, %v6873_v50  ;;  %v4276_v62 = vld [vmem:[%s8735_s3 + $0x64] ss:$8 sps:$4 sm:$0xff]  }
 0x1ad   :  { %v1420_v43 = vpop.f32.mrf.mxu1  ;;  %v4691_v13 = vpop.eup %4690  ;;  %4716 = vtanh.f32 %v1385_v5  ;;  %v1068_v60 = vadd.f32 %v1067_v28, %v6835_v61  ;;  %v1365_v28 = vadd.f32 %v6693_v38, %v6511_v19  ;;  %v1361_v19 = vadd.f32 %v6668_v31, %v6491_v39  ;;  %v4273_v31 = vld [vmem:[%s8735_s3 + $0x54] ss:$8 sps:$4 sm:$0xff]  }
 0x1ae   :  { %v4693_v25 = vpop.eup %4692  ;;  %4718 = vtanh.f32 %v1028_v46  ;;  %v1421_v1 = vadd.f32 %v1420_v43, %v6835_v61  ;;  %v6916_v35 = vpop.f32.mrf.mxu0  ;;  %v4268_v43 = vld [vmem:[%s8735_s3 + $0x40] ss:$8 sps:$4 sm:$0xff]   ;;  %v1836_v45 = vpack.c.bf16 %v6910_v42, %v6886_v54 }
 0x1af   :  { %v6918_v27 = vpop.f32.mrf.mxu1  ;;  %v4695_v58 = vpop.eup %4694  ;;  %4720 = vtanh.f32 %v1381_v48  ;;  %2330 = vmatmul.mubr.bf16.gmra.mxu0 %v4268_v43 }
 0x1b0   :  { %9172 = vst [vmem:[#allocation52_spill] sm:$0xff] %v6918_v27  ;;  %v4697_v34 = vpop.eup %4696  ;;  %4722 = vtanh.f32 %v1375_v3  ;;  %v1071_v33 = vpop.f32.mrf.mxu0  ;;  %2523 = vmatmul.mubr.bf16.gmra.mxu1 %v4268_v43  ;;  %2339 = vmatprep.mubr.bf16.mxu0 %v4273_v31 }
 0x1b1   :  { %v1424_v5 = vpop.f32.mrf.mxu1  ;;  %v4699_v57 = vpop.eup %4698  ;;  %4724 = vtanh.f32 %v1068_v60  ;;  %v1072_v46 = vadd.f32 %v1071_v33, %v6848_v32  ;;  %v1353_v33 = vadd.f32 %v6631_v8, %v6519_v36  ;;  %2532 = vmatprep.mubr.bf16.mxu1 %v4273_v31 }
 0x1b2   :  { %v1425_v59 = vadd.f32 %v1424_v5, %v6848_v32  ;;  %v4701_v2 = vpop.eup %4700  ;;  %4726 = vtanh.f32 %v1421_v1  ;;  %v6929_v48 = vpop.f32.mrf.mxu0 }
 0x1b3   :  { %v6931_v3 = vpop.f32.mrf.mxu1  ;;  %v4703_v24 = vpop.eup %4702  ;;  %4728 = vtanh.f32 %v1072_v46  ;;  %v1838_v38 = vpack.c.bf16 %v4701_v2, %v4693_v25  ;;  %v9176_v2 = vld [vmem:[#allocation20_spill] sm:$0xff] }
 0x1b4   :  { %9173 = vst [vmem:[#allocation49_spill] sm:$0xff] %v6931_v3  ;;  %v4705_v60 = vpop.eup %4704  ;;  %4730 = vtanh.f32 %v1425_v59  ;;  %v1077_v5 = vpop.f32.mrf.mxu0  ;;  %v1840_v6 = vpack.c.bf16 %v4703_v24, %v4695_v58  ;;  %v1837_v3 = vpack.c.bf16 %v4697_v34, %v4691_v13  ;;  %v9177_v58 = vld [vmem:[#allocation15_spill] sm:$0xff]  ;;  %v9180_v59 = vld [vmem:[#allocation21_spill] sm:$0xff] }
 0x1b5   :  { %v6937_v27 = vpop.f32.mrf.mxu1  ;;  %v4707_v1 = vpop.eup %4706  ;;  %4732 = vtanh.f32 %v1365_v28  ;;  %3027 = vmatprep.subr.bf16.mxu0 %v1838_v38  ;;  %v1839_v39 = vpack.c.bf16 %v4699_v57, %v4705_v60  ;;  %v1078_v36 = vadd.f32 %v1077_v5, %v6808_v22  ;;  %v984_v34 = vadd.f32 %v9177_v58, %v9176_v2  ;;  %v9179_v28 = vld [vmem:[#allocation14_spill] sm:$0xff] }
 0x1b6   :  { %v6944_v25 = vpop.eup %4708  ;;  %4734 = vtanh.f32 %v1008_v63  ;;  %3220 = vmatprep.subr.bf16.mxu1 %v1840_v6  ;;  %v6947_v8 = vpop.f32.mrf.mxu0  ;;  %3028 = vmatpush1.bf16.msra.mxu0 %v1837_v3  ;;  %v1337_v46 = vadd.f32 %v9179_v28, %v9176_v2  ;;  %v1343_v43 = vadd.f32 %v9180_v59, %v6540_v10  ;;  %v1835_v3 = vpack.c.bf16 %v4707_v1, %v6880_v4  ;;  %v4271_v10 = vld [vmem:[%s8735_s3 + $0x50] ss:$8 sps:$4 sm:$0xff]   ;;  %v9182_v6 = vld [vmem:[#allocation23_spill] sm:$0xff] }
 0x1b7   :  { %9174 = vst [vmem:[#allocation54_spill] sm:$0xff] %v6944_v25  ;;  %v6949_v24 = vpop.f32.mrf.mxu1  ;;  %v6955_v13 = vpop.eup %4710  ;;  %4736 = vtanh.f32 %v1361_v19  ;;  %3221 = vmatpush1.bf16.msra.mxu1 %v1839_v39  ;;  %3029 = vmatprep.subr.bf16.mxu0 %v1834_v23  ;;  %v1832_v4 = vpack.c.bf16 %v6870_v30, %v6855_v41  ;;  %v9183_v1 = vld [vmem:[#allocation29_spill] sm:$0xff]  ;;  %v1826_v59 = vpack.c.bf16 %v6840_v7, %v6831_v26 }
 0x1b8   :  { %9175 = vst [vmem:[#allocation32_spill] sm:$0xff] %v6955_v13  ;;  %v6959_v57 = vpop.eup %4712  ;;  %4738 = vtanh.f32 %v1353_v33  ;;  %3222 = vmatprep.subr.bf16.mxu1 %v1836_v45  ;;  %v1081_v51 = vpop.f32.mrf.mxu0  ;;  %v980_v39 = vadd.f32 %v9183_v1, %v9182_v6  ;;  %2340 = vmatmul.mubr.bf16.gmra.mxu0 %v4271_v10 }
 0x1b9   :  { %9178 = vst [vmem:[#allocation44_spill] sm:$0xff] %v6959_v57  ;;  %v6965_v54 = vpop.f32.mrf.mxu1  ;;  %v6969_v42 = vpop.eup %4714  ;;  %4740 = vtanh.f32 %v1355_v17  ;;  %v1082_v63 = vadd.f32 %v1081_v51, %v6827_v9  ;;  %v1830_v17 = vpack.c.bf16 %v6867_v0, %v6846_v49  ;;  %v9184_v0 = vld [vmem:[#allocation24_spill] sm:$0xff]  ;;  %2533 = vmatmul.mubr.bf16.gmra.mxu1 %v4271_v10  ;;  %2349 = vmatprep.mubr.bf16.mxu0 %v4276_v62 }
 0x1ba   :  { %9181 = vst [vmem:[#allocation42_spill] sm:$0xff] %v6969_v42  ;;  %v4717_v38 = vpop.eup %4716  ;;  %4742 = vtanh.f32 %v1078_v36  ;;  %v6978_v60 = vpop.f32.mrf.mxu0  ;;  %3030 = vmatpush1.bf16.msra.mxu0 %v1833_v14  ;;  %v1333_v49 = vadd.f32 %v9184_v0, %v9182_v6  ;;  %2542 = vmatprep.mubr.bf16.mxu1 %v4276_v62 }
 0x1bb   :  { %v6980_v50 = vpop.f32.mrf.mxu1  ;;  %v4719_v5 = vpop.eup %4718  ;;  %4744 = vtanh.f32 %v1082_v63  ;;  %3223 = vmatpush1.bf16.msra.mxu1 %v1835_v3  ;;  %3031 = vmatprep.subr.bf16.mxu0 %v1830_v17 }
 0x1bc   :  { %v4721_v31 = vpop.eup %4720  ;;  %4746 = vtanh.f32 %v1343_v43  ;;  %3224 = vmatprep.subr.bf16.mxu1 %v1832_v4  ;;  %v6995_v30 = vpop.f32.mrf.mxu0  ;;  %v1829_v23 = vpack.c.bf16 %v6860_v37, %v4719_v5  ;;  %v1828_v43 = vpack.c.bf16 %v6844_v55, %v6833_v21  ;;  %v1825_v55 = vpack.c.bf16 %v6838_v53, %v6823_v20  ;;  %v4274_v21 = vld [vmem:[%s8735_s3 + $0x60] ss:$8 sps:$4 sm:$0xff]   ;;  %v4279_v20 = vld [vmem:[%s8735_s3 + $0x74] ss:$8 sps:$4 sm:$0xff]  }
 0x1bd   :  { %v6997_v41 = vpop.f32.mrf.mxu1  ;;  %v4723_v36 = vpop.eup %4722  ;;  %4748 = vtanh.f32 %v984_v34  ;;  %v1831_v45 = vpack.c.bf16 %v4717_v38, %v4721_v31  ;;  %v1822_v38 = vpack.c.bf16 %v6814_v16, %v6798_v40  ;;  %v1824_v53 = vpack.c.bf16 %v6820_v47, %v6803_v56 }
 0x1be   :  { %v7000_v2 = vpop.eup %4724  ;;  %4750 = vtanh.f32 %v1337_v46  ;;  %v7002_v58 = vpop.f32.mrf.mxu0  ;;  %3032 = vmatpush1.bf16.msra.mxu0 %v1829_v23  ;;  %v1827_v26 = vpack.c.bf16 %v4723_v36, %v6825_v44  ;;  %v1074_v36 = vadd.f32 %v6929_v48, %v6848_v32 }
 0x1bf   :  { %9185 = vst [vmem:[#allocation45_spill] sm:$0xff] %v7000_v2  ;;  %v7004_v28 = vpop.f32.mrf.mxu1  ;;  %v7010_v34 = vpop.eup %4726  ;;  %4752 = vtanh.f32 %v980_v39  ;;  %3225 = vmatpush1.bf16.msra.mxu1 %v1831_v45  ;;  %3033 = vmatprep.subr.bf16.mxu0 %v1826_v59  ;;  %v1818_v39 = vpack.c.bf16 %v6789_v11, %v6780_v12 }
 0x1c0   :  { %9186 = vst [vmem:[#allocation43_spill] sm:$0xff] %v7010_v34  ;;  %v7012_v37 = vpop.eup %4728  ;;  %4754 = vtanh.f32 %v1333_v49  ;;  %3226 = vmatprep.subr.bf16.mxu1 %v1828_v43  ;;  %v7014_v46 = vpop.f32.mrf.mxu0  ;;  %2350 = vmatmul.mubr.bf16.gmra.mxu0 %v4274_v21  ;;  %v1070_v49 = vadd.f32 %v6916_v35, %v6835_v61  ;;  %v4277_v35 = vld [vmem:[%s8735_s3 + $0x70] ss:$8 sps:$4 sm:$0xff]   ;;  %v1084_v43 = vadd.f32 %v6978_v60, %v6827_v9 }
 0x1c1   :  { %v7016_v51 = vpop.f32.mrf.mxu1  ;;  %v7018_v14 = vpop.eup %4730  ;;  %2543 = vmatmul.mubr.bf16.gmra.mxu1 %v4274_v21  ;;  %2359 = vmatprep.mubr.bf16.mxu0 %v4279_v20  ;;  %v9188_v21 = vld [vmem:[#allocation28_spill] sm:$0xff] }
 0x1c2   :  { %9187 = vst [vmem:[#allocation50_spill] sm:$0xff] %v7018_v14  ;;  %v4733_v63 = vpop.eup %4732  ;;  %v7028_v3 = vpop.f32.mrf.mxu0  ;;  %3034 = vmatpush1.bf16.msra.mxu0 %v1825_v55  ;;  %2552 = vmatprep.mubr.bf16.mxu1 %v4279_v20  ;;  %4756 = vtanh.f32 %v1070_v49  ;;  %v9192_v60 = vld [vmem:[#allocation40_spill] sm:$0xff]  ;;  %v9195_v49 = vld [vmem:[#allocation22_spill] sm:$0xff] }
 0x1c3   :  { %v7030_v10 = vpop.f32.mrf.mxu1  ;;  %v4735_v17 = vpop.eup %4734  ;;  %3227 = vmatpush1.bf16.msra.mxu1 %v1827_v26  ;;  %3035 = vmatprep.subr.bf16.mxu0 %v1822_v38  ;;  %4758 = vtanh.f32 %v1074_v36 }
 0x1c4   :  { %v4737_v4 = vpop.eup %4736  ;;  %3228 = vmatprep.subr.bf16.mxu1 %v1824_v53  ;;  %v7041_v62 = vpop.f32.mrf.mxu0  ;;  %v1821_v47 = vpack.c.bf16 %v6806_v18, %v4735_v17  ;;  %v1437_v17 = vadd.f32 %v6980_v50, %v6827_v9 }
 0x1c5   :  { %v7043_v5 = vpop.f32.mrf.mxu1  ;;  %v4739_v40 = vpop.eup %4738  ;;  %v1823_v56 = vpack.c.bf16 %v4733_v63, %v4737_v4  ;;  %v1814_v63 = vpack.c.bf16 %v9188_v21, %v6753_v29  ;;  %v9191_v4 = vld [vmem:[#allocation34_spill] sm:$0xff]  ;;  %v9194_v29 = vld [vmem:[#allocation33_spill] sm:$0xff] }
 0x1c6   :  { %v4741_v16 = vpop.eup %4740  ;;  %v1099_v6 = vpop.f32.mrf.mxu0  ;;  %v1820_v31 = vpack.c.bf16 %v6795_v52, %v4739_v40  ;;  %3036 = vmatpush1.bf16.msra.mxu0 %v1821_v47  ;;  %v1080_v52 = vadd.f32 %v6947_v8, %v6808_v22  ;;  %v9189_v8 = vld [vmem:[#allocation25_spill] sm:$0xff]  ;;  %v9193_v40 = vpack.c.bf16 %v9191_v4, %v9192_v60  ;;  %v1443_v50 = vadd.f32 %v7004_v28, %v9194_v29  ;;  %v9201_v4 = vld [vmem:[#allocation11_spill] sm:$0xff] }
 0x1c7   :  { %v7046_v1 = vpop.f32.mrf.mxu1  ;;  %v7051_v0 = vpop.eup %4742  ;;  %3229 = vmatpush1.bf16.msra.mxu1 %v1823_v56  ;;  %3037 = vmatprep.subr.bf16.mxu0 %v1818_v39  ;;  %v1819_v45 = vpack.c.bf16 %v4741_v16, %v6772_v15  ;;  %v4282_v15 = vld [vmem:[%s8735_s3 + $0x84] ss:$8 sps:$4 sm:$0xff]   ;;  %v1090_v56 = vadd.f32 %v7002_v58, %v9194_v29 }
 0x1c8   :  { %v7055_v18 = vpop.eup %4744  ;;  %3230 = vmatprep.subr.bf16.mxu1 %v1820_v31  ;;  %v7059_v23 = vpop.f32.mrf.mxu0  ;;  %4760 = vtanh.f32 %v1080_v52  ;;  %2360 = vmatmul.mubr.bf16.gmra.mxu0 %v4277_v35  ;;  %v1447_v52 = vadd.f32 %v7030_v10, %v9195_v49 }
 0x1c9   :  { %v7061_v12 = vpop.f32.mrf.mxu1  ;;  %v4747_v11 = vpop.eup %4746  ;;  %4762 = vtanh.f32 %v1084_v43  ;;  %2553 = vmatmul.mubr.bf16.gmra.mxu1 %v4277_v35  ;;  %2369 = vmatprep.mubr.bf16.mxu0 %v4282_v15  ;;  %v9200_v43 = vld [vmem:[#allocation38_spill] sm:$0xff] }
 0x1ca   :  { %v4749_v59 = vpop.eup %4748  ;;  %v1103_v55 = vpop.f32.mrf.mxu0  ;;  %v1816_v38 = vpack.c.bf16 %v9189_v8, %v4747_v11  ;;  %3038 = vmatpush1.bf16.msra.mxu0 %v9193_v40  ;;  %v1094_v11 = vadd.f32 %v7028_v3, %v9195_v49  ;;  %4764 = vtanh.f32 %v1437_v17  ;;  %v9197_v8 = vld [vmem:[#allocation9_spill] sm:$0xff]  ;;  %v9202_v60 = vpack.c.bf16 %v9200_v43, %v9201_v4  ;;  %v4280_v40 = vld [vmem:[%s8735_s3 + $0x80] ss:$8 sps:$4 sm:$0xff]   ;;  %2562 = vmatprep.mubr.bf16.mxu1 %v4282_v15 }
 0x1cb   :  { %v1456_v26 = vpop.f32.mrf.mxu1  ;;  %v4751_v53 = vpop.eup %4750  ;;  %3231 = vmatpush1.bf16.msra.mxu1 %v1819_v45  ;;  %3039 = vmatprep.subr.bf16.mxu0 %v1814_v63  ;;  %4766 = vtanh.f32 %v1090_v56  ;;  %v9203_v3 = vld [vmem:[#allocation37_spill] sm:$0xff] }
 0x1cc   :  { %v7079_v20 = vpop.permute.xlu0 %2779  ;;  %v4753_v47 = vpop.eup %4752  ;;  %3232 = vmatprep.subr.bf16.mxu1 %v1816_v38  ;;  %v9198_v38 = vld [vmem:[#allocation10_spill] sm:$0xff]  ;;  %v1100_v35 = vadd.f32 %v1099_v6, %v9203_v3  ;;  %4768 = vtanh.f32 %v1443_v50  ;;  %v1453_v10 = vadd.f32 %v7046_v1, %v9203_v3  ;;  %v9212_v15 = vld [vmem:[#allocation41_spill] sm:$0xff] }
 0x1cd   :  { %9190 = vst [vmem:[#allocation53_spill] sm:$0xff] %v7079_v20  ;;  %v7088_v16 = vpop.f32.mrf.mxu0  ;;  %v7090_v39 = vpop.f32.mrf.mxu1  ;;  %v1810_v58 = vpack.c.bf16 %v4749_v59, %v4753_v47  ;;  %v9199_v28 = vpack.c.bf16 %v9197_v8, %v9198_v38  ;;  %4770 = vtanh.f32 %v1094_v11  ;;  %v9205_v47 = vld [vmem:[#allocation26_spill] sm:$0xff]  ;;  %v9207_v8 = vld [vmem:[#allocation16_spill] sm:$0xff]  ;;  %v9220_v20 = vld [vmem:[#allocation19_spill] sm:$0xff] }
 0x1ce   :  { %v4755_v31 = vpop.eup %4754  ;;  %v7096_v63 = vpop.permute.xlu1 %2784  ;;  %v1104_v6 = vadd.f32 %v1103_v55, %v9205_v47  ;;  %4772 = vtanh.f32 %v1447_v52  ;;  %v1457_v50 = vadd.f32 %v1456_v26, %v9205_v47  ;;  %v9209_v38 = vld [vmem:[#allocation12_spill] sm:$0xff] }
 0x1cf   :  { %v1109_v36 = vpop.f32.mrf.mxu0  ;;  %v1462_v45 = vpop.f32.mrf.mxu1  ;;  %v1812_v21 = vpack.c.bf16 %v4751_v53, %v4755_v31  ;;  %9196 = vst [vmem:[#allocation46_spill] sm:$0xff] %v7096_v63  ;;  %3040 = vmatpush1.bf16.msra.mxu0 %v9199_v28  ;;  %3233 = vmatpush1.bf16.msra.mxu1 %v9202_v60  ;;  %v9210_v28 = vld [vmem:[#allocation17_spill] sm:$0xff]  ;;  %4774 = vtanh.f32 %v1100_v35  ;;  %v9214_v52 = vld [vmem:[#allocation36_spill] sm:$0xff] }
 0x1d0   :  { %3041 = vmatprep.subr.bf16.mxu0 %v1810_v58  ;;  %v7111_v17 = vpop.permute.xlu0 %2769  ;;  %v4285_v58 = vld [vmem:[%s8735_s3 + $0x94] ss:$8 sps:$4 sm:$0xff]   ;;  %v9211_v43 = vpack.c.bf16 %v9209_v38, %v9210_v28  ;;  %v1110_v55 = vadd.f32 %v1109_v36, %v9212_v15  ;;  %4776 = vtanh.f32 %v1453_v10  ;;  %v1463_v26 = vadd.f32 %v1462_v45, %v9212_v15  ;;  %2370 = vmatmul.mubr.bf16.gmra.mxu0 %v4280_v40  ;;  %v7141_v38 = vpop.eup %4756  ;;  %v9216_v10 = vld [vmem:[#allocation8_spill] sm:$0xff] }
 0x1d1   :  { %3234 = vmatprep.subr.bf16.mxu1 %v1812_v21  ;;  %v7107_v59 = vpop.f32.mrf.mxu0  ;;  %v7109_v53 = vpop.f32.mrf.mxu1  ;;  %9204 = vst [vmem:[#allocation47_spill] sm:$0xff] %v7111_v17  ;;  %v9206_v21 = vld [vmem:[#allocation18_spill] sm:$0xff]  ;;  %4778 = vtanh.f32 %v1104_v6  ;;  %2563 = vmatmul.mubr.bf16.gmra.mxu1 %v4280_v40 }
 0x1d2   :  { %v9208_v1 = vpack.c.bf16 %v9206_v21, %v9207_v8  ;;  %v7134_v60 = vpop.permute.xlu1 %2774  ;;  %2379 = vmatprep.mubr.bf16.mxu0 %v4285_v58  ;;  %4780 = vtanh.f32 %v1457_v50  ;;  %2572 = vmatprep.mubr.bf16.mxu1 %v4285_v58  ;;  %v7144_v6 = vpop.eup %4758 }
 0x1d3   :  { %v1113_v56 = vpop.f32.mrf.mxu0  ;;  %v1466_v31 = vpop.f32.mrf.mxu1  ;;  %3235 = vmatpush1.bf16.msra.mxu1 %v9211_v43  ;;  %9213 = vst [vmem:[#allocation20_spill] sm:$0xff] %v7134_v60  ;;  %4782 = vtanh.f32 %v1110_v55  ;;  %v4288_v55 = vld [vmem:[%s8735_s3 + $0xa4] ss:$8 sps:$4 sm:$0xff]  }
 0x1d4   :  { %3042 = vmatpush1.bf16.msra.mxu0 %v9208_v1  ;;  %v1114_v21 = vadd.f32 %v1113_v56, %v9214_v52  ;;  %v7138_v35 = vpop.permute.xlu0 %2759  ;;  %v1467_v36 = vadd.f32 %v1466_v31, %v9214_v52  ;;  %4784 = vtanh.f32 %v1463_v26  ;;  %v4283_v56 = vld [vmem:[%s8735_s3 + $0x90] ss:$8 sps:$4 sm:$0xff]   ;;  %v9218_v26 = vld [vmem:[#allocation39_spill] sm:$0xff] }
 0x1d5   :  { %v7130_v11 = vpop.f32.mrf.mxu0  ;;  %v7132_v4 = vpop.f32.mrf.mxu1  ;;  %9215 = vst [vmem:[#allocation15_spill] sm:$0xff] %v7138_v35 }
 0x1d6   :  { %v7150_v50 = vpop.eup %4760  ;;  %4786 = vtanh.f32 %v1114_v21  ;;  %v7157_v33 = vpop.permute.xlu1 %2764 }
 0x1d7   :  { %v1119_v8 = vpop.f32.mrf.mxu0  ;;  %v1472_v1 = vpop.f32.mrf.mxu1  ;;  %9217 = vst [vmem:[#allocation14_spill] sm:$0xff] %v7157_v33  ;;  %4788 = vtanh.f32 %v1467_v36 }
 0x1d8   :  { %v1120_v28 = vadd.f32 %v1119_v8, %v9216_v10  ;;  %v1473_v40 = vadd.f32 %v1472_v1, %v9216_v10  ;;  %v7155_v8 = vpop.eup %4762  ;;  %v7165_v63 = vpop.permute.xlu0 %2749  ;;  %2380 = vmatmul.mubr.bf16.gmra.mxu0 %v4283_v56 }
 0x1d9   :  { %v1121_v45 = vpop.f32.mrf.mxu0  ;;  %v1474_v43 = vpop.f32.mrf.mxu1  ;;  %9219 = vst [vmem:[#allocation21_spill] sm:$0xff] %v7165_v63  ;;  %2573 = vmatmul.mubr.bf16.gmra.mxu1 %v4283_v56  ;;  %2389 = vmatprep.mubr.bf16.mxu0 %v4288_v55  ;;  %v9222_v56 = vld [vmem:[#allocation13_spill] sm:$0xff] }
 0x1da   :  { %v7161_v44 = vpop.eup %4764  ;;  %4790 = vtanh.f32 %v1120_v28  ;;  %2582 = vmatprep.mubr.bf16.mxu1 %v4288_v55  ;;  %v1475_v14 = vadd.f32 %v1474_v43, %v9218_v26  ;;  %v1112_v43 = vadd.f32 %v7107_v59, %v9214_v52  ;;  %v4294_v59 = vld [vmem:[%s8735_s3 + $0xc4] ss:$8 sps:$4 sm:$0xff]  }
 0x1db   :  { %v1123_v31 = vpop.f32.mrf.mxu0  ;;  %v1476_v58 = vpop.f32.mrf.mxu1  ;;  %4792 = vtanh.f32 %v1473_v40 }
 0x1dc   :  { %v1124_v1 = vadd.f32 %v1123_v31, %v9218_v26  ;;  %v1477_v19 = vadd.f32 %v1476_v58, %v9218_v26  ;;  %v7163_v48 = vpop.eup %4766 }
 0x1dd   :  { %v1127_v7 = vpop.f32.mrf.mxu0  ;;  %v1480_v21 = vpop.f32.mrf.mxu1 }
 0x1de   :  { %v1128_v60 = vadd.f32 %v1127_v7, %v9220_v20  ;;  %v7168_v17 = vpop.eup %4768  ;;  %4794 = vtanh.f32 %v1124_v1  ;;  %v7178_v1 = vpop.permute.xlu1 %2754 }
 0x1df   :  { %v1129_v36 = vpop.f32.mrf.mxu0  ;;  %v1482_v31 = vpop.f32.mrf.mxu1  ;;  %4796 = vtanh.f32 %v1477_v19  ;;  %9221 = vst [vmem:[#allocation23_spill] sm:$0xff] %v7178_v1  ;;  %v4286_v19 = vld [vmem:[%s8735_s3 + $0xa0] ss:$8 sps:$4 sm:$0xff]  }
 0x1e0   :  { %v7170_v58 = vpop.eup %4770  ;;  %v1130_v28 = vadd.f32 %v1129_v36, %v9220_v20  ;;  %v1483_v33 = vadd.f32 %v1482_v31, %v9220_v20  ;;  %4798 = vtanh.f32 %v1128_v60  ;;  %v4291_v31 = vld [vmem:[%s8735_s3 + $0xb4] ss:$8 sps:$4 sm:$0xff]   ;;  %2390 = vmatmul.mubr.bf16.gmra.mxu0 %v4286_v19 }
 0x1e1   :  { %v7174_v35 = vpop.eup %4772  ;;  %v1131_v7 = vpop.f32.mrf.mxu0  ;;  %2583 = vmatmul.mubr.bf16.gmra.mxu1 %v4286_v19  ;;  %2399 = vmatprep.mubr.bf16.mxu0 %v4291_v31 }
 0x1e2   :  { %v1484_v40 = vpop.f32.mrf.mxu1  ;;  %v7176_v63 = vpop.eup %4774  ;;  %4800 = vtanh.f32 %v1130_v28  ;;  %v1132_v13 = vadd.f32 %v1131_v7, %v9222_v56  ;;  %v1481_v7 = vadd.f32 %v1480_v21, %v9220_v20  ;;  %2592 = vmatprep.mubr.bf16.mxu1 %v4291_v31 }
 0x1e3   :  { %v1485_v42 = vadd.f32 %v1484_v40, %v9222_v56  ;;  %v7185_v36 = vpop.eup %4776  ;;  %4802 = vtanh.f32 %v1483_v33  ;;  %v1133_v55 = vpop.f32.mrf.mxu0  ;;  %v1122_v33 = vadd.f32 %v1121_v45, %v9218_v26 }
 0x1e4   :  { %v1486_v60 = vpop.f32.mrf.mxu1  ;;  %v7190_v25 = vpop.eup %4778  ;;  %4804 = vtanh.f32 %v1132_v13  ;;  %v1134_v40 = vadd.f32 %v1133_v55, %v9222_v56  ;;  %v1118_v13 = vadd.f32 %v7130_v11, %v9216_v10 }
 0x1e5   :  { %v7192_v28 = vpop.permute.xlu0 %2739  ;;  %v1487_v1 = vadd.f32 %v1486_v60, %v9222_v56  ;;  %v7197_v57 = vpop.eup %4780  ;;  %4806 = vtanh.f32 %v1485_v42  ;;  %v1471_v42 = vadd.f32 %v7132_v4, %v9216_v10  ;;  %v4289_v4 = vld [vmem:[%s8735_s3 + $0xb0] ss:$8 sps:$4 sm:$0xff]   ;;  %v1108_v56 = vadd.f32 %v7088_v16, %v9212_v15 }
 0x1e6   :  { %v7200_v34 = vpop.eup %4782  ;;  %4808 = vtanh.f32 %v1134_v40  ;;  %v7209_v21 = vpop.permute.xlu1 %2744  ;;  %v1455_v16 = vadd.f32 %v7061_v12, %v9205_v47  ;;  %v1092_v12 = vadd.f32 %v7014_v46, %v9195_v49  ;;  %v1441_v46 = vadd.f32 %v6997_v41, %v9194_v29  ;;  %v4297_v41 = vld [vmem:[%s8735_s3 + $0xd4] ss:$8 sps:$4 sm:$0xff]  }
 0x1e7   :  { %v7203_v2 = vpop.eup %4784  ;;  %4810 = vtanh.f32 %v1487_v1  ;;  %v1465_v1 = vadd.f32 %v7109_v53, %v9214_v52  ;;  %v1461_v53 = vadd.f32 %v7090_v39, %v9212_v15  ;;  %v1102_v52 = vadd.f32 %v7059_v23, %v9205_v47 }
 0x1e8   :  { %v7207_v20 = vpop.eup %4786  ;;  %4812 = vtanh.f32 %v1481_v7  ;;  %2400 = vmatmul.mubr.bf16.gmra.mxu0 %v4289_v4  ;;  %v1098_v7 = vadd.f32 %v7041_v62, %v9203_v3  ;;  %v1451_v23 = vadd.f32 %v7043_v5, %v9203_v3  ;;  %v1445_v62 = vadd.f32 %v7016_v51, %v9195_v49 }
 0x1e9   :  { %v7213_v45 = vpop.eup %4788  ;;  %4814 = vtanh.f32 %v1122_v33  ;;  %v7219_v11 = vpop.permute.xlu0 %2729  ;;  %2593 = vmatmul.mubr.bf16.gmra.mxu1 %v4289_v4  ;;  %2409 = vmatprep.mubr.bf16.mxu0 %v4294_v59  ;;  %v4292_v33 = vld [vmem:[%s8735_s3 + $0xc0] ss:$8 sps:$4 sm:$0xff]   ;;  %v1088_v5 = vadd.f32 %v6995_v30, %v9194_v29  ;;  %v1433_v51 = vadd.f32 %v6949_v24, %v6808_v22  ;;  %v1435_v30 = vadd.f32 %v6965_v54, %v6827_v9  ;;  %v9223_v24 = vld [vmem:[#allocation49_spill] sm:$0xff] }
 0x1ea   :  { %v7217_v26 = vpop.eup %4790  ;;  %4816 = vtanh.f32 %v1475_v14  ;;  %v7239_v60 = vpop.permute.xlu1 %2734  ;;  %2602 = vmatprep.mubr.bf16.mxu1 %v4294_v59 }
 0x1eb   :  { %v7226_v10 = vpop.eup %4792  ;;  %4818 = vtanh.f32 %v1118_v13 }
 0x1ec   :  { %v7233_v19 = vpop.eup %4794  ;;  %4820 = vtanh.f32 %v1471_v42 }
 0x1ed   :  { %v4797_v14 = vpop.eup %4796  ;;  %4822 = vtanh.f32 %v1112_v43  ;;  %v7245_v15 = vpop.permute.xlu0 %2719 }
 0x1ee   :  { %v4799_v55 = vpop.eup %4798  ;;  %4824 = vtanh.f32 %v1465_v1  ;;  %v7258_v42 = vpop.permute.xlu1 %2724  ;;  %v1868_v9 = vpack.c.bf16 %v4797_v14, %v7226_v10 }
 0x1ef   :  { %v4801_v31 = vpop.eup %4800  ;;  %4826 = vtanh.f32 %v1108_v56 }
 0x1f0   :  { %v4803_v39 = vpop.eup %4802  ;;  %4828 = vtanh.f32 %v1461_v53  ;;  %2410 = vmatmul.mubr.bf16.gmra.mxu0 %v4292_v33 }
 0x1f1   :  { %v4805_v40 = vpop.eup %4804  ;;  %4830 = vtanh.f32 %v1102_v52  ;;  %v7264_v56 = vpop.permute.xlu0 %2709  ;;  %v1427_v52 = vadd.f32 %v9223_v24, %v6848_v32  ;;  %2603 = vmatmul.mubr.bf16.gmra.mxu1 %v4292_v33  ;;  %2419 = vmatprep.mubr.bf16.mxu0 %v4297_v41  ;;  %v4300_v33 = vld [vmem:[%s8735_s3 + $0xe4] ss:$8 sps:$4 sm:$0xff]  }
 0x1f2   :  { %v4807_v47 = vpop.eup %4806  ;;  %4832 = vtanh.f32 %v1455_v16  ;;  %v1869_v59 = vpack.c.bf16 %v4805_v40, %v4799_v55  ;;  %v1866_v16 = vpack.c.bf16 %v7233_v19, %v7217_v26  ;;  %v1431_v55 = vadd.f32 %v6937_v27, %v6808_v22  ;;  %v9225_v26 = vld [vmem:[#allocation27_spill] sm:$0xff]  ;;  %v4295_v22 = vld [vmem:[%s8735_s3 + $0xd0] ss:$8 sps:$4 sm:$0xff]   ;;  %2612 = vmatprep.mubr.bf16.mxu1 %v4297_v41 }
 0x1f3   :  { %v4809_v13 = vpop.eup %4808  ;;  %4834 = vtanh.f32 %v1098_v7  ;;  %v9224_v7 = vld [vmem:[#allocation52_spill] sm:$0xff]  ;;  %v9226_v19 = vld [vmem:[#allocation51_spill] sm:$0xff] }
 0x1f4   :  { %v4811_v3 = vpop.eup %4810  ;;  %4836 = vtanh.f32 %v1451_v23  ;;  %v1870_v43 = vpack.c.bf16 %v4809_v13, %v4801_v31  ;;  %v7280_v23 = vpop.permute.xlu1 %2714  ;;  %v1064_v10 = vadd.f32 %v9226_v19, %v9225_v26 }
 0x1f5   :  { %v4813_v1 = vpop.eup %4812  ;;  %4838 = vtanh.f32 %v1092_v12  ;;  %v1872_v49 = vpack.c.bf16 %v4811_v3, %v4803_v39  ;;  %v1423_v39 = vadd.f32 %v9224_v7, %v6835_v61  ;;  %v9227_v61 = vld [vmem:[#allocation48_spill] sm:$0xff]  ;;  %v9229_v3 = vld [vmem:[#allocation35_spill] sm:$0xff] }
 0x1f6   :  { %v4815_v4 = vpop.eup %4814  ;;  %4840 = vtanh.f32 %v1445_v62  ;;  %3043 = vmatprep.subr.bf16.mxu0 %v1870_v43  ;;  %v1871_v53 = vpack.c.bf16 %v4807_v47, %v4813_v1  ;;  %v1417_v12 = vadd.f32 %v9227_v61, %v9225_v26  ;;  %v1862_v47 = vpack.c.bf16 %v7207_v20, %v7200_v34 }
 0x1f7   :  { %v4817_v29 = vpop.eup %4816  ;;  %4842 = vtanh.f32 %v1088_v5  ;;  %3236 = vmatprep.subr.bf16.mxu1 %v1872_v49  ;;  %3044 = vmatpush2.bf16.msra.mxu0 %v1869_v59  ;;  %v1864_v62 = vpack.c.bf16 %v7213_v45, %v7203_v2  ;;  %v7296_v5 = vpop.permute.xlu0 %2859 }
 0x1f8   :  { %v4819_v54 = vpop.eup %4818  ;;  %4844 = vtanh.f32 %v1441_v46  ;;  %3237 = vmatpush2.bf16.msra.mxu1 %v1871_v53  ;;  %3045 = vmatprep.subr.bf16.mxu0 %v1866_v16  ;;  %9228 = vst [vmem:[#allocation29_spill] sm:$0xff] %v7296_v5  ;;  %v9230_v46 = vld [vmem:[#allocation31_spill] sm:$0xff]  ;;  %v7306_v53 = vpop.permute.xlu1 %2864 }
 0x1f9   :  { %v4821_v31 = vpop.eup %4820  ;;  %4846 = vtanh.f32 %v1433_v51  ;;  %3238 = vmatprep.subr.bf16.mxu1 %v1868_v9  ;;  %v1865_v14 = vpack.c.bf16 %v4815_v4, %v4819_v54  ;;  %v1060_v43 = vadd.f32 %v9230_v46, %v9229_v3  ;;  %v9231_v51 = vld [vmem:[#allocation30_spill] sm:$0xff]  ;;  %2420 = vmatmul.mubr.bf16.gmra.mxu0 %v4295_v22  ;;  %v1858_v4 = vpack.c.bf16 %v7190_v25, %v7176_v63 }
 0x1fa   :  { %v4823_v32 = vpop.eup %4822  ;;  %4848 = vtanh.f32 %v1435_v30  ;;  %v1867_v40 = vpack.c.bf16 %v4817_v29, %v4821_v31  ;;  %v1413_v34 = vadd.f32 %v9231_v51, %v9229_v3  ;;  %2613 = vmatmul.mubr.bf16.gmra.mxu1 %v4295_v22  ;;  %v1860_v30 = vpack.c.bf16 %v7197_v57, %v7185_v36  ;;  %2429 = vmatprep.mubr.bf16.mxu0 %v4300_v33  ;;  %v4298_v25 = vld [vmem:[%s8735_s3 + $0xe0] ss:$8 sps:$4 sm:$0xff]   ;;  %v4303_v9 = vld [vmem:[%s8735_s3 + $0xf4] ss:$8 sps:$4 sm:$0xff]  }
 0x1fb   :  { %v4825_v27 = vpop.eup %4824  ;;  %4850 = vtanh.f32 %v1427_v52  ;;  %3046 = vmatpush2.bf16.msra.mxu0 %v1865_v14  ;;  %9232 = vst [vmem:[#allocation24_spill] sm:$0xff] %v7306_v53  ;;  %v7308_v24 = vpop.permute.xlu0 %2849  ;;  %2622 = vmatprep.mubr.bf16.mxu1 %v4300_v33  ;;  %v1854_v63 = vpack.c.bf16 %v7170_v58, %v7163_v48  ;;  %v1856_v36 = vpack.c.bf16 %v7174_v35, %v7168_v17  ;;  %v9241_v46 = vld [vmem:[#allocation50_spill] sm:$0xff] }
 0x1fc   :  { %v4827_v13 = vpop.eup %4826  ;;  %4852 = vtanh.f32 %v1431_v55  ;;  %3239 = vmatpush2.bf16.msra.mxu1 %v1867_v40  ;;  %3047 = vmatprep.subr.bf16.mxu0 %v1862_v47  ;;  %9233 = vst [vmem:[#allocation28_spill] sm:$0xff] %v7308_v24  ;;  %v7320_v7 = vpop.permute.xlu1 %2854  ;;  %v1850_v17 = vpack.c.bf16 %v7155_v8, %v7150_v50  ;;  %v4301_v40 = vld [vmem:[%s8735_s3 + $0xf0] ss:$8 sps:$4 sm:$0xff]   ;;  %v4306_v8 = vld [vmem:[%s8736_s5 + $0x4] ss:$8 sps:$4 sm:$0xff]  }
 0x1fd   :  { %v4829_v1 = vpop.eup %4828  ;;  %4854 = vtanh.f32 %v1423_v39  ;;  %3240 = vmatprep.subr.bf16.mxu1 %v1864_v62  ;;  %v1861_v20 = vpack.c.bf16 %v4823_v32, %v4827_v13  ;;  %9234 = vst [vmem:[#allocation25_spill] sm:$0xff] %v7320_v7  ;;  %v9239_v13 = vld [vmem:[#allocation45_spill] sm:$0xff]  ;;  %v9412_v7 = vld [vmem:[#allocation47_spill] sm:$0xff] }
 0x1fe   :  { %v4831_v2 = vpop.eup %4830  ;;  %4856 = vtanh.f32 %v1064_v10  ;;  %v1863_v45 = vpack.c.bf16 %v4825_v27, %v4829_v1  ;;  %v9240_v3 = vpack.c.bf16 %v7012_v37, %v9239_v13  ;;  %v4304_v1 = vld [vmem:[%s8736_s5] ss:$8 sps:$4 sm:$0xff]  }
 0x1ff   :  { %v4833_v49 = vpop.eup %4832  ;;  %4858 = vtanh.f32 %v1417_v12  ;;  %3048 = vmatpush2.bf16.msra.mxu0 %v1861_v20  ;;  %v7325_v26 = vpop.permute.xlu0 %2839  ;;  %v9237_v12 = vpack.c.bf16 %v7055_v18, %v7051_v0  ;;  %v9249_v37 = vld [vmem:[#allocation42_spill] sm:$0xff] }
 0x200   :  { %v4835_v59 = vpop.eup %4834  ;;  %4860 = vtanh.f32 %v1060_v43  ;;  %3241 = vmatpush2.bf16.msra.mxu1 %v1863_v45  ;;  %3049 = vmatprep.subr.bf16.mxu0 %v1858_v4  ;;  %9235 = vst [vmem:[#allocation34_spill] sm:$0xff] %v7325_v26  ;;  %v7335_v61 = vpop.permute.xlu1 %2844  ;;  %v9242_v43 = vld [vmem:[#allocation43_spill] sm:$0xff]  ;;  %v9250_v45 = vld [vmem:[#allocation32_spill] sm:$0xff]  ;;  %v4309_v4 = vld [vmem:[%s8736_s5 + $0x14] ss:$8 sps:$4 sm:$0xff]  }
 0x201   :  { %v4837_v41 = vpop.eup %4836  ;;  %4862 = vtanh.f32 %v1413_v34  ;;  %3242 = vmatprep.subr.bf16.mxu1 %v1860_v30  ;;  %v1857_v52 = vpack.c.bf16 %v4831_v2, %v4835_v59  ;;  %2430 = vmatmul.mubr.bf16.gmra.mxu0 %v4298_v25  ;;  %9236 = vst [vmem:[#allocation40_spill] sm:$0xff] %v7335_v61  ;;  %v9243_v0 = vpack.c.bf16 %v9241_v46, %v9242_v43  ;;  %v9246_v34 = vld [vmem:[#allocation44_spill] sm:$0xff]  ;;  %v9247_v2 = vld [vmem:[#allocation54_spill] sm:$0xff] }
 0x202   :  { %v4839_v29 = vpop.eup %4838  ;;  %v1859_v16 = vpack.c.bf16 %v4833_v49, %v4837_v41  ;;  %2623 = vmatmul.mubr.bf16.gmra.mxu1 %v4298_v25  ;;  %2439 = vmatprep.mubr.bf16.mxu0 %v4303_v9  ;;  %v9248_v20 = vpack.c.bf16 %v9246_v34, %v9247_v2  ;;  %v9251_v49 = vpack.c.bf16 %v9249_v37, %v9250_v45  ;;  %v4307_v41 = vld [vmem:[%s8736_s5 + $0x10] ss:$8 sps:$4 sm:$0xff]   ;;  %v4310_v25 = vld [vmem:[%s8736_s5 + $0x20] ss:$8 sps:$4 sm:$0xff]   ;;  %v4333_v46 = vld [vmem:[%s8736_s5 + $0x94] ss:$8 sps:$4 sm:$0xff]  }
 0x203   :  { %v4841_v57 = vpop.eup %4840  ;;  %3050 = vmatpush2.bf16.msra.mxu0 %v1857_v52  ;;  %2632 = vmatprep.mubr.bf16.mxu1 %v4303_v9  ;;  %v7340_v33 = vpop.permute.xlu0 %2829  ;;  %v4328_v13 = vld [vmem:[%s8736_s5 + $0x80] ss:$8 sps:$4 sm:$0xff]  }
 0x204   :  { %v4843_v54 = vpop.eup %4842  ;;  %3243 = vmatpush2.bf16.msra.mxu1 %v1859_v16  ;;  %3051 = vmatprep.subr.bf16.mxu0 %v1854_v63  ;;  %9238 = vst [vmem:[#allocation33_spill] sm:$0xff] %v7340_v33  ;;  %v7348_v18 = vpop.permute.xlu1 %2834  ;;  %v4315_v63 = vld [vmem:[%s8736_s5 + $0x34] ss:$8 sps:$4 sm:$0xff]  }
 0x205   :  { %v4845_v55 = vpop.eup %4844  ;;  %3244 = vmatprep.subr.bf16.mxu1 %v1856_v36  ;;  %v1853_v39 = vpack.c.bf16 %v4839_v29, %v4843_v54  ;;  %9244 = vst [vmem:[#allocation22_spill] sm:$0xff] %v7348_v18  ;;  %v4312_v29 = vld [vmem:[%s8736_s5 + $0x24] ss:$8 sps:$4 sm:$0xff]   ;;  %v4313_v54 = vld [vmem:[%s8736_s5 + $0x30] ss:$8 sps:$4 sm:$0xff]  }
 0x206   :  { %v4847_v31 = vpop.eup %4846  ;;  %v1855_v32 = vpack.c.bf16 %v4841_v57, %v4845_v55 }
 0x207   :  { %v4849_v48 = vpop.eup %4848  ;;  %v1852_v35 = vpack.c.bf16 %v7161_v44, %v4847_v31  ;;  %3052 = vmatpush2.bf16.msra.mxu0 %v1853_v39  ;;  %v1846_v44 = vpack.c.bf16 %v7144_v6, %v7141_v38  ;;  %v7353_v51 = vpop.permute.xlu0 %2819  ;;  %v4318_v31 = vld [vmem:[%s8736_s5 + $0x44] ss:$8 sps:$4 sm:$0xff]  }
 0x208   :  { %v4851_v58 = vpop.eup %4850  ;;  %3245 = vmatpush2.bf16.msra.mxu1 %v1855_v32  ;;  %3053 = vmatprep.subr.bf16.mxu0 %v1850_v17  ;;  %9245 = vst [vmem:[#allocation9_spill] sm:$0xff] %v7353_v51  ;;  %v7364_v30 = vpop.permute.xlu1 %2824  ;;  %v4321_v17 = vld [vmem:[%s8736_s5 + $0x54] ss:$8 sps:$4 sm:$0xff]  }
 0x209   :  { %v4853_v19 = vpop.eup %4852  ;;  %3246 = vmatprep.subr.bf16.mxu1 %v1852_v35  ;;  %2440 = vmatmul.mubr.bf16.gmra.mxu0 %v4301_v40  ;;  %9252 = vst [vmem:[#allocation10_spill] sm:$0xff] %v7364_v30 }
 0x20a   :  { %v4855_v10 = vpop.eup %4854  ;;  %v1851_v14 = vpack.c.bf16 %v4849_v48, %v4853_v19  ;;  %2633 = vmatmul.mubr.bf16.gmra.mxu1 %v4301_v40  ;;  %3059 = vmatprep.mubr.bf16.mxu0 %v4306_v8  ;;  %v4316_v48 = vld [vmem:[%s8736_s5 + $0x40] ss:$8 sps:$4 sm:$0xff]   ;;  %v4319_v19 = vld [vmem:[%s8736_s5 + $0x50] ss:$8 sps:$4 sm:$0xff]  }
 0x20b   :  { %v4857_v22 = vpop.eup %4856  ;;  %v1848_v50 = vpack.c.bf16 %v4851_v58, %v4855_v10  ;;  %3054 = vmatpush2.bf16.msra.mxu0 %v9237_v12  ;;  %3252 = vmatprep.mubr.bf16.mxu1 %v4306_v8  ;;  %v7366_v59 = vpop.permute.xlu0 %2809  ;;  %v4327_v8 = vld [vmem:[%s8736_s5 + $0x74] ss:$8 sps:$4 sm:$0xff]  }
 0x20c   :  { %v4859_v27 = vpop.eup %4858  ;;  %3247 = vmatpush2.bf16.msra.mxu1 %v1851_v14  ;;  %3055 = vmatprep.subr.bf16.mxu0 %v1846_v44  ;;  %9253 = vst [vmem:[#allocation38_spill] sm:$0xff] %v7366_v59  ;;  %v7374_v52 = vpop.permute.xlu1 %2814  ;;  %v4324_v14 = vld [vmem:[%s8736_s5 + $0x64] ss:$8 sps:$4 sm:$0xff]   ;;  %v4322_v44 = vld [vmem:[%s8736_s5 + $0x60] ss:$8 sps:$4 sm:$0xff]  }
 0x20d   :  { %v4861_v47 = vpop.eup %4860  ;;  %3248 = vmatprep.subr.bf16.mxu1 %v1848_v50  ;;  %9254 = vst [vmem:[#allocation11_spill] sm:$0xff] %v7374_v52 }
 0x20e   :  { %v4863_v62 = vpop.eup %4862  ;;  %v1842_v38 = vpack.c.bf16 %v4857_v22, %v4861_v47  ;;  %v4325_v47 = vld [vmem:[%s8736_s5 + $0x70] ss:$8 sps:$4 sm:$0xff]  }
 0x20f   :  { %v1844_v6 = vpack.c.bf16 %v4859_v27, %v4863_v62  ;;  %3056 = vmatpush2.bf16.msra.mxu0 %v9240_v3  ;;  %v7376_v16 = vpop.permute.xlu0 %2799  ;;  %v4330_v62 = vld [vmem:[%s8736_s5 + $0x84] ss:$8 sps:$4 sm:$0xff]  }
 0x210   :  { %3249 = vmatpush2.bf16.msra.mxu1 %v9243_v0  ;;  %3057 = vmatprep.subr.bf16.mxu0 %v1842_v38  ;;  %v7381_v57 = vpop.permute.xlu1 %2804 }
 0x211   :  { %3250 = vmatprep.subr.bf16.mxu1 %v1844_v6 }
 0x213   :  { %3058 = vmatpush2.bf16.msra.mxu0 %v9248_v20  ;;  %v7386_v36 = vpop.permute.xlu0 %2789 }
 0x214   :  { %3251 = vmatpush2.bf16.msra.mxu1 %v9251_v49  ;;  %v7388_v9 = vpop.permute.xlu1 %2794 }
 0x216   :  { %3060 = vmatmul.mubr.bf16.vlgmr.msra.gmra.mxu0 %v4304_v1 }
 0x217   :  { %3253 = vmatmul.mubr.bf16.vlgmr.msra.gmra.mxu1 %v4304_v1  ;;  %3069 = vmatprep.mubr.bf16.mxu0 %v4309_v4  ;;  %v7393_v55 = vpop.permute.xlu0 %2009 }
 0x218   :  { %3262 = vmatprep.mubr.bf16.mxu1 %v4309_v4  ;;  %v7398_v39 = vpop.permute.xlu1 %2014 }
 0x21b   :  { %v7400_v32 = vpop.permute.xlu0 %1999 }
 0x21c   :  { %v7408_v35 = vpop.permute.xlu1 %2004 }
 0x21e   :  { %3070 = vmatmul.mubr.bf16.gmra.mxu0 %v4307_v41 }
 0x21f   :  { %3263 = vmatmul.mubr.bf16.gmra.mxu1 %v4307_v41  ;;  %3079 = vmatprep.mubr.bf16.mxu0 %v4312_v29  ;;  %v7410_v58 = vpop.permute.xlu0 %1989 }
 0x220   :  { %3272 = vmatprep.mubr.bf16.mxu1 %v4312_v29  ;;  %9255 = vst [vmem:[#allocation37_spill] sm:$0xff] %v7410_v58  ;;  %v7415_v10 = vpop.permute.xlu1 %1994 }
 0x221   :  { %9256 = vst [vmem:[#allocation26_spill] sm:$0xff] %v7415_v10 }
 0x223   :  { %v7420_v40 = vpop.permute.xlu0 %1979 }
 0x224   :  { %9257 = vst [vmem:[#allocation18_spill] sm:$0xff] %v7420_v40  ;;  %v7422_v22 = vpop.permute.xlu1 %1984 }
 0x225   :  { %9258 = vst [vmem:[#allocation16_spill] sm:$0xff] %v7422_v22 }
 0x226   :  { %3080 = vmatmul.mubr.bf16.gmra.mxu0 %v4310_v25 }
 0x227   :  { %3273 = vmatmul.mubr.bf16.gmra.mxu1 %v4310_v25  ;;  %3089 = vmatprep.mubr.bf16.mxu0 %v4315_v63  ;;  %v7427_v50 = vpop.permute.xlu0 %1969 }
 0x228   :  { %3282 = vmatprep.mubr.bf16.mxu1 %v4315_v63  ;;  %v7432_v27 = vpop.permute.xlu1 %1974  ;;  %v4331_v63 = vld [vmem:[%s8736_s5 + $0x90] ss:$8 sps:$4 sm:$0xff]  }
 0x22b   :  { %v7434_v12 = vpop.permute.xlu0 %1959 }
 0x22c   :  { %v7442_v38 = vpop.permute.xlu1 %1964 }
 0x22e   :  { %3090 = vmatmul.mubr.bf16.gmra.mxu0 %v4313_v54 }
 0x22f   :  { %3283 = vmatmul.mubr.bf16.gmra.mxu1 %v4313_v54  ;;  %3099 = vmatprep.mubr.bf16.mxu0 %v4318_v31  ;;  %v1950_v6 = vpop.permute.xlu0 %1949 }
 0x230   :  { %3292 = vmatprep.mubr.bf16.mxu1 %v4318_v31  ;;  %v1955_v3 = vpop.permute.xlu1 %1954 }
 0x233   :  { %v1940_v43 = vpop.permute.xlu0 %1939 }
 0x234   :  { %v1945_v49 = vpop.permute.xlu1 %1944 }
 0x236   :  { %3100 = vmatmul.mubr.bf16.gmra.mxu0 %v4316_v48 }
 0x237   :  { %3293 = vmatmul.mubr.bf16.gmra.mxu1 %v4316_v48  ;;  %3109 = vmatprep.mubr.bf16.mxu0 %v4321_v17  ;;  %v4336_v48 = vld [vmem:[%s8736_s5 + $0xa4] ss:$8 sps:$4 sm:$0xff]  }
 0x238   :  { %3302 = vmatprep.mubr.bf16.mxu1 %v4321_v17 }
 0x23e   :  { %3110 = vmatmul.mubr.bf16.gmra.mxu0 %v4319_v19 }
 0x23f   :  { %3303 = vmatmul.mubr.bf16.gmra.mxu1 %v4319_v19  ;;  %3119 = vmatprep.mubr.bf16.mxu0 %v4324_v14 }
 0x240   :  { %3312 = vmatprep.mubr.bf16.mxu1 %v4324_v14 }
 0x246   :  { %3120 = vmatmul.mubr.bf16.gmra.mxu0 %v4322_v44 }
 0x247   :  { %3313 = vmatmul.mubr.bf16.gmra.mxu1 %v4322_v44  ;;  %3129 = vmatprep.mubr.bf16.mxu0 %v4327_v8 }
 0x248   :  { %3322 = vmatprep.mubr.bf16.mxu1 %v4327_v8 }
 0x24e   :  { %3130 = vmatmul.mubr.bf16.gmra.mxu0 %v4325_v47 }
 0x24f   :  { %3323 = vmatmul.mubr.bf16.gmra.mxu1 %v4325_v47  ;;  %3139 = vmatprep.mubr.bf16.mxu0 %v4330_v62  ;;  %v2291_v0 = vpop.f32.mrf.mxu0 }
 0x250   :  { %3332 = vmatprep.mubr.bf16.mxu1 %v4330_v62  ;;  %v2292_v1 = vadd.f32 %v2291_v0, %v1940_v43  ;;  %v2484_v34 = vpop.f32.mrf.mxu1 }
 0x251   :  { %v2485_v2 = vadd.f32 %v2484_v34, %v1940_v43  ;;  %v2293_v20 = vpop.f32.mrf.mxu0 }
 0x252   :  { %4864 = vtanh.f32 %v2292_v1  ;;  %v2294_v37 = vadd.f32 %v2293_v20, %v1940_v43  ;;  %v2486_v45 = vpop.f32.mrf.mxu1  ;;  %v4334_v20 = vld [vmem:[%s8736_s5 + $0xa0] ss:$8 sps:$4 sm:$0xff]  }
 0x253   :  { %4866 = vtanh.f32 %v2485_v2  ;;  %v2487_v4 = vadd.f32 %v2486_v45, %v1940_v43  ;;  %v2295_v41 = vpop.f32.mrf.mxu0 }
 0x254   :  { %4868 = vtanh.f32 %v2294_v37  ;;  %v2296_v29 = vadd.f32 %v2295_v41, %v1945_v49  ;;  %v2488_v25 = vpop.f32.mrf.mxu1 }
 0x255   :  { %4870 = vtanh.f32 %v2487_v4  ;;  %v2489_v54 = vadd.f32 %v2488_v25, %v1945_v49  ;;  %v2297_v31 = vpop.f32.mrf.mxu0 }
 0x256   :  { %3140 = vmatmul.mubr.bf16.gmra.mxu0 %v4328_v13  ;;  %4872 = vtanh.f32 %v2296_v29  ;;  %v2298_v17 = vadd.f32 %v2297_v31, %v1945_v49  ;;  %v2490_v19 = vpop.f32.mrf.mxu1 }
 0x257   :  { %3333 = vmatmul.mubr.bf16.gmra.mxu1 %v4328_v13  ;;  %3149 = vmatprep.mubr.bf16.mxu0 %v4333_v46  ;;  %4874 = vtanh.f32 %v2489_v54  ;;  %v2491_v14 = vadd.f32 %v2490_v19, %v1945_v49  ;;  %v2301_v44 = vpop.f32.mrf.mxu0  ;;  %v4339_v49 = vld [vmem:[%s8736_s5 + $0xb4] ss:$8 sps:$4 sm:$0xff]  }
 0x258   :  { %3342 = vmatprep.mubr.bf16.mxu1 %v4333_v46  ;;  %4876 = vtanh.f32 %v2298_v17  ;;  %v2302_v8 = vadd.f32 %v2301_v44, %v1950_v6  ;;  %v2494_v47 = vpop.f32.mrf.mxu1 }
 0x259   :  { %4878 = vtanh.f32 %v2491_v14  ;;  %v2495_v62 = vadd.f32 %v2494_v47, %v1950_v6  ;;  %v2303_v13 = vpop.f32.mrf.mxu0 }
 0x25a   :  { %4880 = vtanh.f32 %v2302_v8  ;;  %v2304_v46 = vadd.f32 %v2303_v13, %v1950_v6  ;;  %v2496_v43 = vpop.f32.mrf.mxu1 }
 0x25b   :  { %4882 = vtanh.f32 %v2495_v62  ;;  %v2497_v0 = vadd.f32 %v2496_v43, %v1950_v6  ;;  %v2305_v1 = vpop.f32.mrf.mxu0 }
 0x25c   :  { %4884 = vtanh.f32 %v2304_v46  ;;  %v2306_v34 = vadd.f32 %v2305_v1, %v1955_v3  ;;  %v2498_v2 = vpop.f32.mrf.mxu1 }
 0x25d   :  { %4886 = vtanh.f32 %v2497_v0  ;;  %v2499_v37 = vadd.f32 %v2498_v2, %v1955_v3  ;;  %v2307_v45 = vpop.f32.mrf.mxu0  ;;  %v4337_v0 = vld [vmem:[%s8736_s5 + $0xb0] ss:$8 sps:$4 sm:$0xff]   ;;  %v7486_v2 = vpop.permute.xlu0 %2089 }
 0x25e   :  { %3150 = vmatmul.mubr.bf16.gmra.mxu0 %v4331_v63  ;;  %4888 = vtanh.f32 %v2306_v34  ;;  %v2308_v4 = vadd.f32 %v2307_v45, %v1955_v3  ;;  %v2500_v41 = vpop.f32.mrf.mxu1 }
 0x25f   :  { %3343 = vmatmul.mubr.bf16.gmra.mxu1 %v4331_v63  ;;  %3159 = vmatprep.mubr.bf16.mxu0 %v4336_v48  ;;  %v7462_v29 = vpop.eup %4864  ;;  %4890 = vtanh.f32 %v2499_v37  ;;  %v2501_v6 = vadd.f32 %v2500_v41, %v1955_v3  ;;  %v2311_v25 = vpop.f32.mrf.mxu0  ;;  %v4342_v37 = vld [vmem:[%s8736_s5 + $0xc4] ss:$8 sps:$4 sm:$0xff]  }
 0x260   :  { %3352 = vmatprep.mubr.bf16.mxu1 %v4336_v48  ;;  %9259 = vst [vmem:[#allocation12_spill] sm:$0xff] %v7462_v29  ;;  %v7464_v63 = vpop.eup %4866  ;;  %4892 = vtanh.f32 %v2308_v4  ;;  %v2312_v54 = vadd.f32 %v2311_v25, %v7434_v12  ;;  %v2504_v31 = vpop.f32.mrf.mxu1 }
 0x261   :  { %9260 = vst [vmem:[#allocation17_spill] sm:$0xff] %v7464_v63  ;;  %v7467_v48 = vpop.eup %4868  ;;  %4894 = vtanh.f32 %v2501_v6  ;;  %v2505_v17 = vadd.f32 %v2504_v31, %v7434_v12  ;;  %v2313_v19 = vpop.f32.mrf.mxu0 }
 0x262   :  { %9261 = vst [vmem:[#allocation41_spill] sm:$0xff] %v7467_v48  ;;  %v7470_v14 = vpop.eup %4870  ;;  %4896 = vtanh.f32 %v2312_v54  ;;  %v2314_v3 = vadd.f32 %v2313_v19, %v7434_v12  ;;  %v2506_v44 = vpop.f32.mrf.mxu1 }
 0x263   :  { %9262 = vst [vmem:[#allocation36_spill] sm:$0xff] %v7470_v14  ;;  %v7473_v8 = vpop.eup %4872  ;;  %4898 = vtanh.f32 %v2505_v17  ;;  %v2507_v47 = vadd.f32 %v2506_v44, %v7434_v12  ;;  %v2315_v62 = vpop.f32.mrf.mxu0 }
 0x264   :  { %9263 = vst [vmem:[#allocation8_spill] sm:$0xff] %v7473_v8  ;;  %v7476_v13 = vpop.eup %4874  ;;  %4900 = vtanh.f32 %v2314_v3  ;;  %v2316_v46 = vadd.f32 %v2315_v62, %v7442_v38  ;;  %v2508_v43 = vpop.f32.mrf.mxu1 }
 0x265   :  { %9264 = vst [vmem:[#allocation39_spill] sm:$0xff] %v7476_v13  ;;  %v7484_v34 = vpop.eup %4876  ;;  %4902 = vtanh.f32 %v2507_v47  ;;  %v2509_v12 = vadd.f32 %v2508_v43, %v7442_v38  ;;  %v7509_v62 = vpop.permute.xlu1 %2094 }
 0x266   :  { %3160 = vmatmul.mubr.bf16.gmra.mxu0 %v4334_v20  ;;  %9265 = vst [vmem:[#allocation19_spill] sm:$0xff] %v7484_v34  ;;  %4904 = vtanh.f32 %v2316_v46  ;;  %v2510_v41 = vpop.f32.mrf.mxu1 }
 0x267   :  { %3353 = vmatmul.mubr.bf16.gmra.mxu1 %v4334_v20  ;;  %3169 = vmatprep.mubr.bf16.mxu0 %v4339_v49  ;;  %v2317_v20 = vpop.f32.mrf.mxu0  ;;  %4906 = vtanh.f32 %v2509_v12  ;;  %v2511_v54 = vadd.f32 %v2510_v41, %v7442_v38  ;;  %v7517_v41 = vpop.permute.xlu0 %2079 }
 0x268   :  { %3362 = vmatprep.mubr.bf16.mxu1 %v4339_v49  ;;  %v7494_v49 = vpop.eup %4878  ;;  %v2318_v4 = vadd.f32 %v2317_v20, %v7442_v38  ;;  %v2514_v44 = vpop.f32.mrf.mxu1 }
 0x269   :  { %9266 = vst [vmem:[#allocation13_spill] sm:$0xff] %v7494_v49  ;;  %v7499_v25 = vpop.eup %4880  ;;  %v2321_v31 = vpop.f32.mrf.mxu0  ;;  %v2515_v46 = vadd.f32 %v2514_v44, %v7427_v50 }
 0x26a   :  { %9267 = vst [vmem:[#allocation49_spill] sm:$0xff] %v7499_v25  ;;  %v7504_v19 = vpop.eup %4882  ;;  %4908 = vtanh.f32 %v2318_v4  ;;  %v2322_v3 = vadd.f32 %v2321_v31, %v7427_v50  ;;  %v2516_v20 = vpop.f32.mrf.mxu1 }
 0x26b   :  { %9268 = vst [vmem:[#allocation52_spill] sm:$0xff] %v7504_v19  ;;  %v7507_v47 = vpop.eup %4884  ;;  %4910 = vtanh.f32 %v2511_v54  ;;  %v2323_v38 = vpop.f32.mrf.mxu0 }
 0x26c   :  { %9269 = vst [vmem:[#allocation27_spill] sm:$0xff] %v7507_v47  ;;  %v7512_v43 = vpop.eup %4886  ;;  %4912 = vtanh.f32 %v2322_v3  ;;  %v2324_v12 = vadd.f32 %v2323_v38, %v7427_v50  ;;  %v4340_v3 = vld [vmem:[%s8736_s5 + $0xc0] ss:$8 sps:$4 sm:$0xff]   ;;  %v7553_v29 = vpop.permute.xlu0 %2069 }
 0x26d   :  { %9270 = vst [vmem:[#allocation51_spill] sm:$0xff] %v7512_v43  ;;  %v7515_v4 = vpop.eup %4888  ;;  %4914 = vtanh.f32 %v2515_v46  ;;  %v2325_v31 = vpop.f32.mrf.mxu0 }
 0x26e   :  { %3170 = vmatmul.mubr.bf16.gmra.mxu0 %v4337_v0  ;;  %9271 = vst [vmem:[#allocation48_spill] sm:$0xff] %v7515_v4  ;;  %v7520_v54 = vpop.eup %4890  ;;  %4916 = vtanh.f32 %v2324_v12  ;;  %v2326_v44 = vadd.f32 %v2325_v31, %v7432_v27  ;;  %v4345_v12 = vld [vmem:[%s8736_s5 + $0xd4] ss:$8 sps:$4 sm:$0xff]  }
 0x26f   :  { %3363 = vmatmul.mubr.bf16.gmra.mxu1 %v4337_v0  ;;  %3179 = vmatprep.mubr.bf16.mxu0 %v4342_v37  ;;  %v2517_v0 = vadd.f32 %v2516_v20, %v7427_v50  ;;  %9272 = vst [vmem:[#allocation35_spill] sm:$0xff] %v7520_v54  ;;  %v7528_v45 = vpop.eup %4892  ;;  %v2327_v50 = vpop.f32.mrf.mxu0 }
 0x270   :  { %3372 = vmatprep.mubr.bf16.mxu1 %v4342_v37  ;;  %v2518_v37 = vpop.f32.mrf.mxu1  ;;  %9273 = vst [vmem:[#allocation31_spill] sm:$0xff] %v7528_v45  ;;  %v7536_v31 = vpop.eup %4894  ;;  %v2328_v1 = vadd.f32 %v2327_v50, %v7432_v27 }
 0x271   :  { %4918 = vtanh.f32 %v2517_v0  ;;  %v2519_v46 = vadd.f32 %v2518_v37, %v7432_v27  ;;  %9274 = vst [vmem:[#allocation30_spill] sm:$0xff] %v7536_v31  ;;  %v7541_v0 = vpop.eup %4896  ;;  %v7543_v37 = vpop.permute.xlu1 %2084 }
 0x272   :  { %4920 = vtanh.f32 %v2326_v44  ;;  %v2520_v17 = vpop.f32.mrf.mxu1  ;;  %9275 = vst [vmem:[#allocation45_spill] sm:$0xff] %v7541_v0  ;;  %v2331_v63 = vpop.f32.mrf.mxu0 }
 0x273   :  { %4922 = vtanh.f32 %v2519_v46  ;;  %v2521_v38 = vadd.f32 %v2520_v17, %v7432_v27  ;;  %v7548_v13 = vpop.eup %4898  ;;  %v2332_v44 = vadd.f32 %v2331_v63, %v7420_v40 }
 0x274   :  { %9276 = vst [vmem:[#allocation50_spill] sm:$0xff] %v7548_v13  ;;  %4924 = vtanh.f32 %v2328_v1  ;;  %v2524_v50 = vpop.f32.mrf.mxu1  ;;  %v7551_v6 = vpop.eup %4900 }
 0x275   :  { %9277 = vst [vmem:[#allocation43_spill] sm:$0xff] %v7551_v6  ;;  %4926 = vtanh.f32 %v2521_v38  ;;  %v2525_v46 = vadd.f32 %v2524_v50, %v7420_v40  ;;  %v7556_v27 = vpop.f32.mrf.mxu0  ;;  %v7558_v17 = vpop.eup %4902  ;;  %v4343_v38 = vld [vmem:[%s8736_s5 + $0xd0] ss:$8 sps:$4 sm:$0xff]  }
 0x276   :  { %3180 = vmatmul.mubr.bf16.gmra.mxu0 %v4340_v3  ;;  %9278 = vst [vmem:[#allocation44_spill] sm:$0xff] %v7556_v27  ;;  %9279 = vst [vmem:[#allocation54_spill] sm:$0xff] %v7558_v17  ;;  %v7560_v20 = vpop.f32.mrf.mxu1  ;;  %v7562_v1 = vpop.eup %4904  ;;  %4928 = vtanh.f32 %v2332_v44  ;;  %v4348_v44 = vld [vmem:[%s8736_s5 + $0xe4] ss:$8 sps:$4 sm:$0xff]  }
 0x277   :  { %3373 = vmatmul.mubr.bf16.gmra.mxu1 %v4340_v3  ;;  %3189 = vmatprep.mubr.bf16.mxu0 %v4345_v12  ;;  %9280 = vst [vmem:[#allocation42_spill] sm:$0xff] %v7560_v20  ;;  %9281 = vst [vmem:[#allocation32_spill] sm:$0xff] %v7562_v1  ;;  %v2335_v63 = vpop.f32.mrf.mxu0  ;;  %v7564_v8 = vpop.eup %4906  ;;  %4930 = vtanh.f32 %v2525_v46 }
 0x278   :  { %3382 = vmatprep.mubr.bf16.mxu1 %v4345_v12  ;;  %9282 = vst [vmem:[#allocation55_spill] sm:$0xff] %v7564_v8  ;;  %v2336_v3 = vadd.f32 %v2335_v63, %v7422_v22  ;;  %v2528_v14 = vpop.f32.mrf.mxu1  ;;  %v7572_v50 = vpop.eup %4908 }
 0x279   :  { %9283 = vst [vmem:[#allocation56_spill] sm:$0xff] %v7572_v50  ;;  %v7574_v49 = vpop.permute.xlu1 %2074  ;;  %v2529_v48 = vadd.f32 %v2528_v14, %v7422_v22  ;;  %v7577_v34 = vpop.f32.mrf.mxu0 }
 0x27a   :  { %9284 = vst [vmem:[#allocation57_spill] sm:$0xff] %v7577_v34  ;;  %v7584_v19 = vpop.eup %4910  ;;  %4932 = vtanh.f32 %v2336_v3  ;;  %v7586_v12 = vpop.f32.mrf.mxu1 }
 0x27b   :  { %9285 = vst [vmem:[#allocation58_spill] sm:$0xff] %v7584_v19  ;;  %9286 = vst [vmem:[#allocation59_spill] sm:$0xff] %v7586_v12  ;;  %v7590_v46 = vpop.eup %4912  ;;  %v7592_v14 = vpop.permute.xlu0 %2059  ;;  %4934 = vtanh.f32 %v2529_v48 }
 0x27c   :  { %9287 = vst [vmem:[#allocation60_spill] sm:$0xff] %v7590_v46  ;;  %v2341_v25 = vpop.f32.mrf.mxu0  ;;  %v7596_v43 = vpop.eup %4914 }
 0x27d   :  { %9288 = vst [vmem:[#allocation61_spill] sm:$0xff] %v7596_v43  ;;  %v2342_v63 = vadd.f32 %v2341_v25, %v7410_v58  ;;  %v2534_v31 = vpop.f32.mrf.mxu1  ;;  %v7599_v3 = vpop.eup %4916 }
 0x27e   :  { %3190 = vmatmul.mubr.bf16.gmra.mxu0 %v4343_v38  ;;  %9289 = vst [vmem:[#allocation62_spill] sm:$0xff] %v7599_v3  ;;  %v2535_v54 = vadd.f32 %v2534_v31, %v7410_v58  ;;  %v7602_v47 = vpop.f32.mrf.mxu0  ;;  %v7604_v48 = vpop.eup %4918  ;;  %v4346_v31 = vld [vmem:[%s8736_s5 + $0xe0] ss:$8 sps:$4 sm:$0xff]  }
 0x27f   :  { %3383 = vmatmul.mubr.bf16.gmra.mxu1 %v4343_v38  ;;  %9290 = vst [vmem:[#allocation63_spill] sm:$0xff] %v7602_v47  ;;  %3199 = vmatprep.mubr.bf16.mxu0 %v4348_v44  ;;  %9291 = vst [vmem:[#allocation64_spill] sm:$0xff] %v7604_v48  ;;  %v7606_v45 = vpop.f32.mrf.mxu1  ;;  %v7608_v4 = vpop.eup %4920  ;;  %4936 = vtanh.f32 %v2342_v63  ;;  %v4351_v63 = vld [vmem:[%s8736_s5 + $0xf4] ss:$8 sps:$4 sm:$0xff]  }
 0x280   :  { %3392 = vmatprep.mubr.bf16.mxu1 %v4348_v44  ;;  %9292 = vst [vmem:[#allocation65_spill] sm:$0xff] %v7606_v45  ;;  %9293 = vst [vmem:[#allocation66_spill] sm:$0xff] %v7608_v4  ;;  %v7610_v13 = vpop.permute.xlu1 %2064  ;;  %v2345_v25 = vpop.f32.mrf.mxu0  ;;  %4938 = vtanh.f32 %v2535_v54 }
 0x281   :  { %v7612_v8 = vpop.eup %4922  ;;  %v2346_v38 = vadd.f32 %v2345_v25, %v7415_v10  ;;  %v2538_v0 = vpop.f32.mrf.mxu1 }
 0x282   :  { %9294 = vst [vmem:[#allocation67_spill] sm:$0xff] %v7612_v8  ;;  %v7620_v1 = vpop.eup %4924  ;;  %v7622_v17 = vpop.permute.xlu0 %2049  ;;  %v2539_v19 = vadd.f32 %v2538_v0, %v7415_v10 }
 0x283   :  { %9295 = vst [vmem:[#allocation68_spill] sm:$0xff] %v7620_v1  ;;  %v7625_v6 = vpop.f32.mrf.mxu0  ;;  %v7632_v50 = vpop.eup %4926  ;;  %4940 = vtanh.f32 %v2346_v38 }
 0x284   :  { %9296 = vst [vmem:[#allocation69_spill] sm:$0xff] %v7625_v6  ;;  %9297 = vst [vmem:[#allocation70_spill] sm:$0xff] %v7632_v50  ;;  %v7634_v44 = vpop.f32.mrf.mxu1  ;;  %4942 = vtanh.f32 %v2539_v19  ;;  %v7641_v27 = vpop.eup %4928 }
 0x285   :  { %9298 = vst [vmem:[#allocation71_spill] sm:$0xff] %v7634_v44  ;;  %v2351_v54 = vpop.f32.mrf.mxu0  ;;  %9299 = vst [vmem:[#allocation72_spill] sm:$0xff] %v7641_v27  ;;  %v7643_v25 = vpop.permute.xlu1 %2054  ;;  %v9408_v44 = vld [vmem:[#allocation3_spill] sm:$0xff] }
 0x286   :  { %v2352_v4 = vadd.f32 %v2351_v54, %v7400_v32  ;;  %v2544_v20 = vpop.f32.mrf.mxu1  ;;  %3200 = vmatmul.mubr.bf16.gmra.mxu0 %v4346_v31  ;;  %v7646_v46 = vpop.eup %4930 }
 0x287   :  { %3393 = vmatmul.mubr.bf16.gmra.mxu1 %v4346_v31  ;;  %v2545_v38 = vadd.f32 %v2544_v20, %v7400_v32  ;;  %v2353_v43 = vpop.f32.mrf.mxu0  ;;  %3209 = vmatprep.mubr.bf16.mxu0 %v4351_v63  ;;  %9300 = vst [vmem:[#allocation73_spill] sm:$0xff] %v7646_v46  ;;  %v7649_v8 = vpop.eup %4932 }
 0x288   :  { %3402 = vmatprep.mubr.bf16.mxu1 %v4351_v63  ;;  %4944 = vtanh.f32 %v2352_v4  ;;  %v2354_v19 = vadd.f32 %v2353_v43, %v7400_v32  ;;  %v2546_v0 = vpop.f32.mrf.mxu1  ;;  %9301 = vst [vmem:[#allocation74_spill] sm:$0xff] %v7649_v8  ;;  %v7651_v54 = vpop.permute.xlu0 %2039  ;;  %v4349_v4 = vld [vmem:[%s8736_s5 + $0xf0] ss:$8 sps:$4 sm:$0xff]  }
 0x289   :  { %4946 = vtanh.f32 %v2545_v38  ;;  %v2547_v31 = vadd.f32 %v2546_v0, %v7400_v32  ;;  %v2355_v48 = vpop.f32.mrf.mxu0  ;;  %v7654_v50 = vpop.eup %4934 }
 0x28a   :  { %9302 = vst [vmem:[#allocation75_spill] sm:$0xff] %v7654_v50  ;;  %4948 = vtanh.f32 %v2354_v19  ;;  %v2356_v20 = vadd.f32 %v2355_v48, %v7408_v35  ;;  %v2548_v63 = vpop.f32.mrf.mxu1  ;;  %v7666_v48 = vpop.permute.xlu1 %2044 }
 0x28b   :  { %4950 = vtanh.f32 %v2547_v31  ;;  %v2549_v3 = vadd.f32 %v2548_v63, %v7408_v35  ;;  %v2357_v38 = vpop.f32.mrf.mxu0 }
 0x28c   :  { %4952 = vtanh.f32 %v2356_v20  ;;  %v2358_v0 = vadd.f32 %v2357_v38, %v7408_v35  ;;  %v2550_v19 = vpop.f32.mrf.mxu1  ;;  %v7670_v63 = vpop.eup %4936 }
 0x28d   :  { %4954 = vtanh.f32 %v2549_v3  ;;  %v2551_v1 = vadd.f32 %v2550_v19, %v7408_v35  ;;  %v2361_v40 = vpop.f32.mrf.mxu0  ;;  %9303 = vst [vmem:[#allocation76_spill] sm:$0xff] %v7670_v63  ;;  %v7672_v27 = vpop.permute.xlu0 %2029 }
 0x28e   :  { %4956 = vtanh.f32 %v2358_v0  ;;  %v2362_v43 = vadd.f32 %v2361_v40, %v7393_v55  ;;  %v2554_v31 = vpop.f32.mrf.mxu1  ;;  %3210 = vmatmul.mubr.bf16.gmra.mxu0 %v4349_v4  ;;  %v7675_v32 = vpop.eup %4938 }
 0x28f   :  { %3403 = vmatmul.mubr.bf16.gmra.mxu1 %v4349_v4  ;;  %4958 = vtanh.f32 %v2551_v1  ;;  %v2555_v20 = vadd.f32 %v2554_v31, %v7393_v55  ;;  %v2363_v38 = vpop.f32.mrf.mxu0  ;;  %9304 = vst [vmem:[#allocation77_spill] sm:$0xff] %v7675_v32  ;;  %v7686_v50 = vpop.permute.xlu1 %2034 }
 0x290   :  { %4960 = vtanh.f32 %v2362_v43  ;;  %v2364_v35 = vadd.f32 %v2363_v38, %v7393_v55  ;;  %v2556_v3 = vpop.f32.mrf.mxu1  ;;  %v7678_v0 = vpop.eup %4940 }
 0x291   :  { %9305 = vst [vmem:[#allocation78_spill] sm:$0xff] %v7678_v0  ;;  %4962 = vtanh.f32 %v2555_v20  ;;  %v2557_v40 = vadd.f32 %v2556_v3, %v7393_v55  ;;  %v2365_v4 = vpop.f32.mrf.mxu0  ;;  %v7681_v19 = vpop.eup %4942 }
 0x292   :  { %9306 = vst [vmem:[#allocation79_spill] sm:$0xff] %v7681_v19  ;;  %4964 = vtanh.f32 %v2364_v35  ;;  %v2366_v1 = vadd.f32 %v2365_v4, %v7398_v39  ;;  %v2558_v46 = vpop.f32.mrf.mxu1  ;;  %v2020_v4 = vpop.permute.xlu0 %2019 }
 0x293   :  { %4966 = vtanh.f32 %v2557_v40  ;;  %v2559_v43 = vadd.f32 %v2558_v46, %v7398_v39  ;;  %v2367_v38 = vpop.f32.mrf.mxu0 }
 0x294   :  { %4968 = vtanh.f32 %v2366_v1  ;;  %v2368_v55 = vadd.f32 %v2367_v38, %v7398_v39  ;;  %v2560_v3 = vpop.f32.mrf.mxu1 }
 0x295   :  { %v7692_v35 = vpop.eup %4944  ;;  %4970 = vtanh.f32 %v2559_v43  ;;  %v2561_v8 = vadd.f32 %v2560_v3, %v7398_v39  ;;  %v2371_v31 = vpop.f32.mrf.mxu0 }
 0x296   :  { %9307 = vst [vmem:[#allocation80_spill] sm:$0xff] %v7692_v35  ;;  %v7695_v63 = vpop.eup %4946  ;;  %4972 = vtanh.f32 %v2368_v55  ;;  %v2372_v40 = vadd.f32 %v2371_v31, %v2020_v4  ;;  %v2564_v46 = vpop.f32.mrf.mxu1 }
 0x297   :  { %9308 = vst [vmem:[#allocation81_spill] sm:$0xff] %v7695_v63  ;;  %v7697_v0 = vpop.eup %4948  ;;  %4974 = vtanh.f32 %v2561_v8  ;;  %v2565_v20 = vadd.f32 %v2564_v46, %v2020_v4  ;;  %v2373_v1 = vpop.f32.mrf.mxu0 }
 0x298   :  { %9309 = vst [vmem:[#allocation82_spill] sm:$0xff] %v7697_v0  ;;  %v7699_v32 = vpop.eup %4950  ;;  %4976 = vtanh.f32 %v2372_v40  ;;  %v2374_v38 = vadd.f32 %v2373_v1, %v2020_v4  ;;  %v2566_v19 = vpop.f32.mrf.mxu1 }
 0x299   :  { %9310 = vst [vmem:[#allocation83_spill] sm:$0xff] %v7699_v32  ;;  %v7701_v12 = vpop.eup %4952  ;;  %v2025_v43 = vpop.permute.xlu1 %2024  ;;  %4978 = vtanh.f32 %v2565_v20  ;;  %v2567_v39 = vadd.f32 %v2566_v19, %v2020_v4 }
 0x29a   :  { %9311 = vst [vmem:[#allocation84_spill] sm:$0xff] %v7701_v12  ;;  %v2375_v3 = vpop.f32.mrf.mxu0  ;;  %v7703_v34 = vpop.eup %4954  ;;  %4980 = vtanh.f32 %v2374_v38 }
 0x29b   :  { %9312 = vst [vmem:[#allocation85_spill] sm:$0xff] %v7703_v34  ;;  %v2376_v31 = vadd.f32 %v2375_v3, %v2025_v43  ;;  %v2568_v55 = vpop.f32.mrf.mxu1  ;;  %v7707_v46 = vpop.eup %4956  ;;  %4982 = vtanh.f32 %v2567_v39 }
 0x29c   :  { %9313 = vst [vmem:[#allocation86_spill] sm:$0xff] %v7707_v46  ;;  %v2569_v40 = vadd.f32 %v2568_v55, %v2025_v43  ;;  %v2377_v1 = vpop.f32.mrf.mxu0  ;;  %v7711_v45 = vpop.eup %4958 }
 0x29d   :  { %9314 = vst [vmem:[#allocation87_spill] sm:$0xff] %v7711_v45  ;;  %4984 = vtanh.f32 %v2376_v31  ;;  %v2378_v19 = vadd.f32 %v2377_v1, %v2025_v43  ;;  %v2570_v20 = vpop.f32.mrf.mxu1  ;;  %v7715_v38 = vpop.eup %4960 }
 0x29e   :  { %9315 = vst [vmem:[#allocation88_spill] sm:$0xff] %v7715_v38  ;;  %4986 = vtanh.f32 %v2569_v40  ;;  %v2571_v3 = vadd.f32 %v2570_v20, %v2025_v43  ;;  %v2381_v8 = vpop.f32.mrf.mxu0  ;;  %v7719_v55 = vpop.eup %4962 }
 0x29f   :  { %9316 = vst [vmem:[#allocation89_spill] sm:$0xff] %v7719_v55  ;;  %4988 = vtanh.f32 %v2378_v19  ;;  %v2382_v22 = vadd.f32 %v2381_v8, %v7672_v27  ;;  %v2574_v63 = vpop.f32.mrf.mxu1  ;;  %v7722_v31 = vpop.eup %4964 }
 0x2a0   :  { %9317 = vst [vmem:[#allocation90_spill] sm:$0xff] %v7722_v31  ;;  %4990 = vtanh.f32 %v2571_v3  ;;  %v2575_v1 = vadd.f32 %v2574_v63, %v7672_v27  ;;  %v2383_v4 = vpop.f32.mrf.mxu0  ;;  %v7725_v34 = vpop.eup %4966 }
 0x2a1   :  { %9318 = vst [vmem:[#allocation91_spill] sm:$0xff] %v7725_v34  ;;  %4992 = vtanh.f32 %v2382_v22  ;;  %v2384_v43 = vadd.f32 %v2383_v4, %v7672_v27  ;;  %v2576_v40 = vpop.f32.mrf.mxu1  ;;  %v7728_v20 = vpop.eup %4968 }
 0x2a2   :  { %9319 = vst [vmem:[#allocation92_spill] sm:$0xff] %v7728_v20  ;;  %4994 = vtanh.f32 %v2575_v1  ;;  %v2577_v19 = vadd.f32 %v2576_v40, %v7672_v27  ;;  %v2385_v39 = vpop.f32.mrf.mxu0  ;;  %v7731_v8 = vpop.eup %4970 }
 0x2a3   :  { %9320 = vst [vmem:[#allocation93_spill] sm:$0xff] %v7731_v8  ;;  %4996 = vtanh.f32 %v2384_v43  ;;  %v2386_v3 = vadd.f32 %v2385_v39, %v7686_v50  ;;  %v2578_v35 = vpop.f32.mrf.mxu1  ;;  %v7736_v12 = vpop.eup %4972 }
 0x2a4   :  { %9321 = vst [vmem:[#allocation94_spill] sm:$0xff] %v7736_v12  ;;  %4998 = vtanh.f32 %v2577_v19  ;;  %v2579_v22 = vadd.f32 %v2578_v35, %v7686_v50  ;;  %v2387_v4 = vpop.f32.mrf.mxu0  ;;  %v7741_v27 = vpop.eup %4974 }
 0x2a5   :  { %9322 = vst [vmem:[#allocation95_spill] sm:$0xff] %v7741_v27  ;;  %5000 = vtanh.f32 %v2386_v3  ;;  %v2388_v43 = vadd.f32 %v2387_v4, %v7686_v50  ;;  %v2580_v40 = vpop.f32.mrf.mxu1  ;;  %v7746_v32 = vpop.eup %4976 }
 0x2a6   :  { %9323 = vst [vmem:[#allocation96_spill] sm:$0xff] %v7746_v32  ;;  %5002 = vtanh.f32 %v2579_v22  ;;  %v2581_v19 = vadd.f32 %v2580_v40, %v7686_v50  ;;  %v2391_v63 = vpop.f32.mrf.mxu0  ;;  %v7751_v45 = vpop.eup %4978 }
 0x2a7   :  { %9324 = vst [vmem:[#allocation97_spill] sm:$0xff] %v7751_v45  ;;  %5004 = vtanh.f32 %v2388_v43  ;;  %v2392_v3 = vadd.f32 %v2391_v63, %v7651_v54  ;;  %v2584_v1 = vpop.f32.mrf.mxu1  ;;  %v7754_v4 = vpop.eup %4980 }
 0x2a8   :  { %9325 = vst [vmem:[#allocation98_spill] sm:$0xff] %v7754_v4  ;;  %5006 = vtanh.f32 %v2581_v19  ;;  %v2585_v39 = vadd.f32 %v2584_v1, %v7651_v54  ;;  %v2393_v0 = vpop.f32.mrf.mxu0  ;;  %v7757_v46 = vpop.eup %4982 }
 0x2a9   :  { %9326 = vst [vmem:[#allocation99_spill] sm:$0xff] %v7757_v46  ;;  %5008 = vtanh.f32 %v2392_v3  ;;  %v2394_v50 = vadd.f32 %v2393_v0, %v7651_v54  ;;  %v2586_v22 = vpop.f32.mrf.mxu1 }
 0x2aa   :  { %v7760_v40 = vpop.eup %4984  ;;  %5010 = vtanh.f32 %v2585_v39  ;;  %v2587_v43 = vadd.f32 %v2586_v22, %v7651_v54  ;;  %v2395_v35 = vpop.f32.mrf.mxu0 }
 0x2ab   :  { %9327 = vst [vmem:[#allocation100_spill] sm:$0xff] %v7760_v40  ;;  %v7763_v63 = vpop.eup %4986  ;;  %5012 = vtanh.f32 %v2394_v50  ;;  %v2396_v19 = vadd.f32 %v2395_v35, %v7666_v48  ;;  %v2588_v55 = vpop.f32.mrf.mxu1 }
 0x2ac   :  { %9328 = vst [vmem:[#allocation101_spill] sm:$0xff] %v7763_v63  ;;  %v7768_v8 = vpop.eup %4988  ;;  %5014 = vtanh.f32 %v2587_v43  ;;  %v2589_v0 = vadd.f32 %v2588_v55, %v7666_v48  ;;  %v2397_v3 = vpop.f32.mrf.mxu0 }
 0x2ad   :  { %9329 = vst [vmem:[#allocation102_spill] sm:$0xff] %v7768_v8  ;;  %v7773_v54 = vpop.eup %4990  ;;  %5016 = vtanh.f32 %v2396_v19  ;;  %v2398_v50 = vadd.f32 %v2397_v3, %v7666_v48  ;;  %v2590_v22 = vpop.f32.mrf.mxu1 }
 0x2ae   :  { %9330 = vst [vmem:[#allocation103_spill] sm:$0xff] %v7773_v54  ;;  %v7778_v38 = vpop.eup %4992  ;;  %5018 = vtanh.f32 %v2589_v0  ;;  %v2591_v43 = vadd.f32 %v2590_v22, %v7666_v48  ;;  %v2401_v1 = vpop.f32.mrf.mxu0 }
 0x2af   :  { %9331 = vst [vmem:[#allocation104_spill] sm:$0xff] %v7778_v38  ;;  %v7783_v32 = vpop.eup %4994  ;;  %5020 = vtanh.f32 %v2398_v50  ;;  %v2402_v19 = vadd.f32 %v2401_v1, %v7622_v17  ;;  %v2594_v39 = vpop.f32.mrf.mxu1 }
 0x2b0   :  { %9332 = vst [vmem:[#allocation105_spill] sm:$0xff] %v7783_v32  ;;  %v7786_v3 = vpop.eup %4996  ;;  %5022 = vtanh.f32 %v2591_v43  ;;  %v2595_v35 = vadd.f32 %v2594_v39, %v7622_v17  ;;  %v2403_v45 = vpop.f32.mrf.mxu0 }
 0x2b1   :  { %9333 = vst [vmem:[#allocation106_spill] sm:$0xff] %v7786_v3  ;;  %v7789_v63 = vpop.eup %4998  ;;  %5024 = vtanh.f32 %v2402_v19  ;;  %v2404_v48 = vadd.f32 %v2403_v45, %v7622_v17  ;;  %v2596_v0 = vpop.f32.mrf.mxu1 }
 0x2b2   :  { %9334 = vst [vmem:[#allocation107_spill] sm:$0xff] %v7789_v63  ;;  %v7792_v22 = vpop.eup %5000  ;;  %5026 = vtanh.f32 %v2595_v35  ;;  %v2597_v50 = vadd.f32 %v2596_v0, %v7622_v17  ;;  %v2405_v55 = vpop.f32.mrf.mxu0 }
 0x2b3   :  { %9335 = vst [vmem:[#allocation108_spill] sm:$0xff] %v7792_v22  ;;  %v7795_v1 = vpop.eup %5002  ;;  %5028 = vtanh.f32 %v2404_v48  ;;  %v2406_v43 = vadd.f32 %v2405_v55, %v7643_v25  ;;  %v2598_v40 = vpop.f32.mrf.mxu1 }
 0x2b4   :  { %9336 = vst [vmem:[#allocation109_spill] sm:$0xff] %v7795_v1  ;;  %v7800_v46 = vpop.eup %5004  ;;  %5030 = vtanh.f32 %v2597_v50  ;;  %v2599_v45 = vadd.f32 %v2598_v40, %v7643_v25  ;;  %v2407_v19 = vpop.f32.mrf.mxu0 }
 0x2b5   :  { %9337 = vst [vmem:[#allocation110_spill] sm:$0xff] %v7800_v46  ;;  %v7805_v17 = vpop.eup %5006  ;;  %5032 = vtanh.f32 %v2406_v43  ;;  %v2408_v48 = vadd.f32 %v2407_v19, %v7643_v25  ;;  %v2600_v0 = vpop.f32.mrf.mxu1 }
 0x2b6   :  { %9338 = vst [vmem:[#allocation111_spill] sm:$0xff] %v7805_v17  ;;  %v7810_v54 = vpop.eup %5008  ;;  %5034 = vtanh.f32 %v2599_v45  ;;  %v2601_v50 = vadd.f32 %v2600_v0, %v7643_v25  ;;  %v2411_v39 = vpop.f32.mrf.mxu0 }
 0x2b7   :  { %9339 = vst [vmem:[#allocation112_spill] sm:$0xff] %v7810_v54  ;;  %v7815_v4 = vpop.eup %5010  ;;  %5036 = vtanh.f32 %v2408_v48  ;;  %v2412_v43 = vadd.f32 %v2411_v39, %v7592_v14  ;;  %v2604_v35 = vpop.f32.mrf.mxu1 }
 0x2b8   :  { %9340 = vst [vmem:[#allocation113_spill] sm:$0xff] %v7815_v4  ;;  %v7818_v19 = vpop.eup %5012  ;;  %5038 = vtanh.f32 %v2601_v50  ;;  %v2605_v55 = vadd.f32 %v2604_v35, %v7592_v14  ;;  %v2413_v8 = vpop.f32.mrf.mxu0 }
 0x2b9   :  { %9341 = vst [vmem:[#allocation114_spill] sm:$0xff] %v7818_v19  ;;  %v7821_v32 = vpop.eup %5014  ;;  %5040 = vtanh.f32 %v2412_v43  ;;  %v2414_v25 = vadd.f32 %v2413_v8, %v7592_v14  ;;  %v2606_v45 = vpop.f32.mrf.mxu1 }
 0x2ba   :  { %9342 = vst [vmem:[#allocation115_spill] sm:$0xff] %v7821_v32  ;;  %v7824_v0 = vpop.eup %5016  ;;  %5042 = vtanh.f32 %v2605_v55  ;;  %v2607_v48 = vadd.f32 %v2606_v45, %v7592_v14  ;;  %v2415_v40 = vpop.f32.mrf.mxu0 }
 0x2bb   :  { %9343 = vst [vmem:[#allocation116_spill] sm:$0xff] %v7824_v0  ;;  %v7827_v39 = vpop.eup %5018  ;;  %5044 = vtanh.f32 %v2414_v25  ;;  %v2416_v50 = vadd.f32 %v2415_v40, %v7610_v13  ;;  %v2608_v1 = vpop.f32.mrf.mxu1 }
 0x2bc   :  { %9344 = vst [vmem:[#allocation117_spill] sm:$0xff] %v7827_v39  ;;  %v7832_v38 = vpop.eup %5020  ;;  %5046 = vtanh.f32 %v2607_v48  ;;  %v2609_v8 = vadd.f32 %v2608_v1, %v7610_v13  ;;  %v2417_v43 = vpop.f32.mrf.mxu0 }
 0x2bd   :  { %9345 = vst [vmem:[#allocation118_spill] sm:$0xff] %v7832_v38  ;;  %v7837_v14 = vpop.eup %5022  ;;  %5048 = vtanh.f32 %v2416_v50  ;;  %v2418_v25 = vadd.f32 %v2417_v43, %v7610_v13  ;;  %v2610_v45 = vpop.f32.mrf.mxu1 }
 0x2be   :  { %9346 = vst [vmem:[#allocation119_spill] sm:$0xff] %v7837_v14  ;;  %v7842_v22 = vpop.eup %5024  ;;  %5050 = vtanh.f32 %v2609_v8  ;;  %v2611_v48 = vadd.f32 %v2610_v45, %v7610_v13  ;;  %v2421_v35 = vpop.f32.mrf.mxu0 }
 0x2bf   :  { %9347 = vst [vmem:[#allocation120_spill] sm:$0xff] %v7842_v22  ;;  %v7847_v63 = vpop.eup %5026  ;;  %5052 = vtanh.f32 %v2418_v25  ;;  %v2422_v50 = vadd.f32 %v2421_v35, %v7553_v29  ;;  %v2614_v55 = vpop.f32.mrf.mxu1 }
 0x2c0   :  { %9348 = vst [vmem:[#allocation121_spill] sm:$0xff] %v7847_v63  ;;  %v7850_v43 = vpop.eup %5028  ;;  %5054 = vtanh.f32 %v2611_v48  ;;  %v2615_v40 = vadd.f32 %v2614_v55, %v7553_v29  ;;  %v2423_v17 = vpop.f32.mrf.mxu0 }
 0x2c1   :  { %9349 = vst [vmem:[#allocation122_spill] sm:$0xff] %v7850_v43  ;;  %v7853_v3 = vpop.eup %5030  ;;  %5056 = vtanh.f32 %v2422_v50  ;;  %v2424_v13 = vadd.f32 %v2423_v17, %v7553_v29  ;;  %v2616_v8 = vpop.f32.mrf.mxu1 }
 0x2c2   :  { %9350 = vst [vmem:[#allocation123_spill] sm:$0xff] %v7853_v3  ;;  %v7856_v45 = vpop.eup %5032  ;;  %5058 = vtanh.f32 %v2615_v40  ;;  %v2617_v25 = vadd.f32 %v2616_v8, %v7553_v29  ;;  %v2425_v1 = vpop.f32.mrf.mxu0 }
 0x2c3   :  { %9351 = vst [vmem:[#allocation124_spill] sm:$0xff] %v7856_v45  ;;  %v7859_v35 = vpop.eup %5034  ;;  %5060 = vtanh.f32 %v2424_v13  ;;  %v2426_v48 = vadd.f32 %v2425_v1, %v7574_v49  ;;  %v2618_v46 = vpop.f32.mrf.mxu1 }
 0x2c4   :  { %9352 = vst [vmem:[#allocation125_spill] sm:$0xff] %v7859_v35  ;;  %v7864_v4 = vpop.eup %5036  ;;  %5062 = vtanh.f32 %v2617_v25  ;;  %v2619_v17 = vadd.f32 %v2618_v46, %v7574_v49  ;;  %v2427_v50 = vpop.f32.mrf.mxu0 }
 0x2c5   :  { %9353 = vst [vmem:[#allocation126_spill] sm:$0xff] %v7864_v4  ;;  %v7869_v29 = vpop.eup %5038  ;;  %5064 = vtanh.f32 %v2426_v48  ;;  %v2428_v13 = vadd.f32 %v2427_v50, %v7574_v49  ;;  %v2620_v8 = vpop.f32.mrf.mxu1 }
 0x2c6   :  { %9354 = vst [vmem:[#allocation127_spill] sm:$0xff] %v7869_v29  ;;  %v7874_v39 = vpop.eup %5040  ;;  %5066 = vtanh.f32 %v2619_v17  ;;  %v2621_v25 = vadd.f32 %v2620_v8, %v7574_v49  ;;  %v2431_v55 = vpop.f32.mrf.mxu0 }
 0x2c7   :  { %9355 = vst [vmem:[#allocation128_spill] sm:$0xff] %v7874_v39  ;;  %v7879_v54 = vpop.eup %5042  ;;  %5068 = vtanh.f32 %v2428_v13  ;;  %v2432_v48 = vadd.f32 %v2431_v55, %v7517_v41  ;;  %v2624_v40 = vpop.f32.mrf.mxu1 }
 0x2c8   :  { %9356 = vst [vmem:[#allocation129_spill] sm:$0xff] %v7879_v54  ;;  %v7882_v50 = vpop.eup %5044  ;;  %5070 = vtanh.f32 %v2621_v25  ;;  %v2625_v1 = vadd.f32 %v2624_v40, %v7517_v41  ;;  %v2433_v0 = vpop.f32.mrf.mxu0 }
 0x2c9   :  { %9357 = vst [vmem:[#allocation130_spill] sm:$0xff] %v7882_v50  ;;  %v7885_v32 = vpop.eup %5046  ;;  %5072 = vtanh.f32 %v2432_v48  ;;  %v2434_v49 = vadd.f32 %v2433_v0, %v7517_v41  ;;  %v2626_v17 = vpop.f32.mrf.mxu1 }
 0x2ca   :  { %9358 = vst [vmem:[#allocation131_spill] sm:$0xff] %v7885_v32  ;;  %v7888_v8 = vpop.eup %5048  ;;  %5074 = vtanh.f32 %v2625_v1  ;;  %v2627_v13 = vadd.f32 %v2626_v17, %v7517_v41  ;;  %v2435_v46 = vpop.f32.mrf.mxu0 }
 0x2cb   :  { %9359 = vst [vmem:[#allocation132_spill] sm:$0xff] %v7888_v8  ;;  %v7891_v55 = vpop.eup %5050  ;;  %5076 = vtanh.f32 %v2434_v49  ;;  %v2436_v25 = vadd.f32 %v2435_v46, %v7543_v37  ;;  %v2628_v14 = vpop.f32.mrf.mxu1 }
 0x2cc   :  { %9360 = vst [vmem:[#allocation133_spill] sm:$0xff] %v7891_v55  ;;  %v7896_v19 = vpop.eup %5052  ;;  %5078 = vtanh.f32 %v2627_v13  ;;  %v2629_v0 = vadd.f32 %v2628_v14, %v7543_v37  ;;  %v2437_v48 = vpop.f32.mrf.mxu0 }
 0x2cd   :  { %9361 = vst [vmem:[#allocation134_spill] sm:$0xff] %v7896_v19  ;;  %v7901_v41 = vpop.eup %5054  ;;  %5080 = vtanh.f32 %v2436_v25  ;;  %v2438_v49 = vadd.f32 %v2437_v48, %v7543_v37  ;;  %v2630_v17 = vpop.f32.mrf.mxu1 }
 0x2ce   :  { %9362 = vst [vmem:[#allocation135_spill] sm:$0xff] %v7901_v41  ;;  %v7906_v38 = vpop.eup %5056  ;;  %5082 = vtanh.f32 %v2629_v0  ;;  %v2631_v13 = vadd.f32 %v2630_v17, %v7543_v37  ;;  %v2441_v40 = vpop.f32.mrf.mxu0 }
 0x2cf   :  { %9363 = vst [vmem:[#allocation136_spill] sm:$0xff] %v7906_v38  ;;  %v7911_v63 = vpop.eup %5058  ;;  %5084 = vtanh.f32 %v2438_v49  ;;  %v2442_v25 = vadd.f32 %v2441_v40, %v7486_v2  ;;  %v2634_v1 = vpop.f32.mrf.mxu1 }
 0x2d0   :  { %9364 = vst [vmem:[#allocation137_spill] sm:$0xff] %v7911_v63  ;;  %v7914_v48 = vpop.eup %5060  ;;  %5086 = vtanh.f32 %v2631_v13  ;;  %v2635_v46 = vadd.f32 %v2634_v1, %v7486_v2  ;;  %v2443_v35 = vpop.f32.mrf.mxu0 }
 0x2d1   :  { %9365 = vst [vmem:[#allocation138_spill] sm:$0xff] %v7914_v48  ;;  %v7917_v22 = vpop.eup %5062  ;;  %5088 = vtanh.f32 %v2442_v25  ;;  %v2444_v37 = vadd.f32 %v2443_v35, %v7486_v2  ;;  %v2636_v0 = vpop.f32.mrf.mxu1 }
 0x2d2   :  { %9366 = vst [vmem:[#allocation139_spill] sm:$0xff] %v7917_v22  ;;  %v7920_v17 = vpop.eup %5064  ;;  %5090 = vtanh.f32 %v2635_v46  ;;  %v2637_v49 = vadd.f32 %v2636_v0, %v7486_v2  ;;  %v2445_v14 = vpop.f32.mrf.mxu0 }
 0x2d3   :  { %9367 = vst [vmem:[#allocation140_spill] sm:$0xff] %v7920_v17  ;;  %v7923_v40 = vpop.eup %5066  ;;  %5092 = vtanh.f32 %v2444_v37  ;;  %v2446_v13 = vadd.f32 %v2445_v14, %v7509_v62  ;;  %v2638_v45 = vpop.f32.mrf.mxu1 }
 0x2d4   :  { %9368 = vst [vmem:[#allocation141_spill] sm:$0xff] %v7923_v40  ;;  %v7928_v3 = vpop.eup %5068  ;;  %5094 = vtanh.f32 %v2637_v49  ;;  %v2639_v35 = vadd.f32 %v2638_v45, %v7509_v62  ;;  %v2447_v25 = vpop.f32.mrf.mxu0 }
 0x2d5   :  { %9369 = vst [vmem:[#allocation142_spill] sm:$0xff] %v7928_v3  ;;  %v7933_v2 = vpop.eup %5070  ;;  %5096 = vtanh.f32 %v2446_v13  ;;  %v2448_v37 = vadd.f32 %v2447_v25, %v7509_v62  ;;  %v2640_v0 = vpop.f32.mrf.mxu1 }
 0x2d6   :  { %9370 = vst [vmem:[#allocation143_spill] sm:$0xff] %v7933_v2  ;;  %v7938_v29 = vpop.eup %5072  ;;  %5098 = vtanh.f32 %v2639_v35  ;;  %v2641_v49 = vadd.f32 %v2640_v0, %v7509_v62  ;;  %v3061_v46 = vpop.f32.mrf.mxu0 }
 0x2d7   :  { %9371 = vst [vmem:[#allocation144_spill] sm:$0xff] %v7938_v29  ;;  %v7943_v1 = vpop.eup %5074  ;;  %5100 = vtanh.f32 %v2448_v37  ;;  %v3254_v43 = vpop.f32.mrf.mxu1  ;;  %v3062_v25 = vadd.f32 %v3061_v46, %v7264_v56 }
 0x2d8   :  { %9372 = vst [vmem:[#allocation145_spill] sm:$0xff] %v7943_v1  ;;  %v7945_v13 = vpop.eup %5076  ;;  %5102 = vtanh.f32 %v2641_v49  ;;  %v3255_v14 = vadd.f32 %v3254_v43, %v7264_v56  ;;  %v3063_v35 = vpop.f32.mrf.mxu0 }
 0x2d9   :  { %9373 = vst [vmem:[#allocation146_spill] sm:$0xff] %v7945_v13  ;;  %v7949_v4 = vpop.eup %5078  ;;  %v3256_v54 = vpop.f32.mrf.mxu1  ;;  %5104 = vtanh.f32 %v3062_v25  ;;  %v3064_v0 = vadd.f32 %v3063_v35, %v7264_v56 }
 0x2da   :  { %9374 = vst [vmem:[#allocation147_spill] sm:$0xff] %v7949_v4  ;;  %v7951_v62 = vpop.eup %5080  ;;  %v3257_v37 = vadd.f32 %v3256_v54, %v7264_v56  ;;  %5106 = vtanh.f32 %v3255_v14  ;;  %v3065_v55 = vpop.f32.mrf.mxu0 }
 0x2db   :  { %9375 = vst [vmem:[#allocation148_spill] sm:$0xff] %v7951_v62  ;;  %v7955_v45 = vpop.eup %5082  ;;  %v3258_v49 = vpop.f32.mrf.mxu1  ;;  %5108 = vtanh.f32 %v3064_v0  ;;  %v3066_v39 = vadd.f32 %v3065_v55, %v7280_v23 }
 0x2dc   :  { %9376 = vst [vmem:[#allocation149_spill] sm:$0xff] %v7955_v45  ;;  %v7959_v43 = vpop.eup %5084  ;;  %v3259_v8 = vadd.f32 %v3258_v49, %v7280_v23  ;;  %5110 = vtanh.f32 %v3257_v37  ;;  %v3067_v56 = vpop.f32.mrf.mxu0 }
 0x2dd   :  { %9377 = vst [vmem:[#allocation150_spill] sm:$0xff] %v7959_v43  ;;  %v7965_v35 = vpop.eup %5086  ;;  %v3260_v54 = vpop.f32.mrf.mxu1  ;;  %5112 = vtanh.f32 %v3066_v39  ;;  %v3068_v0 = vadd.f32 %v3067_v56, %v7280_v23 }
 0x2de   :  { %9378 = vst [vmem:[#allocation151_spill] sm:$0xff] %v7965_v35  ;;  %v7969_v32 = vpop.eup %5088  ;;  %v3261_v55 = vadd.f32 %v3260_v54, %v7280_v23  ;;  %5114 = vtanh.f32 %v3259_v8  ;;  %v3071_v25 = vpop.f32.mrf.mxu0 }
 0x2df   :  { %9379 = vst [vmem:[#allocation152_spill] sm:$0xff] %v7969_v32  ;;  %v7975_v46 = vpop.eup %5090  ;;  %v3264_v37 = vpop.f32.mrf.mxu1  ;;  %5116 = vtanh.f32 %v3068_v0  ;;  %v3072_v14 = vadd.f32 %v3071_v25, %v7245_v15 }
 0x2e0   :  { %9380 = vst [vmem:[#allocation153_spill] sm:$0xff] %v7975_v46  ;;  %v7977_v41 = vpop.eup %5092  ;;  %v3265_v50 = vadd.f32 %v3264_v37, %v7245_v15  ;;  %5118 = vtanh.f32 %v3261_v55  ;;  %v3073_v56 = vpop.f32.mrf.mxu0 }
 0x2e1   :  { %9381 = vst [vmem:[#allocation154_spill] sm:$0xff] %v7977_v41  ;;  %v7981_v39 = vpop.eup %5094  ;;  %v3266_v23 = vpop.f32.mrf.mxu1  ;;  %5120 = vtanh.f32 %v3072_v14  ;;  %v3074_v49 = vadd.f32 %v3073_v56, %v7245_v15  ;;  %v9403_v41 = vld [vmem:[#allocation21_spill] sm:$0xff] }
 0x2e2   :  { %9382 = vst [vmem:[#allocation155_spill] sm:$0xff] %v7981_v39  ;;  %v7983_v54 = vpop.eup %5096  ;;  %v3267_v8 = vadd.f32 %v3266_v23, %v7245_v15  ;;  %5122 = vtanh.f32 %v3265_v50  ;;  %v3075_v0 = vpop.f32.mrf.mxu0 }
 0x2e3   :  { %9383 = vst [vmem:[#allocation156_spill] sm:$0xff] %v7983_v54  ;;  %v7987_v19 = vpop.eup %5098  ;;  %v3268_v63 = vpop.f32.mrf.mxu1  ;;  %5124 = vtanh.f32 %v3074_v49  ;;  %v3076_v55 = vadd.f32 %v3075_v0, %v7258_v42 }
 0x2e4   :  { %9384 = vst [vmem:[#allocation157_spill] sm:$0xff] %v7987_v19  ;;  %v7991_v37 = vpop.eup %5100  ;;  %v3269_v40 = vadd.f32 %v3268_v63, %v7258_v42  ;;  %5126 = vtanh.f32 %v3267_v8  ;;  %v3077_v15 = vpop.f32.mrf.mxu0 }
 0x2e5   :  { %9385 = vst [vmem:[#allocation158_spill] sm:$0xff] %v7991_v37  ;;  %v7997_v56 = vpop.eup %5102  ;;  %v3270_v50 = vpop.f32.mrf.mxu1  ;;  %5128 = vtanh.f32 %v3076_v55  ;;  %v3078_v25 = vadd.f32 %v3077_v15, %v7258_v42 }
 0x2e6   :  { %9386 = vst [vmem:[#allocation159_spill] sm:$0xff] %v7997_v56  ;;  %v3271_v49 = vadd.f32 %v3270_v50, %v7258_v42  ;;  %v8005_v63 = vpop.eup %5104  ;;  %5130 = vtanh.f32 %v3269_v40  ;;  %v8007_v14 = vpop.f32.mrf.mxu0 }
 0x2e7   :  { %9387 = vst [vmem:[#allocation160_spill] sm:$0xff] %v8005_v63  ;;  %v8009_v38 = vpop.f32.mrf.mxu1  ;;  %v8011_v8 = vpop.eup %5106  ;;  %5132 = vtanh.f32 %v3078_v25 }
 0x2e8   :  { %9388 = vst [vmem:[#allocation161_spill] sm:$0xff] %v8011_v8  ;;  %v8013_v17 = vpop.eup %5108  ;;  %5134 = vtanh.f32 %v3271_v49  ;;  %v3083_v55 = vpop.f32.mrf.mxu0 }
 0x2e9   :  { %9389 = vst [vmem:[#allocation162_spill] sm:$0xff] %v8013_v17  ;;  %v3276_v15 = vpop.f32.mrf.mxu1  ;;  %v8015_v23 = vpop.eup %5110  ;;  %v3084_v50 = vadd.f32 %v3083_v55, %v7219_v11 }
 0x2ea   :  { %9390 = vst [vmem:[#allocation163_spill] sm:$0xff] %v8015_v23  ;;  %v8017_v42 = vpop.eup %5112  ;;  %v8020_v0 = vpop.f32.mrf.mxu0  ;;  %v3277_v2 = vadd.f32 %v3276_v15, %v7219_v11 }
 0x2eb   :  { %9391 = vst [vmem:[#allocation164_spill] sm:$0xff] %v8017_v42  ;;  %v8022_v40 = vpop.f32.mrf.mxu1  ;;  %v8024_v22 = vpop.eup %5114  ;;  %5136 = vtanh.f32 %v3084_v50 }
 0x2ec   :  { %9392 = vst [vmem:[#allocation165_spill] sm:$0xff] %v8024_v22  ;;  %v8029_v49 = vpop.eup %5116  ;;  %v3087_v48 = vpop.f32.mrf.mxu0  ;;  %5138 = vtanh.f32 %v3277_v2 }
 0x2ed   :  { %9393 = vst [vmem:[#allocation166_spill] sm:$0xff] %v8029_v49  ;;  %v3280_v3 = vpop.f32.mrf.mxu1  ;;  %v8033_v45 = vpop.eup %5118  ;;  %v3088_v55 = vadd.f32 %v3087_v48, %v7239_v60 }
 0x2ee   :  { %9394 = vst [vmem:[#allocation167_spill] sm:$0xff] %v8033_v45  ;;  %v3281_v29 = vadd.f32 %v3280_v3, %v7239_v60  ;;  %v8039_v15 = vpop.eup %5120  ;;  %v3091_v25 = vpop.f32.mrf.mxu0 }
 0x2ef   :  { %9395 = vst [vmem:[#allocation168_spill] sm:$0xff] %v8039_v15  ;;  %v8041_v4 = vpop.f32.mrf.mxu1  ;;  %v8045_v13 = vpop.eup %5122  ;;  %v3092_v1 = vadd.f32 %v3091_v25, %v7192_v28  ;;  %5140 = vtanh.f32 %v3088_v55 }
 0x2f0   :  { %9396 = vst [vmem:[#allocation169_spill] sm:$0xff] %v8045_v13  ;;  %v8048_v48 = vpop.eup %5124  ;;  %v3093_v3 = vpop.f32.mrf.mxu0  ;;  %5142 = vtanh.f32 %v3281_v29 }
 0x2f1   :  { %9397 = vst [vmem:[#allocation170_spill] sm:$0xff] %v8048_v48  ;;  %v3286_v43 = vpop.f32.mrf.mxu1  ;;  %v8050_v62 = vpop.eup %5126  ;;  %v3094_v50 = vadd.f32 %v3093_v3, %v7192_v28  ;;  %5144 = vtanh.f32 %v3092_v1 }
 0x2f2   :  { %9398 = vst [vmem:[#allocation171_spill] sm:$0xff] %v8050_v62  ;;  %v3287_v46 = vadd.f32 %v3286_v43, %v7192_v28  ;;  %v8054_v19 = vpop.eup %5128  ;;  %v3095_v35 = vpop.f32.mrf.mxu0 }
 0x2f3   :  { %9399 = vst [vmem:[#allocation172_spill] sm:$0xff] %v8054_v19  ;;  %v3288_v32 = vpop.f32.mrf.mxu1  ;;  %v8056_v2 = vpop.eup %5130  ;;  %5146 = vtanh.f32 %v3094_v50  ;;  %v3096_v25 = vadd.f32 %v3095_v35, %v7209_v21 }
 0x2f4   :  { %9400 = vst [vmem:[#allocation173_spill] sm:$0xff] %v8056_v2  ;;  %v3289_v55 = vadd.f32 %v3288_v32, %v7209_v21  ;;  %v8062_v29 = vpop.eup %5132  ;;  %5148 = vtanh.f32 %v3287_v46  ;;  %v3097_v3 = vpop.f32.mrf.mxu0  ;;  %v9404_v46 = vld [vmem:[#allocation23_spill] sm:$0xff] }
 0x2f5   :  { %9401 = vst [vmem:[#allocation174_spill] sm:$0xff] %v8062_v29  ;;  %v3290_v43 = vpop.f32.mrf.mxu1  ;;  %v8066_v39 = vpop.eup %5134  ;;  %5150 = vtanh.f32 %v3096_v25  ;;  %v3098_v50 = vadd.f32 %v3097_v3, %v7209_v21 }
 0x2f6   :  { %9402 = vst [vmem:[#allocation175_spill] sm:$0xff] %v8066_v39  ;;  %v3291_v35 = vadd.f32 %v3290_v43, %v7209_v21  ;;  %5152 = vtanh.f32 %v3289_v55  ;;  %v3101_v54 = vpop.f32.mrf.mxu0 }
 0x2f7   :  { %v3294_v56 = vpop.f32.mrf.mxu1  ;;  %5154 = vtanh.f32 %v3098_v50  ;;  %v3102_v37 = vadd.f32 %v3101_v54, %v9403_v41 }
 0x2f8   :  { %v3295_v1 = vadd.f32 %v3294_v56, %v9403_v41  ;;  %5156 = vtanh.f32 %v3291_v35  ;;  %v3103_v25 = vpop.f32.mrf.mxu0  ;;  %v8078_v32 = vpop.eup %5136 }
 0x2f9   :  { %v3296_v20 = vpop.f32.mrf.mxu1  ;;  %5158 = vtanh.f32 %v3102_v37  ;;  %v3104_v21 = vadd.f32 %v3103_v25, %v9403_v41  ;;  %v8082_v34 = vpop.eup %5138 }
 0x2fa   :  { %v3297_v3 = vadd.f32 %v3296_v20, %v9403_v41  ;;  %5160 = vtanh.f32 %v3295_v1  ;;  %v3105_v55 = vpop.f32.mrf.mxu0 }
 0x2fb   :  { %v3298_v43 = vpop.f32.mrf.mxu1  ;;  %5162 = vtanh.f32 %v3104_v21  ;;  %v3106_v50 = vadd.f32 %v3105_v55, %v9404_v46  ;;  %v5379_v55 = vmov 1966171168  }
 0x2fc   :  { %v3299_v54 = vadd.f32 %v3298_v43, %v9404_v46  ;;  %5164 = vtanh.f32 %v3297_v3  ;;  %v3107_v56 = vpop.f32.mrf.mxu0  ;;  %v8084_v37 = vpop.eup %5140  ;;  %v3808_v27 = vunpack.c.l.s4 %v5379_v55  ;;  %v9406_v3 = vld [vmem:[#allocation15_spill] sm:$0xff] }
 0x2fd   :  { %v3300_v35 = vpop.f32.mrf.mxu1  ;;  %5166 = vtanh.f32 %v3106_v50  ;;  %v3108_v20 = vadd.f32 %v3107_v56, %v9404_v46  ;;  %v8088_v1 = vpop.eup %5142 }
 0x2fe   :  { %v3301_v41 = vadd.f32 %v3300_v35, %v9404_v46  ;;  %9405 = vst [vmem:[#allocation21_spill] sm:$0xff] %v8088_v1  ;;  %5168 = vtanh.f32 %v3299_v54  ;;  %v3111_v25 = vpop.f32.mrf.mxu0  ;;  %v8090_v43 = vpop.eup %5144  ;;  %v8099_v46 = vld.sshfl [vmem:[%s8737_s7] sm:$0x11 pattern:$0x75316420]  ;;  %v3809_v54 = vunpack.c.0.s8 %v3808_v27 }
 0x2ff   :  { %v3304_v21 = vpop.f32.mrf.mxu1  ;;  %5170 = vtanh.f32 %v3108_v20  ;;  %v3112_v31 = vadd.f32 %v3111_v25, %v9406_v3  ;;  %9407 = vst [vmem:[#allocation23_spill] sm:$0xff] %v8099_v46  ;;  %v9410_v27 = vld [vmem:[#allocation14_spill] sm:$0xff] }
 0x300   :  { %v3305_v12 = vadd.f32 %v3304_v21, %v9406_v3  ;;  %v8094_v47 = vpop.eup %5146  ;;  %5172 = vtanh.f32 %v3301_v41  ;;  %v3113_v50 = vpop.f32.mrf.mxu0  ;;  %v3806_v21 = vcombine.high %v8099_v46, %v8099_v46  ;;  %v8110_v6 = vsub.s32 %v3809_v54, %v9408_v44 }
 0x301   :  { %v3306_v56 = vpop.f32.mrf.mxu1  ;;  %v8101_v35 = vpop.eup %5148  ;;  %5174 = vtanh.f32 %v3112_v31  ;;  %v3114_v20 = vadd.f32 %v3113_v50, %v9406_v3 }
 0x302   :  { %v3307_v25 = vadd.f32 %v3306_v56, %v9406_v3  ;;  %v8107_v55 = vpop.eup %5150  ;;  %5176 = vtanh.f32 %v3305_v12  ;;  %v3115_v41 = vpop.f32.mrf.mxu0  ;;  %9409 = vst [vmem:[#allocation15_spill] sm:$0xff] %v8110_v6  ;;  %v8119_v46 = vrot.slane %v3806_v21, %v8110_v6 }
 0x303   :  { %v3308_v58 = vpop.f32.mrf.mxu1  ;;  %v8112_v10 = vpop.eup %5152  ;;  %5178 = vtanh.f32 %v3114_v20  ;;  %v3116_v31 = vadd.f32 %v3115_v41, %v9410_v27 }
 0x304   :  { %v3309_v50 = vadd.f32 %v3308_v58, %v9410_v27  ;;  %v8116_v53 = vpop.eup %5154  ;;  %5180 = vtanh.f32 %v3307_v25  ;;  %v3117_v3 = vpop.f32.mrf.mxu0  ;;  %9411 = vst [vmem:[#allocation14_spill] sm:$0xff] %v8119_v46  ;;  %v3825_v5 = vshrl.u32 %v8119_v46, 16 }
 0x305   :  { %v3310_v56 = vpop.f32.mrf.mxu1  ;;  %v8121_v12 = vpop.eup %5156  ;;  %5182 = vtanh.f32 %v3116_v31  ;;  %v3118_v54 = vadd.f32 %v3117_v3, %v9410_v27 }
 0x306   :  { %v3311_v44 = vadd.f32 %v3310_v56, %v9410_v27  ;;  %v8125_v20 = vpop.eup %5158  ;;  %5184 = vtanh.f32 %v3309_v50  ;;  %v3121_v41 = vpop.f32.mrf.mxu0  ;;  %3861 = vmatprep.mubr.bf16.mxu0 %v3825_v5  ;;  %3902 = vmatprep.mubr.bf16.mxu1 %v3825_v5 }
 0x307   :  { %v3314_v58 = vpop.f32.mrf.mxu1  ;;  %v8128_v25 = vpop.eup %5160  ;;  %5186 = vtanh.f32 %v3118_v54  ;;  %v3122_v21 = vadd.f32 %v3121_v41, %v9412_v7 }
 0x308   :  { %v3315_v6 = vadd.f32 %v3314_v58, %v9412_v7  ;;  %v8132_v24 = vpop.eup %5162  ;;  %5188 = vtanh.f32 %v3311_v44  ;;  %v3123_v31 = vpop.f32.mrf.mxu0  ;;  %v9413_v44 = vld [vmem:[#allocation20_spill] sm:$0xff] }
 0x309   :  { %v3316_v3 = vpop.f32.mrf.mxu1  ;;  %v8134_v27 = vpop.eup %5164  ;;  %5190 = vtanh.f32 %v3122_v21  ;;  %v3124_v50 = vadd.f32 %v3123_v31, %v9412_v7 }
 0x30a   :  { %v3317_v56 = vadd.f32 %v3316_v3, %v9412_v7  ;;  %v8138_v46 = vpop.eup %5166  ;;  %5192 = vtanh.f32 %v3315_v6  ;;  %v3125_v54 = vpop.f32.mrf.mxu0 }
 0x30b   :  { %v3318_v41 = vpop.f32.mrf.mxu1  ;;  %v8140_v58 = vpop.eup %5168  ;;  %5194 = vtanh.f32 %v3124_v50  ;;  %v3126_v61 = vadd.f32 %v3125_v54, %v9413_v44 }
 0x30c   :  { %v3319_v26 = vadd.f32 %v3318_v41, %v9413_v44  ;;  %v8144_v5 = vpop.eup %5170  ;;  %5196 = vtanh.f32 %v3317_v56  ;;  %v3127_v21 = vpop.f32.mrf.mxu0  ;;  %v9414_v41 = vld [vmem:[#allocation53_spill] sm:$0xff] }
 0x30d   :  { %v3320_v8 = vpop.f32.mrf.mxu1  ;;  %v8146_v31 = vpop.eup %5172  ;;  %5198 = vtanh.f32 %v3126_v61  ;;  %v3128_v7 = vadd.f32 %v3127_v21, %v9413_v44 }
 0x30e   :  { %v3321_v6 = vadd.f32 %v3320_v8, %v9413_v44  ;;  %v8150_v3 = vpop.eup %5174  ;;  %5200 = vtanh.f32 %v3319_v26  ;;  %v3131_v50 = vpop.f32.mrf.mxu0 }
 0x30f   :  { %v3324_v22 = vpop.f32.mrf.mxu1  ;;  %v8152_v54 = vpop.eup %5176  ;;  %5202 = vtanh.f32 %v3128_v7  ;;  %v3132_v63 = vadd.f32 %v3131_v50, %v9414_v41 }
 0x310   :  { %v3325_v56 = vadd.f32 %v3324_v22, %v9414_v41  ;;  %v8156_v42 = vpop.eup %5178  ;;  %5204 = vtanh.f32 %v3321_v6  ;;  %v3133_v61 = vpop.f32.mrf.mxu0  ;;  %v9415_v22 = vld [vmem:[#allocation46_spill] sm:$0xff] }
 0x311   :  { %v3326_v18 = vpop.f32.mrf.mxu1  ;;  %v8158_v21 = vpop.eup %5180  ;;  %5206 = vtanh.f32 %v3132_v63  ;;  %v3134_v8 = vadd.f32 %v3133_v61, %v9414_v41 }
 0x312   :  { %v3327_v26 = vadd.f32 %v3326_v18, %v9414_v41  ;;  %v8162_v44 = vpop.eup %5182  ;;  %5208 = vtanh.f32 %v3325_v56  ;;  %v3135_v7 = vpop.f32.mrf.mxu0 }
 0x313   :  { %v3328_v23 = vpop.f32.mrf.mxu1  ;;  %v8164_v50 = vpop.eup %5184  ;;  %5210 = vtanh.f32 %v3134_v8  ;;  %v3136_v45 = vadd.f32 %v3135_v7, %v9415_v22 }
 0x314   :  { %v3329_v6 = vadd.f32 %v3328_v23, %v9415_v22  ;;  %v8168_v33 = vpop.eup %5186  ;;  %5212 = vtanh.f32 %v3327_v26  ;;  %v3137_v63 = vpop.f32.mrf.mxu0 }
 0x315   :  { %v3330_v17 = vpop.f32.mrf.mxu1  ;;  %v8170_v61 = vpop.eup %5188  ;;  %5214 = vtanh.f32 %v3136_v45  ;;  %v3138_v18 = vadd.f32 %v3137_v63, %v9415_v22 }
 0x316   :  { %v3331_v41 = vadd.f32 %v3330_v17, %v9415_v22  ;;  %v8174_v56 = vpop.eup %5190  ;;  %5216 = vtanh.f32 %v3329_v6  ;;  %v3141_v8 = vpop.f32.mrf.mxu0 }
 0x317   :  { %v3334_v49 = vpop.f32.mrf.mxu1  ;;  %v8176_v7 = vpop.eup %5192  ;;  %5218 = vtanh.f32 %v3138_v18  ;;  %v3142_v23 = vadd.f32 %v3141_v8, %v7386_v36 }
 0x318   :  { %v3335_v26 = vadd.f32 %v3334_v49, %v7386_v36  ;;  %v8180_v13 = vpop.eup %5194  ;;  %5220 = vtanh.f32 %v3331_v41  ;;  %v3143_v45 = vpop.f32.mrf.mxu0 }
 0x319   :  { %v3336_v2 = vpop.f32.mrf.mxu1  ;;  %v8182_v63 = vpop.eup %5196  ;;  %5222 = vtanh.f32 %v3142_v23  ;;  %v3144_v17 = vadd.f32 %v3143_v45, %v7386_v36 }
 0x31a   :  { %v3337_v22 = vadd.f32 %v3336_v2, %v7386_v36  ;;  %v8186_v6 = vpop.eup %5198  ;;  %5224 = vtanh.f32 %v3335_v26  ;;  %v3145_v18 = vpop.f32.mrf.mxu0 }
 0x31b   :  { %v3338_v15 = vpop.f32.mrf.mxu1  ;;  %v8188_v8 = vpop.eup %5200  ;;  %5226 = vtanh.f32 %v3144_v17  ;;  %v3146_v49 = vadd.f32 %v3145_v18, %v7388_v9 }
 0x31c   :  { %v3339_v41 = vadd.f32 %v3338_v15, %v7388_v9  ;;  %v8192_v19 = vpop.eup %5202  ;;  %5228 = vtanh.f32 %v3337_v22  ;;  %v3147_v23 = vpop.f32.mrf.mxu0 }
 0x31d   :  { %v3340_v30 = vpop.f32.mrf.mxu1  ;;  %v8194_v45 = vpop.eup %5204  ;;  %5230 = vtanh.f32 %v3146_v49  ;;  %v3148_v36 = vadd.f32 %v3147_v23, %v7388_v9 }
 0x31e   :  { %v3341_v2 = vadd.f32 %v3340_v30, %v7388_v9  ;;  %v5207_v26 = vpop.eup %5206  ;;  %5232 = vtanh.f32 %v3339_v41  ;;  %v3151_v62 = vpop.f32.mrf.mxu0 }
 0x31f   :  { %v3344_v17 = vpop.f32.mrf.mxu1  ;;  %v5209_v39 = vpop.eup %5208  ;;  %5234 = vtanh.f32 %v3148_v36  ;;  %v3152_v15 = vadd.f32 %v3151_v62, %v7376_v16 }
 0x320   :  { %v3345_v18 = vadd.f32 %v3344_v17, %v7376_v16  ;;  %v5211_v22 = vpop.eup %5210  ;;  %5236 = vtanh.f32 %v3341_v2  ;;  %v3153_v51 = vpop.f32.mrf.mxu0  ;;  %v3285_v2 = vadd.f32 %v8041_v4, %v7192_v28 }
 0x321   :  { %v3346_v48 = vpop.f32.mrf.mxu1  ;;  %v5213_v29 = vpop.eup %5212  ;;  %5238 = vtanh.f32 %v3152_v15  ;;  %v3154_v49 = vadd.f32 %v3153_v51, %v7376_v16 }
 0x322   :  { %v3347_v30 = vadd.f32 %v3346_v48, %v7376_v16  ;;  %v5215_v9 = vpop.eup %5214  ;;  %5240 = vtanh.f32 %v3345_v18  ;;  %v3155_v41 = vpop.f32.mrf.mxu0 }
 0x323   :  { %v3348_v23 = vpop.f32.mrf.mxu1  ;;  %v5217_v52 = vpop.eup %5216  ;;  %5242 = vtanh.f32 %v3154_v49  ;;  %v3156_v62 = vadd.f32 %v3155_v41, %v7381_v57  ;;  %v3086_v49 = vadd.f32 %v8020_v0, %v7239_v60  ;;  %v3761_v4 = vpack.c.bf16 %v5215_v9, %v5207_v26 }
 0x324   :  { %v3349_v36 = vadd.f32 %v3348_v23, %v7381_v57  ;;  %v5219_v17 = vpop.eup %5218  ;;  %5244 = vtanh.f32 %v3347_v30  ;;  %v3157_v15 = vpop.f32.mrf.mxu0  ;;  %v3082_v0 = vadd.f32 %v8007_v14, %v7219_v11  ;;  %v3757_v14 = vpack.c.bf16 %v8186_v6, %v8174_v56 }
 0x325   :  { %v3350_v59 = vpop.f32.mrf.mxu1  ;;  %v5221_v51 = vpop.eup %5220  ;;  %5246 = vtanh.f32 %v3156_v62  ;;  %v3158_v16 = vadd.f32 %v3157_v15, %v7381_v57  ;;  %v3762_v18 = vpack.c.bf16 %v5219_v17, %v5211_v22  ;;  %v3279_v62 = vadd.f32 %v8022_v40, %v7239_v60 }
 0x326   :  { %v3351_v48 = vadd.f32 %v3350_v59, %v7381_v57  ;;  %v8208_v1 = vpop.eup %5222  ;;  %5248 = vtanh.f32 %v3349_v36  ;;  %v8212_v41 = vpop.f32.mrf.mxu0  ;;  %v3764_v28 = vpack.c.bf16 %v5221_v51, %v5213_v29  ;;  %v3763_v59 = vpack.c.bf16 %v5217_v52, %v5209_v39 }
 0x327   :  { %9416 = vst [vmem:[#allocation47_spill] sm:$0xff] %v8208_v1  ;;  %v8214_v23 = vpop.f32.mrf.mxu1  ;;  %v8216_v30 = vpop.eup %5224  ;;  %5250 = vtanh.f32 %v3158_v16  ;;  %3829 = vmatprep.subr.bf16.mxu0 %v3762_v18  ;;  %v3758_v57 = vpack.c.bf16 %v8192_v19, %v8180_v13  ;;  %v3760_v60 = vpack.c.bf16 %v8194_v45, %v8182_v63  ;;  %v3275_v52 = vadd.f32 %v8009_v38, %v7219_v11 }
 0x328   :  { %9417 = vst [vmem:[#allocation20_spill] sm:$0xff] %v8216_v30  ;;  %v8222_v22 = vpop.eup %5226  ;;  %5252 = vtanh.f32 %v3351_v48  ;;  %3870 = vmatprep.subr.bf16.mxu1 %v3764_v28  ;;  %v8226_v29 = vpop.f32.mrf.mxu0  ;;  %3830 = vmatpush1.bf16.msra.mxu0 %v3761_v4  ;;  %v3759_v11 = vpack.c.bf16 %v8188_v8, %v8176_v7  ;;  %v3754_v38 = vpack.c.bf16 %v8168_v33, %v8156_v42  ;;  %v9442_v7 = vld [vmem:[#allocation162_spill] sm:$0xff] }
 0x329   :  { %9418 = vst [vmem:[#allocation53_spill] sm:$0xff] %v8222_v22  ;;  %v8228_v26 = vpop.f32.mrf.mxu1  ;;  %v8232_v40 = vpop.eup %5228  ;;  %5254 = vtanh.f32 %v3285_v2  ;;  %3871 = vmatpush1.bf16.msra.mxu1 %v3763_v59  ;;  %3831 = vmatprep.subr.bf16.mxu0 %v3758_v57  ;;  %v3756_v56 = vpack.c.bf16 %v8170_v61, %v8158_v21  ;;  %v3753_v21 = vpack.c.bf16 %v8162_v44, %v8150_v3  ;;  %v9446_v61 = vld [vmem:[#allocation163_spill] sm:$0xff] }
 0x32a   :  { %9419 = vst [vmem:[#allocation46_spill] sm:$0xff] %v8232_v40  ;;  %v8236_v19 = vpop.eup %5230  ;;  %5256 = vtanh.f32 %v3086_v49  ;;  %3872 = vmatprep.subr.bf16.mxu1 %v3760_v60  ;;  %v8238_v13 = vpop.f32.mrf.mxu0  ;;  %v3755_v51 = vpack.c.bf16 %v8164_v50, %v8152_v54  ;;  %v3750_v16 = vpack.c.bf16 %v8144_v5, %v8132_v24  ;;  %v3752_v3 = vpack.c.bf16 %v8146_v31, %v8134_v27 }
 0x32b   :  { %9420 = vst [vmem:[#allocation176_spill] sm:$0xff] %v8236_v19  ;;  %v8240_v39 = vpop.f32.mrf.mxu1  ;;  %v8244_v63 = vpop.eup %5232  ;;  %5258 = vtanh.f32 %v3279_v62  ;;  %v3749_v24 = vpack.c.bf16 %v8138_v46, %v8125_v20  ;;  %v3751_v4 = vpack.c.bf16 %v8140_v58, %v8128_v25  ;;  %v3746_v27 = vpack.c.bf16 %v8116_v53, %v8094_v47 }
 0x32c   :  { %9421 = vst [vmem:[#allocation177_spill] sm:$0xff] %v8244_v63  ;;  %v8252_v9 = vpop.eup %5234  ;;  %5260 = vtanh.f32 %v3082_v0  ;;  %v8254_v36 = vpop.f32.mrf.mxu0  ;;  %3832 = vmatpush1.bf16.msra.mxu0 %v3757_v14  ;;  %v3748_v0 = vpack.c.bf16 %v8121_v12, %v8101_v35  ;;  %v3745_v60 = vpack.c.bf16 %v8107_v55, %v8090_v43  ;;  %v3742_v14 = vpack.c.bf16 %v8084_v37, %v8078_v32  ;;  %v9425_v55 = vld [vmem:[#allocation38_spill] sm:$0xff] }
 0x32d   :  { %9422 = vst [vmem:[#allocation178_spill] sm:$0xff] %v8252_v9  ;;  %v8256_v17 = vpop.f32.mrf.mxu1  ;;  %v8262_v6 = vpop.eup %5236  ;;  %5262 = vtanh.f32 %v3275_v52  ;;  %3873 = vmatpush1.bf16.msra.mxu1 %v3759_v11  ;;  %3833 = vmatprep.subr.bf16.mxu0 %v3754_v38  ;;  %v3357_v37 = vadd.f32 %v8228_v26, %v9425_v55  ;;  %v9432_v26 = vld [vmem:[#allocation171_spill] sm:$0xff] }
 0x32e   :  { %9423 = vst [vmem:[#allocation179_spill] sm:$0xff] %v8262_v6  ;;  %v8266_v42 = vpop.eup %5238  ;;  %3874 = vmatprep.subr.bf16.mxu1 %v3756_v56  ;;  %v8268_v8 = vpop.f32.mrf.mxu0 }
 0x32f   :  { %v8270_v2 = vpop.f32.mrf.mxu1  ;;  %v8276_v15 = vpop.eup %5240 }
 0x330   :  { %v8282_v48 = vpop.eup %5242  ;;  %v3173_v18 = vpop.f32.mrf.mxu0  ;;  %3834 = vmatpush1.bf16.msra.mxu0 %v3753_v21  ;;  %v9424_v21 = vld [vmem:[#allocation21_spill] sm:$0xff] }
 0x331   :  { %v8284_v49 = vpop.f32.mrf.mxu1  ;;  %v8288_v44 = vpop.eup %5244  ;;  %3875 = vmatpush1.bf16.msra.mxu1 %v3755_v51  ;;  %3835 = vmatprep.subr.bf16.mxu0 %v3750_v16  ;;  %v3744_v51 = vpack.c.bf16 %v9424_v21, %v8082_v34 }
 0x332   :  { %v8290_v28 = vpop.eup %5246  ;;  %3876 = vmatprep.subr.bf16.mxu1 %v3752_v3  ;;  %v8292_v54 = vpop.f32.mrf.mxu0  ;;  %v3164_v3 = vadd.f32 %v8226_v29, %v9425_v55  ;;  %v9427_v29 = vld [vmem:[#allocation174_spill] sm:$0xff] }
 0x333   :  { %v8294_v50 = vpop.f32.mrf.mxu1  ;;  %v8298_v5 = vpop.eup %5248 }
 0x334   :  { %v8306_v62 = vpop.eup %5250  ;;  %v3177_v59 = vpop.f32.mrf.mxu0  ;;  %3836 = vmatpush1.bf16.msra.mxu0 %v3749_v24  ;;  %5264 = vtanh.f32 %v3164_v3  ;;  %v9435_v3 = vld [vmem:[#allocation172_spill] sm:$0xff] }
 0x335   :  { %v3370_v57 = vpop.f32.mrf.mxu1  ;;  %v8312_v20 = vpop.eup %5252  ;;  %3877 = vmatpush1.bf16.msra.mxu1 %v3751_v4  ;;  %3837 = vmatprep.subr.bf16.mxu0 %v3746_v27  ;;  %v9426_v27 = vld [vmem:[#allocation11_spill] sm:$0xff]  ;;  %5266 = vtanh.f32 %v3357_v37  ;;  %v9441_v37 = vld [vmem:[#allocation166_spill] sm:$0xff] }
 0x336   :  { %v5255_v47 = vpop.eup %5254  ;;  %3878 = vmatprep.subr.bf16.mxu1 %v3748_v0  ;;  %v8316_v25 = vpop.f32.mrf.mxu0  ;;  %v3168_v34 = vadd.f32 %v8254_v36, %v9426_v27  ;;  %v9443_v45 = vpack.c.bf16 %v9441_v37, %v9442_v7 }
 0x337   :  { %v8318_v58 = vpop.f32.mrf.mxu1  ;;  %v5257_v12 = vpop.eup %5256  ;;  %v3747_v52 = vpack.c.bf16 %v8112_v10, %v5255_v47 }
 0x338   :  { %v5259_v11 = vpop.eup %5258  ;;  %v3183_v38 = vpop.f32.mrf.mxu0  ;;  %3838 = vmatpush1.bf16.msra.mxu0 %v3745_v60  ;;  %v3361_v60 = vadd.f32 %v8256_v17, %v9426_v27  ;;  %5268 = vtanh.f32 %v3168_v34  ;;  %v9445_v34 = vld [vmem:[#allocation167_spill] sm:$0xff] }
 0x339   :  { %v3376_v56 = vpop.f32.mrf.mxu1  ;;  %v5261_v16 = vpop.eup %5260  ;;  %3879 = vmatpush1.bf16.msra.mxu1 %v3747_v52  ;;  %3839 = vmatprep.subr.bf16.mxu0 %v3742_v14  ;;  %v9428_v52 = vld [vmem:[#allocation170_spill] sm:$0xff]  ;;  %v9447_v33 = vpack.c.bf16 %v9445_v34, %v9446_v61  ;;  %v9456_v34 = vld [vmem:[#allocation40_spill] sm:$0xff] }
 0x33a   :  { %v5263_v43 = vpop.eup %5262  ;;  %3880 = vmatprep.subr.bf16.mxu1 %v3744_v51  ;;  %v8331_v24 = vpop.f32.mrf.mxu0  ;;  %v3741_v32 = vpack.c.bf16 %v5257_v12, %v5261_v16  ;;  %v9429_v14 = vpack.c.bf16 %v9427_v29, %v9428_v52  ;;  %v9430_v12 = vld [vmem:[#allocation9_spill] sm:$0xff]  ;;  %v9431_v51 = vld [vmem:[#allocation175_spill] sm:$0xff]  ;;  %v9436_v52 = vld [vmem:[#allocation168_spill] sm:$0xff]  ;;  %5270 = vtanh.f32 %v3361_v60 }
 0x33b   :  { %v8333_v10 = vpop.f32.mrf.mxu1  ;;  %v3743_v4 = vpack.c.bf16 %v5259_v11, %v5263_v43  ;;  %v3174_v21 = vadd.f32 %v3173_v18, %v9430_v12  ;;  %v9433_v11 = vpack.c.bf16 %v9431_v51, %v9432_v26  ;;  %v3367_v17 = vadd.f32 %v8284_v49, %v9430_v12  ;;  %v9434_v43 = vld [vmem:[#allocation10_spill] sm:$0xff]  ;;  %v9438_v51 = vld [vmem:[#allocation173_spill] sm:$0xff] }
 0x33c   :  { %v3187_v0 = vpop.f32.mrf.mxu0  ;;  %3840 = vmatpush1.bf16.msra.mxu0 %v3741_v32  ;;  %v3178_v32 = vadd.f32 %v3177_v59, %v9434_v43  ;;  %v9437_v18 = vpack.c.bf16 %v9435_v3, %v9436_v52  ;;  %v9439_v26 = vld [vmem:[#allocation169_spill] sm:$0xff]  ;;  %v9448_v52 = vld [vmem:[#allocation22_spill] sm:$0xff] }
 0x33d   :  { %v3380_v47 = vpop.f32.mrf.mxu1  ;;  %3881 = vmatpush1.bf16.msra.mxu1 %v3743_v4  ;;  %3841 = vmatprep.subr.bf16.mxu0 %v9429_v14  ;;  %v3371_v14 = vadd.f32 %v3370_v57, %v9434_v43  ;;  %5272 = vtanh.f32 %v3174_v21  ;;  %v9444_v49 = vld [vmem:[#allocation33_spill] sm:$0xff]  ;;  %v9450_v21 = vld [vmem:[#allocation160_spill] sm:$0xff] }
 0x33e   :  { %3882 = vmatprep.subr.bf16.mxu1 %v9433_v11  ;;  %v8348_v16 = vpop.f32.mrf.mxu0  ;;  %v9440_v11 = vpack.c.bf16 %v9438_v51, %v9439_v26  ;;  %v3184_v59 = vadd.f32 %v3183_v38, %v9444_v49  ;;  %5274 = vtanh.f32 %v3367_v17  ;;  %v3377_v57 = vadd.f32 %v3376_v56, %v9444_v49  ;;  %v9453_v38 = vld [vmem:[#allocation161_spill] sm:$0xff]  ;;  %v9455_v17 = vld [vmem:[#allocation34_spill] sm:$0xff] }
 0x33f   :  { %v8350_v36 = vpop.f32.mrf.mxu1  ;;  %5276 = vtanh.f32 %v3178_v32  ;;  %v3381_v61 = vadd.f32 %v3380_v47, %v9448_v52 }
 0x340   :  { %v3193_v4 = vpop.f32.mrf.mxu0  ;;  %3842 = vmatpush1.bf16.msra.mxu0 %v9437_v18  ;;  %v3188_v18 = vadd.f32 %v3187_v0, %v9448_v52  ;;  %5278 = vtanh.f32 %v3371_v14 }
 0x341   :  { %v3386_v29 = vpop.f32.mrf.mxu1  ;;  %3883 = vmatpush1.bf16.msra.mxu1 %v9440_v11  ;;  %3843 = vmatprep.subr.bf16.mxu0 %v9443_v45  ;;  %v9449_v45 = vld [vmem:[#allocation164_spill] sm:$0xff]  ;;  %5280 = vtanh.f32 %v3184_v59  ;;  %v3194_v37 = vadd.f32 %v3193_v4, %v9455_v17 }
 0x342   :  { %3884 = vmatprep.subr.bf16.mxu1 %v9447_v33  ;;  %v8369_v3 = vpop.f32.mrf.mxu0  ;;  %v9451_v26 = vpack.c.bf16 %v9449_v45, %v9450_v21  ;;  %v9452_v33 = vld [vmem:[#allocation165_spill] sm:$0xff]  ;;  %5282 = vtanh.f32 %v3377_v57  ;;  %v3387_v0 = vadd.f32 %v3386_v29, %v9455_v17 }
 0x343   :  { %v8371_v60 = vpop.f32.mrf.mxu1  ;;  %v9454_v11 = vpack.c.bf16 %v9452_v33, %v9453_v38  ;;  %5284 = vtanh.f32 %v3188_v18  ;;  %v8391_v38 = vpop.eup %5264 }
 0x344   :  { %v3197_v51 = vpop.f32.mrf.mxu0  ;;  %3844 = vmatpush1.bf16.msra.mxu0 %v9451_v26  ;;  %5286 = vtanh.f32 %v3381_v61  ;;  %v9457_v26 = vld [vmem:[#allocation28_spill] sm:$0xff]  ;;  %v9458_v61 = vld [vmem:[#allocation25_spill] sm:$0xff] }
 0x345   :  { %v3390_v7 = vpop.f32.mrf.mxu1  ;;  %3885 = vmatpush1.bf16.msra.mxu1 %v9454_v11  ;;  %v3198_v45 = vadd.f32 %v3197_v51, %v9456_v34  ;;  %5288 = vtanh.f32 %v3194_v37  ;;  %v8394_v11 = vpop.eup %5266 }
 0x346   :  { %v8383_v56 = vpop.f32.mrf.mxu0  ;;  %v3391_v47 = vadd.f32 %v3390_v7, %v9456_v34  ;;  %5290 = vtanh.f32 %v3387_v0  ;;  %v8396_v51 = vpop.eup %5268 }
 0x347   :  { %v8385_v32 = vpop.f32.mrf.mxu1  ;;  %5292 = vtanh.f32 %v3198_v45 }
 0x348   :  { %v3203_v14 = vpop.f32.mrf.mxu0  ;;  %5294 = vtanh.f32 %v3391_v47 }
 0x349   :  { %v3396_v21 = vpop.f32.mrf.mxu1  ;;  %v3204_v59 = vadd.f32 %v3203_v14, %v9457_v26  ;;  %v8400_v14 = vpop.eup %5270 }
 0x34a   :  { %v3205_v33 = vpop.f32.mrf.mxu0  ;;  %v3397_v57 = vadd.f32 %v3396_v21, %v9457_v26  ;;  %v8402_v0 = vpop.eup %5272  ;;  %v9459_v21 = vld [vmem:[#allocation29_spill] sm:$0xff] }
 0x34b   :  { %v3398_v4 = vpop.f32.mrf.mxu1  ;;  %5296 = vtanh.f32 %v3204_v59  ;;  %v8405_v45 = vpop.eup %5274 }
 0x34c   :  { %v3207_v29 = vpop.f32.mrf.mxu0  ;;  %5298 = vtanh.f32 %v3397_v57  ;;  %v8407_v47 = vpop.eup %5276 }
 0x34d   :  { %v3400_v18 = vpop.f32.mrf.mxu1  ;;  %v3208_v7 = vadd.f32 %v3207_v29, %v9458_v61  ;;  %v8411_v59 = vpop.eup %5278 }
 0x34e   :  { %v3401_v37 = vadd.f32 %v3400_v18, %v9458_v61  ;;  %v3211_v46 = vpop.f32.mrf.mxu0  ;;  %v8413_v57 = vpop.eup %5280 }
 0x34f   :  { %v3404_v31 = vpop.f32.mrf.mxu1  ;;  %v3212_v35 = vadd.f32 %v3211_v46, %v9459_v21  ;;  %5300 = vtanh.f32 %v3208_v7  ;;  %v9460_v46 = vld [vmem:[#allocation24_spill] sm:$0xff]  ;;  %v8417_v40 = vpop.eup %5282 }
 0x350   :  { %v3213_v53 = vpop.f32.mrf.mxu0  ;;  %5302 = vtanh.f32 %v3401_v37 }
 0x351   :  { %v3406_v30 = vpop.f32.mrf.mxu1  ;;  %v3214_v29 = vadd.f32 %v3213_v53, %v9459_v21  ;;  %5304 = vtanh.f32 %v3212_v35  ;;  %v8419_v53 = vpop.eup %5284 }
 0x352   :  { %v3407_v18 = vadd.f32 %v3406_v30, %v9459_v21  ;;  %v3215_v63 = vpop.f32.mrf.mxu0  ;;  %v3405_v30 = vadd.f32 %v3404_v31, %v9459_v21  ;;  %v8424_v9 = vpop.eup %5286  ;;  %v3202_v31 = vadd.f32 %v8383_v56, %v9457_v26 }
 0x353   :  { %v3408_v1 = vpop.f32.mrf.mxu1  ;;  %5306 = vtanh.f32 %v3214_v29  ;;  %v3216_v19 = vadd.f32 %v3215_v63, %v9460_v46  ;;  %v3206_v63 = vadd.f32 %v3205_v33, %v9458_v61  ;;  %v3399_v29 = vadd.f32 %v3398_v4, %v9458_v61 }
 0x354   :  { %v3409_v7 = vadd.f32 %v3408_v1, %v9460_v46  ;;  %5308 = vtanh.f32 %v3407_v18  ;;  %v3217_v37 = vpop.f32.mrf.mxu0  ;;  %v8427_v1 = vpop.eup %5288  ;;  %v3196_v33 = vadd.f32 %v8369_v3, %v9456_v34  ;;  %v3389_v61 = vadd.f32 %v8371_v60, %v9456_v34 }
 0x355   :  { %v3410_v6 = vpop.f32.mrf.mxu1  ;;  %5310 = vtanh.f32 %v3216_v19  ;;  %v3218_v35 = vadd.f32 %v3217_v37, %v9460_v46  ;;  %v8430_v18 = vpop.eup %5290  ;;  %v3186_v3 = vadd.f32 %v8331_v24, %v9448_v52  ;;  %v3379_v60 = vadd.f32 %v8333_v10, %v9448_v52 }
 0x356   :  { %v3411_v22 = vadd.f32 %v3410_v6, %v9460_v46  ;;  %5312 = vtanh.f32 %v3409_v7  ;;  %v8434_v19 = vpop.eup %5292  ;;  %v3395_v6 = vadd.f32 %v8385_v32, %v9457_v26  ;;  %v3385_v32 = vadd.f32 %v8350_v36, %v9455_v17 }
 0x357   :  { %5314 = vtanh.f32 %v3218_v35  ;;  %v8438_v21 = vpop.eup %5294  ;;  %v3375_v36 = vadd.f32 %v8318_v58, %v9444_v49  ;;  %v3176_v24 = vadd.f32 %v8292_v54, %v9434_v43  ;;  %v3369_v10 = vadd.f32 %v8294_v50, %v9434_v43 }
 0x358   :  { %5316 = vtanh.f32 %v3411_v22  ;;  %v5297_v4 = vpop.eup %5296  ;;  %v3192_v22 = vadd.f32 %v8348_v16, %v9455_v17  ;;  %v3182_v16 = vadd.f32 %v8316_v25, %v9444_v49  ;;  %v3172_v25 = vadd.f32 %v8268_v8, %v9430_v12 }
 0x359   :  { %5318 = vtanh.f32 %v3405_v30  ;;  %v5299_v46 = vpop.eup %5298  ;;  %v3365_v58 = vadd.f32 %v8270_v2, %v9430_v12  ;;  %v3166_v54 = vadd.f32 %v8238_v13, %v9426_v27  ;;  %v3359_v43 = vadd.f32 %v8240_v39, %v9426_v27 }
 0x35a   :  { %5320 = vtanh.f32 %v3206_v63  ;;  %v3162_v2 = vadd.f32 %v8212_v41, %v9425_v55  ;;  %v3786_v41 = vpack.c.bf16 %v8434_v19, %v8427_v1  ;;  %v3784_v1 = vpack.c.bf16 %v8424_v9, %v8417_v40 }
 0x35b   :  { %5322 = vtanh.f32 %v3399_v29 }
 0x35c   :  { %5324 = vtanh.f32 %v3202_v31  ;;  %v5301_v56 = vpop.eup %5300 }
 0x35d   :  { %5326 = vtanh.f32 %v3395_v6  ;;  %v5303_v26 = vpop.eup %5302  ;;  %v3790_v6 = vpack.c.bf16 %v5301_v56, %v5297_v4 }
 0x35e   :  { %5328 = vtanh.f32 %v3196_v33  ;;  %v5305_v7 = vpop.eup %5304  ;;  %v3792_v12 = vpack.c.bf16 %v5303_v26, %v5299_v46  ;;  %v3788_v46 = vpack.c.bf16 %v8438_v21, %v8430_v18 }
 0x35f   :  { %5330 = vtanh.f32 %v3389_v61  ;;  %v3355_v61 = vadd.f32 %v8214_v23, %v9425_v55 }
 0x360   :  { %v5307_v34 = vpop.eup %5306  ;;  %5332 = vtanh.f32 %v3192_v22 }
 0x361   :  { %v5309_v37 = vpop.eup %5308  ;;  %5334 = vtanh.f32 %v3385_v32 }
 0x362   :  { %v5311_v17 = vpop.eup %5310  ;;  %5336 = vtanh.f32 %v3186_v3 }
 0x363   :  { %v5313_v30 = vpop.eup %5312  ;;  %5338 = vtanh.f32 %v3379_v60  ;;  %v3793_v31 = vpack.c.bf16 %v5311_v17, %v5305_v7  ;;  %v3782_v7 = vpack.c.bf16 %v8419_v53, %v8413_v57  ;;  %v3780_v57 = vpack.c.bf16 %v8411_v59, %v8405_v45 }
 0x364   :  { %v5315_v52 = vpop.eup %5314  ;;  %5340 = vtanh.f32 %v3182_v16  ;;  %v3776_v45 = vpack.c.bf16 %v8400_v14, %v8394_v11  ;;  %v9470_v14 = vld [vmem:[#allocation18_spill] sm:$0xff] }
 0x365   :  { %v5317_v35 = vpop.eup %5316  ;;  %5342 = vtanh.f32 %v3375_v36  ;;  %v3794_v49 = vpack.c.bf16 %v5315_v52, %v5307_v34 }
 0x366   :  { %v5319_v63 = vpop.eup %5318  ;;  %5344 = vtanh.f32 %v3176_v24  ;;  %v3796_v29 = vpack.c.bf16 %v5317_v35, %v5309_v37  ;;  %v3778_v37 = vpack.c.bf16 %v8407_v47, %v8402_v0  ;;  %v9461_v24 = vld [vmem:[#allocation26_spill] sm:$0xff]  ;;  %v9463_v47 = vld [vmem:[#allocation71_spill] sm:$0xff] }
 0x367   :  { %v5321_v50 = vpop.eup %5320  ;;  %5346 = vtanh.f32 %v3369_v10  ;;  %3845 = vmatprep.subr.bf16.mxu0 %v3794_v49  ;;  %v3795_v8 = vpack.c.bf16 %v5313_v30, %v5319_v63  ;;  %v9462_v30 = vld [vmem:[#allocation69_spill] sm:$0xff]  ;;  %v2541_v35 = vadd.f32 %v9463_v47, %v9461_v24  ;;  %v9465_v49 = vld [vmem:[#allocation63_spill] sm:$0xff] }
 0x368   :  { %v5323_v33 = vpop.eup %5322  ;;  %5348 = vtanh.f32 %v3172_v25  ;;  %3886 = vmatprep.subr.bf16.mxu1 %v3796_v29  ;;  %3846 = vmatpush2.bf16.msra.mxu0 %v3793_v31  ;;  %v2348_v10 = vadd.f32 %v9462_v30, %v9461_v24  ;;  %v3774_v25 = vpack.c.bf16 %v8396_v51, %v8391_v38  ;;  %v9466_v29 = vld [vmem:[#allocation65_spill] sm:$0xff]  ;;  %v9467_v51 = vld [vmem:[#allocation16_spill] sm:$0xff] }
 0x369   :  { %v5325_v13 = vpop.eup %5324  ;;  %5350 = vtanh.f32 %v3365_v58  ;;  %3887 = vmatpush2.bf16.msra.mxu1 %v3795_v8  ;;  %3847 = vmatprep.subr.bf16.mxu0 %v3790_v6  ;;  %v9464_v58 = vld [vmem:[#allocation37_spill] sm:$0xff]  ;;  %v9469_v6 = vld [vmem:[#allocation59_spill] sm:$0xff] }
 0x36a   :  { %v5327_v39 = vpop.eup %5326  ;;  %5352 = vtanh.f32 %v3166_v54  ;;  %3888 = vmatprep.subr.bf16.mxu1 %v3792_v12  ;;  %v3789_v27 = vpack.c.bf16 %v5321_v50, %v5325_v13  ;;  %v2344_v63 = vadd.f32 %v9465_v49, %v9464_v58  ;;  %v2537_v31 = vadd.f32 %v9466_v29, %v9464_v58  ;;  %v9468_v50 = vld [vmem:[#allocation57_spill] sm:$0xff]  ;;  %v9473_v13 = vld [vmem:[#allocation42_spill] sm:$0xff]  ;;  %v9511_v58 = vld [vmem:[#allocation80_spill] sm:$0xff] }
 0x36b   :  { %v5329_v4 = vpop.eup %5328  ;;  %5354 = vtanh.f32 %v3359_v43  ;;  %v3791_v22 = vpack.c.bf16 %v5323_v33, %v5327_v39  ;;  %v2338_v43 = vadd.f32 %v9468_v50, %v9467_v51  ;;  %v2531_v11 = vadd.f32 %v9469_v6, %v9467_v51  ;;  %v9471_v33 = vld [vmem:[#allocation44_spill] sm:$0xff]  ;;  %v9513_v29 = vld [vmem:[#allocation85_spill] sm:$0xff] }
 0x36c   :  { %v5331_v56 = vpop.eup %5330  ;;  %5356 = vtanh.f32 %v3162_v2  ;;  %3848 = vmatpush2.bf16.msra.mxu0 %v3789_v27  ;;  %v2334_v2 = vadd.f32 %v9471_v33, %v9470_v14  ;;  %v9472_v12 = vpack.c.bf16 %v8306_v62, %v8282_v48  ;;  %v9474_v39 = vpack.c.bf16 %v8312_v20, %v8288_v44  ;;  %v9475_v27 = vld [vmem:[#allocation15_spill] sm:$0xff]  ;;  %v9479_v62 = vld [vmem:[#allocation178_spill] sm:$0xff]  ;;  %v9517_v6 = vld [vmem:[#allocation76_spill] sm:$0xff] }
 0x36d   :  { %v5333_v23 = vpop.eup %5332  ;;  %5358 = vtanh.f32 %v3355_v61  ;;  %3889 = vmatpush2.bf16.msra.mxu1 %v3791_v22  ;;  %3849 = vmatprep.subr.bf16.mxu0 %v3786_v41  ;;  %v2527_v61 = vadd.f32 %v9473_v13, %v9470_v14  ;;  %v9477_v41 = vpack.c.bf16 %v8290_v28, %v8266_v42  ;;  %v9478_v48 = vpack.c.bf16 %v8298_v5, %v8276_v15  ;;  %v9482_v44 = vld [vmem:[#allocation179_spill] sm:$0xff]  ;;  %v9483_v20 = vld [vmem:[#allocation46_spill] sm:$0xff]  ;;  %v9488_v28 = vld [vmem:[#allocation177_spill] sm:$0xff] }
 0x36e   :  { %v5335_v55 = vpop.eup %5334  ;;  %3890 = vmatprep.subr.bf16.mxu1 %v3788_v46  ;;  %v3785_v32 = vpack.c.bf16 %v5329_v4, %v5333_v23  ;;  %5360 = vtanh.f32 %v2348_v10  ;;  %v9476_v4 = vld [vmem:[#allocation23_spill] sm:$0xff]  ;;  %v9484_v23 = vpack.c.bf16 %v9482_v44, %v9483_v20  ;;  %v9491_v15 = vld [vmem:[#allocation94_spill] sm:$0xff]  ;;  %v9532_v20 = vld [vmem:[#allocation64_spill] sm:$0xff] }
 0x36f   :  { %v5337_v26 = vpop.eup %5336  ;;  %v3787_v3 = vpack.c.bf16 %v5331_v56, %v5335_v55  ;;  %5362 = vtanh.f32 %v2541_v35  ;;  %v8512_v22 = vrot.slane %v9476_v4, %v9475_v27  ;;  %v9480_v56 = vld [vmem:[#allocation53_spill] sm:$0xff]  ;;  %v9492_v5 = vld [vmem:[#allocation90_spill] sm:$0xff]  ;;  %v9506_v10 = vld [vmem:[#allocation87_spill] sm:$0xff] }
 0x370   :  { %v5339_v60 = vpop.eup %5338  ;;  %3850 = vmatpush2.bf16.msra.mxu0 %v3785_v32  ;;  %5364 = vtanh.f32 %v2344_v63  ;;  %v9481_v46 = vpack.c.bf16 %v9479_v62, %v9480_v56  ;;  %v9485_v32 = vld [vmem:[#allocation176_spill] sm:$0xff]  ;;  %v9519_v33 = vld [vmem:[#allocation79_spill] sm:$0xff]  ;;  %v9522_v13 = vld [vmem:[#allocation74_spill] sm:$0xff] }
 0x371   :  { %v5341_v19 = vpop.eup %5340  ;;  %3891 = vmatpush2.bf16.msra.mxu1 %v3787_v3  ;;  %3851 = vmatprep.subr.bf16.mxu0 %v3782_v7  ;;  %5366 = vtanh.f32 %v2537_v31  ;;  %v3822_v55 = vshrl.u32 %v8512_v22, 16  ;;  %v9489_v3 = vld [vmem:[#allocation20_spill] sm:$0xff]  ;;  %v9514_v31 = vld [vmem:[#allocation81_spill] sm:$0xff]  ;;  %v9525_v4 = vld [vmem:[#allocation75_spill] sm:$0xff] }
 0x372   :  { %v5343_v18 = vpop.eup %5342  ;;  %3892 = vmatprep.subr.bf16.mxu1 %v3784_v1  ;;  %v3781_v21 = vpack.c.bf16 %v5337_v26, %v5341_v19  ;;  %5368 = vtanh.f32 %v2338_v43  ;;  %v9486_v26 = vld [vmem:[#allocation47_spill] sm:$0xff]  ;;  %v9490_v7 = vpack.c.bf16 %v9488_v28, %v9489_v3  ;;  %v9528_v62 = vld [vmem:[#allocation68_spill] sm:$0xff]  ;;  %v9529_v56 = vld [vmem:[#allocation62_spill] sm:$0xff] }
 0x373   :  { %v5345_v34 = vpop.eup %5344  ;;  %v3783_v16 = vpack.c.bf16 %v5339_v60, %v5343_v18  ;;  %5370 = vtanh.f32 %v2531_v11  ;;  %v9487_v42 = vpack.c.bf16 %v9485_v32, %v9486_v26  ;;  %v9493_v60 = vpack.c.bf16 %v9491_v15, %v9492_v5  ;;  %v9494_v1 = vld [vmem:[#allocation95_spill] sm:$0xff]  ;;  %v9531_v44 = vld [vmem:[#allocation70_spill] sm:$0xff]  ;;  %v9535_v32 = vld [vmem:[#allocation60_spill] sm:$0xff] }
 0x374   :  { %v5347_v36 = vpop.eup %5346  ;;  %3852 = vmatpush2.bf16.msra.mxu0 %v3781_v21  ;;  %5372 = vtanh.f32 %v2334_v2  ;;  %v9495_v19 = vld [vmem:[#allocation91_spill] sm:$0xff]  ;;  %v9520_v2 = vld [vmem:[#allocation77_spill] sm:$0xff] }
 0x375   :  { %v5349_v53 = vpop.eup %5348  ;;  %3893 = vmatpush2.bf16.msra.mxu1 %v3783_v16  ;;  %3853 = vmatprep.subr.bf16.mxu0 %v3778_v37  ;;  %5374 = vtanh.f32 %v2527_v61  ;;  %v9496_v18 = vpack.c.bf16 %v9494_v1, %v9495_v19  ;;  %v9498_v16 = vld [vmem:[#allocation88_spill] sm:$0xff]  ;;  %v9538_v28 = vld [vmem:[#allocation61_spill] sm:$0xff]  ;;  %v9541_v15 = vld [vmem:[#allocation43_spill] sm:$0xff] }
 0x376   :  { %v5351_v40 = vpop.eup %5350  ;;  %3894 = vmatprep.subr.bf16.mxu1 %v3780_v57  ;;  %v3777_v9 = vpack.c.bf16 %v5345_v34, %v5349_v53  ;;  %v9497_v34 = vld [vmem:[#allocation92_spill] sm:$0xff]  ;;  %v9500_v57 = vld [vmem:[#allocation93_spill] sm:$0xff]  ;;  %v9544_v1 = vld [vmem:[#allocation54_spill] sm:$0xff] }
 0x377   :  { %v5353_v17 = vpop.eup %5352  ;;  %v3779_v52 = vpack.c.bf16 %v5347_v36, %v5351_v40  ;;  %v9499_v37 = vpack.c.bf16 %v9497_v34, %v9498_v16  ;;  %v9501_v53 = vld [vmem:[#allocation89_spill] sm:$0xff]  ;;  %v9523_v61 = vld [vmem:[#allocation72_spill] sm:$0xff]  ;;  %v9549_v16 = vld [vmem:[#allocation55_spill] sm:$0xff] }
 0x378   :  { %v5355_v0 = vpop.eup %5354  ;;  %3854 = vmatpush2.bf16.msra.mxu0 %v3777_v9  ;;  %v9502_v40 = vpack.c.bf16 %v9500_v57, %v9501_v53  ;;  %v9503_v9 = vld [vmem:[#allocation86_spill] sm:$0xff]  ;;  %v9552_v57 = vld [vmem:[#allocation31_spill] sm:$0xff] }
 0x379   :  { %v5357_v59 = vpop.eup %5356  ;;  %3895 = vmatpush2.bf16.msra.mxu1 %v3779_v52  ;;  %3855 = vmatprep.subr.bf16.mxu0 %v3774_v25  ;;  %v9507_v52 = vld [vmem:[#allocation83_spill] sm:$0xff] }
 0x37a   :  { %v5359_v54 = vpop.eup %5358  ;;  %3896 = vmatprep.subr.bf16.mxu1 %v3776_v45  ;;  %v3773_v38 = vpack.c.bf16 %v5353_v17, %v5357_v59  ;;  %v9504_v17 = vld [vmem:[#allocation82_spill] sm:$0xff]  ;;  %v9508_v25 = vpack.c.bf16 %v9506_v10, %v9507_v52  ;;  %v9510_v59 = vld [vmem:[#allocation84_spill] sm:$0xff]  ;;  %v9553_v53 = vld [vmem:[#allocation27_spill] sm:$0xff] }
 0x37b   :  { %v3775_v8 = vpack.c.bf16 %v5355_v0, %v5359_v54  ;;  %v5361_v21 = vpop.eup %5360  ;;  %v9505_v24 = vpack.c.bf16 %v9503_v9, %v9504_v17  ;;  %v9509_v0 = vld [vmem:[#allocation14_spill] sm:$0xff]  ;;  %v9512_v49 = vpack.c.bf16 %v9510_v59, %v9511_v58  ;;  %v9556_v17 = vld [vmem:[#allocation51_spill] sm:$0xff]  ;;  %v9559_v10 = vld [vmem:[#allocation49_spill] sm:$0xff] }
 0x37c   :  { %3856 = vmatpush2.bf16.msra.mxu0 %v3773_v38  ;;  %v5363_v36 = vpop.eup %5362  ;;  %v9515_v38 = vpack.c.bf16 %v9513_v29, %v9514_v31  ;;  %v9555_v9 = vld [vmem:[#allocation30_spill] sm:$0xff]  ;;  %v9567_v58 = vld [vmem:[#allocation13_spill] sm:$0xff]  ;;  %v9571_v29 = vld [vmem:[#allocation12_spill] sm:$0xff] }
 0x37d   :  { %3897 = vmatpush2.bf16.msra.mxu1 %v3775_v8  ;;  %3857 = vmatprep.subr.bf16.mxu0 %v9472_v12  ;;  %v5365_v30 = vpop.eup %5364  ;;  %v9516_v8 = vld [vmem:[#allocation78_spill] sm:$0xff]  ;;  %v9521_v12 = vpack.c.bf16 %v9519_v33, %v9520_v2  ;;  %v9582_v2 = vld [vmem:[#allocation156_spill] sm:$0xff] }
 0x37e   :  { %3898 = vmatprep.subr.bf16.mxu1 %v9474_v39  ;;  %v5367_v47 = vpop.eup %5366  ;;  %v3562_v35 = vpack.c.bf16 %v5361_v21, %v5365_v30  ;;  %v9518_v11 = vpack.c.bf16 %v9516_v8, %v9517_v6  ;;  %v9524_v39 = vpack.c.bf16 %v9522_v13, %v9523_v61  ;;  %v9547_v21 = vld [vmem:[#allocation45_spill] sm:$0xff]  ;;  %v9558_v30 = vld [vmem:[#allocation48_spill] sm:$0xff]  ;;  %v9577_v8 = vld [vmem:[#allocation154_spill] sm:$0xff] }
 0x37f   :  { %v5369_v45 = vpop.eup %5368  ;;  %v3564_v63 = vpack.c.bf16 %v5363_v36, %v5367_v47  ;;  %v9560_v52 = vpack.c.bf16 %v9558_v30, %v9559_v10  ;;  %v9585_v61 = vld [vmem:[#allocation157_spill] sm:$0xff] }
 0x380   :  { %3858 = vmatpush2.bf16.msra.mxu0 %v9477_v41  ;;  %v5371_v54 = vpop.eup %5370  ;;  %v9526_v41 = vld [vmem:[#allocation73_spill] sm:$0xff] }
 0x381   :  { %3899 = vmatpush2.bf16.msra.mxu1 %v9478_v48  ;;  %3859 = vmatprep.subr.bf16.mxu0 %v9481_v46  ;;  %v5373_v51 = vpop.eup %5372  ;;  %v9527_v48 = vpack.c.bf16 %v9525_v4, %v9526_v41  ;;  %v9530_v46 = vpack.c.bf16 %v9528_v62, %v9529_v56  ;;  %v9588_v41 = vld [vmem:[#allocation150_spill] sm:$0xff]  ;;  %v9591_v56 = vld [vmem:[#allocation151_spill] sm:$0xff]  ;;  %v9621_v10 = vld [vmem:[#allocation133_spill] sm:$0xff] }
 0x382   :  { %3900 = vmatprep.subr.bf16.mxu1 %v9484_v23  ;;  %v5375_v50 = vpop.eup %5374  ;;  %v3558_v43 = vpack.c.bf16 %v5369_v45, %v5373_v51  ;;  %v9533_v23 = vpack.c.bf16 %v9531_v44, %v9532_v20  ;;  %v9565_v45 = vld [vmem:[#allocation41_spill] sm:$0xff]  ;;  %v9594_v20 = vld [vmem:[#allocation148_spill] sm:$0xff] }
 0x383   :  { %v3560_v14 = vpack.c.bf16 %v5371_v54, %v5375_v50  ;;  %v9570_v54 = vld [vmem:[#allocation8_spill] sm:$0xff]  ;;  %v9574_v51 = vld [vmem:[#allocation17_spill] sm:$0xff] }
 0x384   :  { %3860 = vmatpush2.bf16.msra.mxu0 %v9487_v42  ;;  %v9537_v42 = vld [vmem:[#allocation67_spill] sm:$0xff]  ;;  %v9572_v31 = vpack.c.bf16 %v9570_v54, %v9571_v29  ;;  %v9633_v29 = vld [vmem:[#allocation125_spill] sm:$0xff] }
 0x385   :  { %3901 = vmatpush2.bf16.msra.mxu1 %v9490_v7  ;;  %3913 = vmatprep.subr.bf16.mxu0 %v9493_v60  ;;  %v9539_v3 = vpack.c.bf16 %v9537_v42, %v9538_v28  ;;  %v9540_v7 = vld [vmem:[#allocation56_spill] sm:$0xff]  ;;  %v9543_v60 = vld [vmem:[#allocation58_spill] sm:$0xff] }
 0x386   :  { %3954 = vmatprep.subr.bf16.mxu1 %v9496_v18  ;;  %v9542_v5 = vpack.c.bf16 %v9540_v7, %v9541_v15  ;;  %v9545_v19 = vpack.c.bf16 %v9543_v60, %v9544_v1  ;;  %v9546_v18 = vld [vmem:[#allocation32_spill] sm:$0xff]  ;;  %v9600_v28 = vld [vmem:[#allocation142_spill] sm:$0xff]  ;;  %v9603_v15 = vld [vmem:[#allocation143_spill] sm:$0xff] }
 0x387   :  { %3862 = vmatmul.mubr.bf16.vlgmr.msra.gmra.mxu0 %v3822_v55  ;;  %v9548_v34 = vpack.c.bf16 %v9546_v18, %v9547_v21  ;;  %v9606_v1 = vld [vmem:[#allocation140_spill] sm:$0xff]  ;;  %v9609_v21 = vld [vmem:[#allocation141_spill] sm:$0xff] }
 0x388   :  { %3903 = vmatmul.mubr.bf16.vlgmr.msra.gmra.mxu1 %v3822_v55  ;;  %3914 = vmatpush1.bf16.msra.mxu0 %v9499_v37  ;;  %v9534_v55 = vld [vmem:[#allocation66_spill] sm:$0xff] }
 0x389   :  { %3955 = vmatpush1.bf16.msra.mxu1 %v9502_v40  ;;  %3915 = vmatprep.subr.bf16.mxu0 %v9505_v24  ;;  %v9536_v26 = vpack.c.bf16 %v9534_v55, %v9535_v32  ;;  %v9550_v37 = vld [vmem:[#allocation50_spill] sm:$0xff]  ;;  %v9554_v40 = vpack.c.bf16 %v9552_v57, %v9553_v53  ;;  %v9557_v24 = vpack.c.bf16 %v9555_v9, %v9556_v17  ;;  %v9597_v32 = vld [vmem:[#allocation149_spill] sm:$0xff]  ;;  %v9615_v53 = vld [vmem:[#allocation135_spill] sm:$0xff] }
 0x38a   :  { %3956 = vmatprep.subr.bf16.mxu1 %v9508_v25  ;;  %3945 = vmatprep.mubr.bf16.mxu0 %v9509_v0  ;;  %v9551_v36 = vpack.c.bf16 %v9549_v16, %v9550_v37  ;;  %v9561_v25 = vld [vmem:[#allocation35_spill] sm:$0xff]  ;;  %v9612_v37 = vld [vmem:[#allocation134_spill] sm:$0xff]  ;;  %v9618_v17 = vld [vmem:[#allocation132_spill] sm:$0xff] }
 0x38b   :  { %3986 = vmatprep.mubr.bf16.mxu1 %v9509_v0  ;;  %v9562_v0 = vld [vmem:[#allocation52_spill] sm:$0xff] }
 0x38c   :  { %3916 = vmatpush1.bf16.msra.mxu0 %v9512_v49  ;;  %v9563_v47 = vpack.c.bf16 %v9561_v25, %v9562_v0  ;;  %v9568_v49 = vld [vmem:[#allocation36_spill] sm:$0xff]  ;;  %v9624_v0 = vld [vmem:[#allocation126_spill] sm:$0xff] }
 0x38d   :  { %3957 = vmatpush1.bf16.msra.mxu1 %v9515_v38  ;;  %3917 = vmatprep.subr.bf16.mxu0 %v3562_v35  ;;  %v9564_v35 = vld [vmem:[#allocation19_spill] sm:$0xff] }
 0x38e   :  { %3958 = vmatprep.subr.bf16.mxu1 %v3564_v63  ;;  %v9566_v59 = vpack.c.bf16 %v9564_v35, %v9565_v45  ;;  %v9569_v63 = vpack.c.bf16 %v9567_v58, %v9568_v49  ;;  %v9573_v38 = vld [vmem:[#allocation39_spill] sm:$0xff]  ;;  %v9630_v49 = vld [vmem:[#allocation124_spill] sm:$0xff] }
 0x38f   :  { %v9575_v50 = vpack.c.bf16 %v9573_v38, %v9574_v51  ;;  %v9627_v45 = vld [vmem:[#allocation127_spill] sm:$0xff]  ;;  %v9636_v51 = vld [vmem:[#allocation118_spill] sm:$0xff] }
 0x390   :  { %3918 = vmatpush1.bf16.msra.mxu0 %v9518_v11  ;;  %v9579_v11 = vld [vmem:[#allocation159_spill] sm:$0xff] }
 0x391   :  { %3959 = vmatpush1.bf16.msra.mxu1 %v9521_v12  ;;  %3919 = vmatprep.subr.bf16.mxu0 %v3558_v43  ;;  %v9576_v43 = vld [vmem:[#allocation158_spill] sm:$0xff]  ;;  %v9583_v12 = vld [vmem:[#allocation152_spill] sm:$0xff] }
 0x392   :  { %3960 = vmatprep.subr.bf16.mxu1 %v3560_v14  ;;  %v9578_v6 = vpack.c.bf16 %v9576_v43, %v9577_v8  ;;  %v9580_v14 = vld [vmem:[#allocation155_spill] sm:$0xff]  ;;  %v9584_v13 = vpack.c.bf16 %v9582_v2, %v9583_v12  ;;  %v9645_v12 = vld [vmem:[#allocation117_spill] sm:$0xff] }
 0x393   :  { %v9581_v33 = vpack.c.bf16 %v9579_v11, %v9580_v14  ;;  %v9639_v8 = vld [vmem:[#allocation119_spill] sm:$0xff]  ;;  %v9642_v14 = vld [vmem:[#allocation116_spill] sm:$0xff] }
 0x394   :  { %3920 = vmatpush1.bf16.msra.mxu0 %v9524_v39  ;;  %v9586_v39 = vld [vmem:[#allocation153_spill] sm:$0xff] }
 0x395   :  { %3961 = vmatpush1.bf16.msra.mxu1 %v9527_v48  ;;  %3921 = vmatprep.subr.bf16.mxu0 %v9530_v46  ;;  %v9587_v4 = vpack.c.bf16 %v9585_v61, %v9586_v39  ;;  %v9589_v48 = vld [vmem:[#allocation146_spill] sm:$0xff]  ;;  %v9592_v46 = vld [vmem:[#allocation147_spill] sm:$0xff] }
 0x396   :  { %3962 = vmatprep.subr.bf16.mxu1 %v9533_v23  ;;  %v9590_v62 = vpack.c.bf16 %v9588_v41, %v9589_v48  ;;  %v9593_v44 = vpack.c.bf16 %v9591_v56, %v9592_v46  ;;  %v9595_v23 = vld [vmem:[#allocation144_spill] sm:$0xff]  ;;  %v9648_v39 = vld [vmem:[#allocation110_spill] sm:$0xff]  ;;  %v9651_v48 = vld [vmem:[#allocation111_spill] sm:$0xff] }
 0x397   :  { %v9596_v55 = vpack.c.bf16 %v9594_v20, %v9595_v23  ;;  %v9654_v46 = vld [vmem:[#allocation108_spill] sm:$0xff]  ;;  %v9657_v23 = vld [vmem:[#allocation109_spill] sm:$0xff] }
 0x398   :  { %3922 = vmatpush1.bf16.msra.mxu0 %v9536_v26  ;;  %v9598_v26 = vld [vmem:[#allocation145_spill] sm:$0xff] }
 0x399   :  { %3963 = vmatpush1.bf16.msra.mxu1 %v9539_v3  ;;  %3923 = vmatprep.subr.bf16.mxu0 %v9542_v5  ;;  %v9599_v42 = vpack.c.bf16 %v9597_v32, %v9598_v26  ;;  %v9601_v3 = vld [vmem:[#allocation138_spill] sm:$0xff]  ;;  %v9604_v5 = vld [vmem:[#allocation139_spill] sm:$0xff] }
 0x39a   :  { %3964 = vmatprep.subr.bf16.mxu1 %v9545_v19  ;;  %v9602_v7 = vpack.c.bf16 %v9600_v28, %v9601_v3  ;;  %v9605_v60 = vpack.c.bf16 %v9603_v15, %v9604_v5  ;;  %v9607_v19 = vld [vmem:[#allocation136_spill] sm:$0xff]  ;;  %v9660_v26 = vld [vmem:[#allocation102_spill] sm:$0xff]  ;;  %v9663_v3 = vld [vmem:[#allocation103_spill] sm:$0xff] }
 0x39b   :  { %v9608_v18 = vpack.c.bf16 %v9606_v1, %v9607_v19  ;;  %v9666_v5 = vld [vmem:[#allocation100_spill] sm:$0xff]  ;;  %v9669_v19 = vld [vmem:[#allocation101_spill] sm:$0xff] }
 0x39c   :  { %3924 = vmatpush1.bf16.msra.mxu0 %v9548_v34  ;;  %v9610_v34 = vld [vmem:[#allocation137_spill] sm:$0xff] }
 0x39d   :  { %3965 = vmatpush1.bf16.msra.mxu1 %v9551_v36  ;;  %3925 = vmatprep.subr.bf16.mxu0 %v9554_v40  ;;  %v9611_v16 = vpack.c.bf16 %v9609_v21, %v9610_v34  ;;  %v9613_v36 = vld [vmem:[#allocation130_spill] sm:$0xff]  ;;  %v9616_v40 = vld [vmem:[#allocation131_spill] sm:$0xff] }
 0x39e   :  { %3966 = vmatprep.subr.bf16.mxu1 %v9557_v24  ;;  %v9614_v57 = vpack.c.bf16 %v9612_v37, %v9613_v36  ;;  %v9617_v9 = vpack.c.bf16 %v9615_v53, %v9616_v40  ;;  %v9619_v24 = vld [vmem:[#allocation128_spill] sm:$0xff] }
 0x39f   :  { %v9620_v30 = vpack.c.bf16 %v9618_v17, %v9619_v24  ;;  %v9672_v17 = vld [vmem:[#allocation3_spill] sm:$0xff] }
 0x3a0   :  { %3926 = vmatpush1.bf16.msra.mxu0 %v9560_v52  ;;  %v9622_v52 = vld [vmem:[#allocation129_spill] sm:$0xff]  ;;  %v4003_v24 = vsub.s32 0, %v9672_v17 }
 0x3a1   :  { %3967 = vmatpush1.bf16.msra.mxu1 %v9563_v47  ;;  %3927 = vmatprep.subr.bf16.mxu0 %v9566_v59  ;;  %v9623_v25 = vpack.c.bf16 %v9621_v10, %v9622_v52  ;;  %v9625_v47 = vld [vmem:[#allocation122_spill] sm:$0xff]  ;;  %v9628_v59 = vld [vmem:[#allocation123_spill] sm:$0xff] }
 0x3a2   :  { %3968 = vmatprep.subr.bf16.mxu1 %v9569_v63  ;;  %v9626_v35 = vpack.c.bf16 %v9624_v0, %v9625_v47  ;;  %v9629_v58 = vpack.c.bf16 %v9627_v45, %v9628_v59  ;;  %v9631_v63 = vld [vmem:[#allocation120_spill] sm:$0xff] }
 0x3a3   :  { %v9632_v54 = vpack.c.bf16 %v9630_v49, %v9631_v63 }
 0x3a4   :  { %3928 = vmatpush1.bf16.msra.mxu0 %v9572_v31  ;;  %v9634_v31 = vld [vmem:[#allocation121_spill] sm:$0xff] }
 0x3a5   :  { %3969 = vmatpush1.bf16.msra.mxu1 %v9575_v50  ;;  %3929 = vmatprep.subr.bf16.mxu0 %v9578_v6  ;;  %v9635_v38 = vpack.c.bf16 %v9633_v29, %v9634_v31  ;;  %v9637_v50 = vld [vmem:[#allocation114_spill] sm:$0xff]  ;;  %v9640_v6 = vld [vmem:[#allocation115_spill] sm:$0xff] }
 0x3a6   :  { %3970 = vmatprep.subr.bf16.mxu1 %v9581_v33  ;;  %v9638_v43 = vpack.c.bf16 %v9636_v51, %v9637_v50  ;;  %v9641_v11 = vpack.c.bf16 %v9639_v8, %v9640_v6  ;;  %v9643_v33 = vld [vmem:[#allocation112_spill] sm:$0xff]  ;;  %v9674_v51 = vld [vmem:[#allocation7_spill] sm:$0xff] }
 0x3a7   :  { %v9644_v2 = vpack.c.bf16 %v9642_v14, %v9643_v33  ;;  %v9675_v6 = vld [vmem:[#allocation4_spill] sm:$0xff]  ;;  %v9676_v33 = vld [vmem:[#allocation5_spill] sm:$0xff] }
 0x3a8   :  { %3930 = vmatpush2.bf16.msra.mxu0 %v9584_v13  ;;  %v9646_v13 = vld [vmem:[#allocation113_spill] sm:$0xff] }
 0x3a9   :  { %3971 = vmatpush2.bf16.msra.mxu1 %v9587_v4  ;;  %3931 = vmatprep.subr.bf16.mxu0 %v9590_v62  ;;  %v9647_v61 = vpack.c.bf16 %v9645_v12, %v9646_v13  ;;  %v9649_v4 = vld [vmem:[#allocation106_spill] sm:$0xff]  ;;  %v9652_v62 = vld [vmem:[#allocation107_spill] sm:$0xff] }
 0x3aa   :  { %3972 = vmatprep.subr.bf16.mxu1 %v9593_v44  ;;  %v9650_v41 = vpack.c.bf16 %v9648_v39, %v9649_v4  ;;  %v9653_v56 = vpack.c.bf16 %v9651_v48, %v9652_v62  ;;  %v9655_v44 = vld [vmem:[#allocation104_spill] sm:$0xff] }
 0x3ab   :  { %v9656_v20 = vpack.c.bf16 %v9654_v46, %v9655_v44  ;;  %v9677_v46 = vlaneseq }
 0x3ac   :  { %3932 = vmatpush2.bf16.msra.mxu0 %v9596_v55  ;;  %v9658_v55 = vld [vmem:[#allocation105_spill] sm:$0xff] }
 0x3ad   :  { %3973 = vmatpush2.bf16.msra.mxu1 %v9599_v42  ;;  %3933 = vmatprep.subr.bf16.mxu0 %v9602_v7  ;;  %v9659_v32 = vpack.c.bf16 %v9657_v23, %v9658_v55  ;;  %v9661_v42 = vld [vmem:[#allocation98_spill] sm:$0xff]  ;;  %v9664_v7 = vld [vmem:[#allocation99_spill] sm:$0xff]  ;;  %vm4048_vm9 = vcmp.lt.s32.totalorder %v9677_v46, 512 }
 0x3ae   :  { %3974 = vmatprep.subr.bf16.mxu1 %v9605_v60  ;;  %v9662_v28 = vpack.c.bf16 %v9660_v26, %v9661_v42  ;;  %v9665_v15 = vpack.c.bf16 %v9663_v3, %v9664_v7  ;;  %v9667_v60 = vld [vmem:[#allocation96_spill] sm:$0xff] }
 0x3af   :  { %v9668_v1 = vpack.c.bf16 %v9666_v5, %v9667_v60 }
 0x3b0   :  { %3934 = vmatpush2.bf16.msra.mxu0 %v9608_v18  ;;  %v9670_v18 = vld [vmem:[#allocation97_spill] sm:$0xff] }
 0x3b1   :  { %3975 = vmatpush2.bf16.msra.mxu1 %v9611_v16  ;;  %3935 = vmatprep.subr.bf16.mxu0 %v9614_v57  ;;  %v9671_v21 = vpack.c.bf16 %v9669_v19, %v9670_v18 }
 0x3b2   :  { %3976 = vmatprep.subr.bf16.mxu1 %v9617_v9 }
 0x3b4   :  { %3936 = vmatpush2.bf16.msra.mxu0 %v9620_v30  ;;  %v3999_v30 = vpop.permute.xlu0 %3998 }
 0x3b5   :  { %3977 = vmatpush2.bf16.msra.mxu1 %v9623_v25  ;;  %3937 = vmatprep.subr.bf16.mxu0 %v9626_v35  ;;  %v4004_v52 = vrot.slane %v3999_v30, %v4003_v24 }
 0x3b6   :  { %3978 = vmatprep.subr.bf16.mxu1 %v9629_v58 }
 0x3b8   :  { %3938 = vmatpush2.bf16.msra.mxu0 %v9632_v54  ;;  %v9673_v54 = vld [vmem:[#allocation6_spill] sm:$0xff] }
 0x3b9   :  { %3979 = vmatpush2.bf16.msra.mxu1 %v9635_v38  ;;  %3939 = vmatprep.subr.bf16.mxu0 %v9638_v43 }
 0x3ba   :  { %3980 = vmatprep.subr.bf16.mxu1 %v9641_v11 }
 0x3bc   :  { %3940 = vmatpush2.bf16.msra.mxu0 %v9644_v2 }
 0x3bd   :  { %3981 = vmatpush2.bf16.msra.mxu1 %v9647_v61  ;;  %3941 = vmatprep.subr.bf16.mxu0 %v9650_v41 }
 0x3be   :  { %3982 = vmatprep.subr.bf16.mxu1 %v9653_v56 }
 0x3c0   :  { %3942 = vmatpush2.bf16.msra.mxu0 %v9656_v20 }
 0x3c1   :  { %3983 = vmatpush2.bf16.msra.mxu1 %v9659_v32  ;;  %3943 = vmatprep.subr.bf16.mxu0 %v9662_v28 }
 0x3c2   :  { %3984 = vmatprep.subr.bf16.mxu1 %v9665_v15 }
 0x3c4   :  { %3944 = vmatpush2.bf16.msra.mxu0 %v9668_v1 }
 0x3c5   :  { %3985 = vmatpush2.bf16.msra.mxu1 %v9671_v21 }
 0x3c7   :  { %3946 = vmatmul.mubr.bf16.vlgmr.msra.gmra.mxu0 %v8512_v22 }
 0x3c8   :  { %3987 = vmatmul.mubr.bf16.vlgmr.msra.gmra.mxu1 %v8512_v22 }
 0x447   :  { %v3863_v34 = vpop.f32.mrf.mxu0 }
 0x448   :  { %v3904_v16 = vpop.f32.mrf.mxu1 }
 0x449   :  { %v3865_v37 = vpop.f32.mrf.mxu0 }
 0x44a   :  { %v3906_v36 = vpop.f32.mrf.mxu1 }
 0x44b   :  { %v3867_v57 = vpop.f32.mrf.mxu0 }
 0x44c   :  { %v3908_v53 = vpop.f32.mrf.mxu1 }
 0x44d   :  { %v3868_v40 = vpop.f32.mrf.mxu0 }
 0x44e   :  { %v3909_v9 = vpop.f32.mrf.mxu1 }
 0x487   :  { %v3947_v10 = vpop.f32.mrf.mxu0 }
 0x488   :  { %v3948_v25 = vadd.f32 %v3947_v10, %v3863_v34  ;;  %v3988_v0 = vpop.f32.mrf.mxu1 }
 0x489   :  { %v3989_v47 = vadd.f32 %v3988_v0, %v3904_v16  ;;  %v3949_v35 = vpop.f32.mrf.mxu0 }
 0x48a   :  { %v4005_v45 = vadd.f32 %v4004_v52, %v3948_v25  ;;  %v3950_v59 = vadd.f32 %v3949_v35, %v3865_v37  ;;  %v3990_v22 = vpop.f32.mrf.mxu1 }
 0x48b   :  { %v4007_v58 = vadd.f32 %v4004_v52, %v3989_v47  ;;  %v3991_v49 = vadd.f32 %v3990_v22, %v3906_v36  ;;  %v3951_v63 = vpop.f32.mrf.mxu0 }
 0x48c   :  { %v4009_v29 = vadd.f32 %v4005_v45, %v9673_v54  ;;  %v4006_v31 = vadd.f32 %v4004_v52, %v3950_v59  ;;  %v3992_v38 = vpop.f32.mrf.mxu1 }
 0x48d   :  { %v4011_v50 = vadd.f32 %v4007_v58, %v9674_v51  ;;  %v4008_v43 = vadd.f32 %v4004_v52, %v3991_v49  ;;  %v3952_v8 = vpop.f32.mrf.mxu0 }
 0x48e   :  { %v4010_v11 = vadd.f32 %v4006_v31, %v9675_v6  ;;  %v3993_v14 = vpop.f32.mrf.mxu1  ;;  %v4013_v12 = vmax.f32 %v4009_v29, 800.0 }
 0x48f   :  { %v4012_v2 = vadd.f32 %v4008_v43, %v9676_v33  ;;  %v4015_v61 = vmax.f32 %v4011_v50, 800.0 }
 0x490   :  { %v4014_v13 = vmax.f32 %v4010_v11, 800.0 }
 0x491   :  { %v4016_v39 = vmax.f32 %v4012_v2, 800.0 }
 0x492   :  { %v4021_v4 = vcombine.low %v4013_v12, %v4014_v13 }
 0x493   :  { %v4022_v41 = vcombine.low %v4015_v61, %v4016_v39 }
 0x494   :  { %v4029_v48 = vrot.slane %v4021_v4, %v9475_v27 }
 0x495   :  { %v4036_v62 = vrot.slane %v4022_v41, %v9475_v27 }
 0x497   :  { %v4037_v56 = vcombine.low %v4029_v48, %v4036_v62 }
 0x499   :  { %v4044_v44 = vrot.slane %v4037_v56, %v9475_v27 }
 0x49b   :  { %4050 = vst.msk [vmem:[%s8738_s9] sm:$0xf] %vm4048_vm9, %v4044_v44 }

</bundles_post_ra>
